<compile_context>
chip_gen: v7x
topology: tpu7x:2x2x1
jax: 0.10.0
libtpu: 0.0.40
codegen_flags: <defaults>
</compile_context>

<pallas_src>
import functools

import numpy as np
import jax
import jax.numpy as jnp
from jax.experimental import pallas as pl
from jax.experimental.pallas import tpu as pltpu


def _round_up(x, m):
    return (x + m - 1) // m * m


# ----------------------------- Pallas kernel ------------------------------- #

def bigru_kernel(len_ref, gif_ref, gib_ref, bhn_ref, whh_hbm,
                 outf_ref, outb_ref,
                 hf_ref, hb_ref, whh_ref, whh_sem, *, tt, hid_p, unroll):
    """Fused bidirectional GRU recurrence over one block of TT time steps.

    len_ref: (Bp, 1)         int32 sequence lengths (padded rows are 0)
    gif_ref: (TT, Bp, 3*Hp)  precomputed input gates, forward dir, block i
    gib_ref: (TT, Bp, 3*Hp)  precomputed input gates, backward dir, block nb-1-i
    bhn_ref: (2, 1, Hp)      per-direction b_hn (only bias not folded into gi)
    whh_hbm: (2, Hp, 3*Hp)   recurrent weights W_hh^T, left in HBM (ANY)
    outf_ref/outb_ref: (TT, Bp, Hp) per-direction outputs
    hf_ref/hb_ref: (Bp, Hp)  hidden-state scratch (persists across grid steps)
    whh_ref: (2, Hp, 3*Hp)   single-buffered VMEM copy of W_hh
    """
    i = pl.program_id(0)
    nb = pl.num_programs(0)

    @pl.when(i == 0)
    def _():
        # W_hh is grid-invariant: copy HBM -> VMEM scratch once (single buffer
        # instead of the pipeline's double buffer).
        cp = pltpu.make_async_copy(whh_hbm, whh_ref, whh_sem)
        cp.start()
        cp.wait()
        hf_ref[...] = jnp.zeros_like(hf_ref)
        hb_ref[...] = jnp.zeros_like(hb_ref)

    lens = len_ref[...]                      # (Bp, 1)
    t0_f = i * tt                            # first global time of fwd block
    t0_b = (nb - 1 - i) * tt                 # first global time of bwd block

    wf_ref = whh_ref.at[0]                   # (Hp, 3Hp) ref views (no load yet)
    wb_ref = whh_ref.at[1]
    bf_n = bhn_ref[0]                        # (1, Hp)
    bb_n = bhn_ref[1]

    H = hid_p

    def gru_cell(g, h, w_ref, b_n):
        # One fused (Bp,Hp)@(Hp,3Hp) recurrent matmul; slices at 128-lane
        # boundaries (Hp is a multiple of 128).
        gh = jnp.dot(h, w_ref[...], preferred_element_type=jnp.float32)
        r = jax.nn.sigmoid(g[:, 0:H] + gh[:, 0:H])
        z = jax.nn.sigmoid(g[:, H:2 * H] + gh[:, H:2 * H])
        n = jnp.tanh(g[:, 2 * H:3 * H] + r * (gh[:, 2 * H:3 * H] + b_n))
        return (1.0 - z) * n + z * h

    def step(k, carry):
        hf, hb = carry                               # hidden states in vregs

        # ---- forward direction: local time k (ascending) ----
        hf_new = gru_cell(gif_ref[k], hf, wf_ref, bf_n)
        vf = lens > (t0_f + k)                       # (Bp, 1)
        hf = jnp.where(vf, hf_new, hf)               # freeze past seq end
        outf_ref[k] = jnp.where(vf, hf, 0.0)         # zero-pad outputs

        # ---- backward direction: local time tt-1-k (descending) ----
        kb = tt - 1 - k
        hb_new = gru_cell(gib_ref[kb], hb, wb_ref, bb_n)
        vb = lens > (t0_b + kb)
        hb = jnp.where(vb, hb_new, hb)
        outb_ref[kb] = jnp.where(vb, hb, 0.0)
        return (hf, hb)

    hf_fin, hb_fin = jax.lax.fori_loop(
        0, tt, step, (hf_ref[...], hb_ref[...]), unroll=unroll)
    hf_ref[...] = hf_fin                             # persist across grid steps
    hb_ref[...] = hb_fin


def bigru_layer(gi_f, gi_b, whh_fb, bhn_fb, len2d, *, tt, unroll):
    """One fused bidirectional GRU layer.  gi_*: (T_pad, Bp, 3*Hp)."""
    t_pad, bsz_p, g3 = gi_f.shape
    hid_p = g3 // 3
    nb = t_pad // tt

    # Explicit VMEM accounting: gi/out blocks are double-buffered by the
    # pipeline; W_hh lives in a single VMEM scratch.
    gi_bytes = 4 * tt * bsz_p * 3 * hid_p
    out_bytes = 4 * tt * bsz_p * hid_p
    whh_bytes = 4 * 2 * hid_p * 3 * hid_p
    misc = 4 * (2 * bsz_p * hid_p + 2 * hid_p + bsz_p) + 4096
    needed = 2 * 2 * gi_bytes + 2 * 2 * out_bytes + whh_bytes + misc
    vmem_limit = int(min(max(2 * needed, 32 << 20), 96 << 20))

    kernel = functools.partial(bigru_kernel, tt=tt, hid_p=hid_p, unroll=unroll)
    return pl.pallas_call(
        kernel,
        out_shape=(jax.ShapeDtypeStruct((t_pad, bsz_p, hid_p), jnp.float32),
                   jax.ShapeDtypeStruct((t_pad, bsz_p, hid_p), jnp.float32)),
        grid_spec=pltpu.PrefetchScalarGridSpec(
            num_scalar_prefetch=0,
            grid=(nb,),
            in_specs=[
                pl.BlockSpec((bsz_p, 1), lambda i: (0, 0)),                  # seq_len
                pl.BlockSpec((tt, bsz_p, 3 * hid_p), lambda i: (i, 0, 0)),   # gi fwd
                pl.BlockSpec((tt, bsz_p, 3 * hid_p),
                             lambda i: (nb - 1 - i, 0, 0)),                  # gi bwd
                pl.BlockSpec((2, 1, hid_p), lambda i: (0, 0, 0)),            # b_hn
                pl.BlockSpec(memory_space=pl.ANY),                           # W_hh (HBM)
            ],
            out_specs=[
                pl.BlockSpec((tt, bsz_p, hid_p), lambda i: (i, 0, 0)),            # fwd
                pl.BlockSpec((tt, bsz_p, hid_p), lambda i: (nb - 1 - i, 0, 0)),   # bwd
            ],
            scratch_shapes=[
                pltpu.VMEM((bsz_p, hid_p), jnp.float32),           # h fwd
                pltpu.VMEM((bsz_p, hid_p), jnp.float32),           # h bwd
                pltpu.VMEM((2, hid_p, 3 * hid_p), jnp.float32),    # W_hh (1 buffer)
                pltpu.SemaphoreType.DMA(()),
            ],
        ),
        compiler_params=pltpu.CompilerParams(
            dimension_semantics=("arbitrary",),
            vmem_limit_bytes=vmem_limit),
    )(len2d, gi_f, gi_b, bhn_fb, whh_fb)


# ------------------------------ Encoder glue -------------------------------- #

def _pad_gate_cols(a, hid, hid_p):
    """Zero-pad the last (3*hid) axis per gate block to 3*hid_p."""
    if hid_p == hid:
        return a
    lead = a.shape[:-1]
    a = a.reshape(lead + (3, hid))
    pad = [(0, 0)] * len(lead) + [(0, 0), (0, hid_p - hid)]
    return jnp.pad(a, pad).reshape(lead + (3 * hid_p,))


def _pad_whh(whh_t, hid, hid_p):
    """(hid, 3*hid) W_hh^T -> (hid_p, 3*hid_p) with zero rows / per-gate cols."""
    w = _pad_gate_cols(whh_t, hid, hid_p)
    if hid_p != hid:
        w = jnp.pad(w, ((0, hid_p - hid), (0, 0)))
    return w


def _precompute_gates(pieces, piece_dims, wih_t, bih, bhh, hid, hid_p):
    """gi[t] = x[t] @ W_ih^T + b_ih + [b_hr, b_hz, 0], laid out lane-dense as
    (T, B, 3*hid_p) (no transpose).  `pieces` are the feature-chunks of this
    layer's input (previous layer's fwd/bwd halves consumed directly, no
    concatenation); each is sliced back to its true feature count."""
    wih_p = _pad_gate_cols(wih_t, hid, hid_p)            # (D, 3*hid_p)
    acc = None
    off = 0
    for p, dk in zip(pieces, piece_dims):
        term = jnp.einsum('tbd,dg->tbg', p[..., :dk], wih_p[off:off + dk])
        acc = term if acc is None else acc + term
        off += dk
    bias = bih + jnp.concatenate(
        [bhh[:hid], bhh[hid:2 * hid], jnp.zeros((hid,), bhh.dtype)])
    bias = _pad_gate_cols(bias, hid, hid_p)
    return acc + bias[None, None, :]                      # (T, B, 3*hid_p)


def _pick_tt(t, bsz_p, hid_p, budget_bytes=48 << 20):
    """Largest time block whose double-buffered working set + W_hh fits a VMEM
    budget valid on all generations (v7x has 64 MiB per TensorCore)."""
    fixed = 4 * (2 * hid_p * 3 * hid_p + 2 * bsz_p * hid_p) + (1 << 20)
    per_step = 4 * bsz_p * (3 * hid_p + hid_p) * 2 * 2   # gi+out, 2 dirs, 2 bufs
    avail = max(budget_bytes - fixed, per_step)
    tt = int(max(1, min(t, 64, avail // per_step)))
    if tt >= 8:
        tt = (tt // 8) * 8     # keep divisible by the partial-unroll factor
    return tt


def encoder_forward(params, x, seq_len):
    """x: (B, 1, dim_in, T); seq_len: (B,) int.  Returns (out, out_len) with
    out: (T, B, 2*hidden), zero-padded past each sequence's length (same as
    pad_packed_sequence of the packed GRU output)."""
    x = jnp.squeeze(x, axis=1)           # (B, dim_in, T)
    x = jnp.transpose(x, (2, 0, 1))      # (T, B, dim_in)
    t, bsz, dim_in = x.shape

    hid = params[0]["fwd"][1].shape[0]   # whh_t: (hid, 3*hid)
    hid_p = _round_up(hid, 128)          # lane-dense hidden dim
    bsz_p = _round_up(bsz, 8)            # sublane-dense batch

    if bsz_p != bsz:
        x = jnp.pad(x, ((0, 0), (0, bsz_p - bsz), (0, 0)))
    len_p = jnp.zeros((bsz_p,), jnp.int32).at[:bsz].set(seq_len.astype(jnp.int32))
    len2d = len_p.reshape(bsz_p, 1)

    tt = _pick_tt(t, bsz_p, hid_p)
    t_pad = _round_up(t, tt)
    unroll = 8 if tt >= 8 else tt

    # TODO(synk): on v7x the fwd/bwd recurrences could be split across the two
    # TensorCores (core-parallel direction axis) for ~2x on the recurrent part.
    pieces, piece_dims = [x], [dim_in]
    out_f = out_b = None
    for layer_p in params:
        wih_f, whh_f, bih_f, bhh_f = layer_p["fwd"]
        wih_b, whh_b, bih_b, bhh_b = layer_p["bwd"]

        gi_f = _precompute_gates(pieces, piece_dims, wih_f, bih_f, bhh_f, hid, hid_p)
        gi_b = _precompute_gates(pieces, piece_dims, wih_b, bih_b, bhh_b, hid, hid_p)
        if t_pad != t:
            pad = ((0, t_pad - t), (0, 0), (0, 0))
            gi_f = jnp.pad(gi_f, pad)
            gi_b = jnp.pad(gi_b, pad)

        whh_fb = jnp.stack([_pad_whh(whh_f, hid, hid_p),
                            _pad_whh(whh_b, hid, hid_p)])        # (2, Hp, 3Hp)
        bhn_fb = jnp.stack([
            jnp.pad(bhh_f[2 * hid:], (0, hid_p - hid)).reshape(1, hid_p),
            jnp.pad(bhh_b[2 * hid:], (0, hid_p - hid)).reshape(1, hid_p)])

        out_f, out_b = bigru_layer(gi_f, gi_b, whh_fb, bhn_fb, len2d,
                                   tt=tt, unroll=unroll)
        out_f, out_b = out_f[:t], out_b[:t]
        pieces, piece_dims = [out_f, out_b], [hid, hid]   # consume halves directly

    out = jnp.concatenate([out_f[:, :bsz, :hid], out_b[:, :bsz, :hid]], axis=-1)
    return out, seq_len.astype(jnp.int32)


def init_encoder_params(key, num_layers, dim_in, hidden):
    """Deterministic params, PyTorch GRU default init U(-1/sqrt(H), 1/sqrt(H))."""
    params = []
    k = 1.0 / np.sqrt(hidden)
    for layer in range(num_layers):
        in_dim = dim_in if layer == 0 else 2 * hidden
        layer_p = {}
        for d in ("fwd", "bwd"):
            key, k0, k1, k2, k3 = jax.random.split(key, 5)
            wih = jax.random.uniform(k0, (3 * hidden, in_dim), jnp.float32, -k, k)
            whh = jax.random.uniform(k1, (3 * hidden, hidden), jnp.float32, -k, k)
            bih = jax.random.uniform(k2, (3 * hidden,), jnp.float32, -k, k)
            bhh = jax.random.uniform(k3, (3 * hidden,), jnp.float32, -k, k)
            layer_p[d] = (wih.T, whh.T, bih, bhh)
        params.append(layer_p)
    return params


# ------------------------- pure-JAX reference (check) ----------------------- #

def _gru_dir_ref(x_seq, seq_len, wih_t, whh_t, bih, bhh, reverse):
    T, B, _ = x_seq.shape
    H = whh_t.shape[0]
    order = jnp.arange(T)[::-1] if reverse else jnp.arange(T)

    def step(h, t):
        gi = x_seq[t] @ wih_t + bih
        gh = h @ whh_t + bhh
        r = jax.nn.sigmoid(gi[:, :H] + gh[:, :H])
        z = jax.nn.sigmoid(gi[:, H:2 * H] + gh[:, H:2 * H])
        n = jnp.tanh(gi[:, 2 * H:] + r * gh[:, 2 * H:])
        h_new = (1.0 - z) * n + z * h
        valid = seq_len[:, None] > t
        h_upd = jnp.where(valid, h_new, h)
        return h_upd, jnp.where(valid, h_upd, 0.0)

    _, outs = jax.lax.scan(step, jnp.zeros((B, H), jnp.float32), order)
    return outs[::-1] if reverse else outs


def encoder_ref(params, x, seq_len):
    x = jnp.transpose(jnp.squeeze(x, axis=1), (2, 0, 1))
    sl = seq_len.astype(jnp.int32)
    h = x
    for layer_p in params:
        fwd = _gru_dir_ref(h, sl, *layer_p["fwd"], reverse=False)
        bwd = _gru_dir_ref(h, sl, *layer_p["bwd"], reverse=True)
        h = jnp.concatenate([fwd, bwd], axis=-1)
    return h


# ----------------------------------- main ----------------------------------- #

if __name__ == "__main__":
    B, DIM_IN, T, HIDDEN, NUM_LAYERS = 2, 16, 8, 32, 2

    key = jax.random.PRNGKey(0)
    key, kx = jax.random.split(key)
    x = jax.random.normal(kx, (B, 1, DIM_IN, T), dtype=jnp.float32)
    seq_len = jnp.array([T, 5], dtype=jnp.int32)   # padded batch: lengths <= T

    params = init_encoder_params(key, NUM_LAYERS, DIM_IN, HIDDEN)

    out, out_len = encoder_forward(params, x, seq_len)
    out = jax.block_until_ready(out)

    ref = jax.block_until_ready(encoder_ref(params, x, seq_len))

    assert out.shape == (T, B, 2 * HIDDEN), out.shape
    np.testing.assert_allclose(np.asarray(out), np.asarray(ref),
                               rtol=1e-5, atol=1e-4)
    assert np.array_equal(np.asarray(out_len), np.asarray(seq_len))

    print("KERNEL_OK")
</pallas_src>

<mosaic_0001>
module attributes {stable_mosaic.version = 11 : i64} {
  func.func @bigru_kernel(%arg0: i32, %arg1: memref<8x1xi32, #tpu.memory_space<vmem>>, %arg2: memref<8x8x384xf32, #tpu.memory_space<vmem>>, %arg3: memref<8x8x384xf32, #tpu.memory_space<vmem>>, %arg4: memref<2x1x128xf32, #tpu.memory_space<vmem>>, %arg5: memref<2x128x384xf32, #tpu.memory_space<any>>, %arg6: memref<8x8x128xf32, #tpu.memory_space<vmem>>, %arg7: memref<8x8x128xf32, #tpu.memory_space<vmem>>, %arg8: memref<8x128xf32, #tpu.memory_space<vmem>>, %arg9: memref<8x128xf32, #tpu.memory_space<vmem>>, %arg10: memref<2x128x384xf32, #tpu.memory_space<vmem>>, %arg11: memref<!tpu.dma_semaphore, #tpu.memory_space<semaphore_mem>>) attributes {dimension_semantics = [#tpu.dimension_semantics<arbitrary>], iteration_bounds = array<i64: 1>, scalar_prefetch = 0 : i64, scratch_operands = 4 : i64, tpu.core_type = #tpu.core_type<tc>, window_params = [{pipeline_mode = #tpu.pipeline_mode<synchronous>, transform_indices = @transform_0, window_bounds = array<i64: 8, 1>}, {transform_indices = @transform_1, window_bounds = array<i64: 8, 8, 384>}, {transform_indices = @transform_2, window_bounds = array<i64: 8, 8, 384>}, {pipeline_mode = #tpu.pipeline_mode<synchronous>, transform_indices = @transform_3, window_bounds = array<i64: 2, 1, 128>}, {}, {transform_indices = @transform_5, window_bounds = array<i64: 8, 8, 128>}, {transform_indices = @transform_6, window_bounds = array<i64: 8, 8, 128>}]} {
    %c0_i32 = arith.constant 0 : i32
    %0 = arith.cmpi eq, %arg0, %c0_i32 : i32
    %1 = arith.extui %0 : i1 to i32
    %c0_i32_0 = arith.constant 0 : i32
    %2 = arith.cmpi ne, %1, %c0_i32_0 : i32
    scf.if %2 {
      tpu.enqueue_dma source(%arg5 : memref<2x128x384xf32, #tpu.memory_space<any>>) target(%arg10 : memref<2x128x384xf32, #tpu.memory_space<vmem>>) target_semaphore(%arg11 : memref<!tpu.dma_semaphore, #tpu.memory_space<semaphore_mem>>)
      tpu.wait_dma2 semaphore(%arg11 : memref<!tpu.dma_semaphore, #tpu.memory_space<semaphore_mem>>) src(%arg5 : memref<2x128x384xf32, #tpu.memory_space<any>>) dst(%arg10 : memref<2x128x384xf32, #tpu.memory_space<vmem>>)
      %cst_204 = arith.constant 0.000000e+00 : f32
      %807 = vector.broadcast %cst_204 : f32 to vector<8x128xf32>
      %c0_205 = arith.constant 0 : index
      %c0_206 = arith.constant 0 : index
      %808 = vector.load %arg8[%c0_205, %c0_206] : memref<8x128xf32, #tpu.memory_space<vmem>>, vector<8x128xf32>
      tpu.vector_store %arg8[%c0_205, %c0_206], %807 {strides = array<i32>} : memref<8x128xf32, #tpu.memory_space<vmem>>, vector<8x128xf32>,
      %cst_207 = arith.constant 0.000000e+00 : f32
      %809 = vector.broadcast %cst_207 : f32 to vector<8x128xf32>
      %c0_208 = arith.constant 0 : index
      %c0_209 = arith.constant 0 : index
      %810 = vector.load %arg9[%c0_208, %c0_209] : memref<8x128xf32, #tpu.memory_space<vmem>>, vector<8x128xf32>
      tpu.vector_store %arg9[%c0_208, %c0_209], %809 {strides = array<i32>} : memref<8x128xf32, #tpu.memory_space<vmem>>, vector<8x128xf32>,
    } else {
    }
    %c0 = arith.constant 0 : index
    %c0_1 = arith.constant 0 : index
    %3 = vector.load %arg1[%c0, %c0_1] : memref<8x1xi32, #tpu.memory_space<vmem>>, vector<8x1xi32>
    %c8_i32 = arith.constant 8 : i32
    %4 = arith.muli %arg0, %c8_i32 : i32
    %c0_i32_2 = arith.constant 0 : i32
    %5 = arith.subi %c0_i32_2, %arg0 : i32
    %c8_i32_3 = arith.constant 8 : i32
    %6 = arith.muli %5, %c8_i32_3 : i32
    %c0_4 = arith.constant 0 : index
    %c0_5 = arith.constant 0 : index
    %c0_6 = arith.constant 0 : index
    %7 = vector.load %arg4[%c0_4, %c0_5, %c0_6] : memref<2x1x128xf32, #tpu.memory_space<vmem>>, vector<1x1x128xf32>
    %8 = vector.shape_cast %7 : vector<1x1x128xf32> to vector<1x128xf32>
    %c1 = arith.constant 1 : index
    %c0_7 = arith.constant 0 : index
    %c0_8 = arith.constant 0 : index
    %9 = vector.load %arg4[%c1, %c0_7, %c0_8] : memref<2x1x128xf32, #tpu.memory_space<vmem>>, vector<1x1x128xf32>
    %10 = vector.shape_cast %9 : vector<1x1x128xf32> to vector<1x128xf32>
    %c0_9 = arith.constant 0 : index
    %c0_10 = arith.constant 0 : index
    %11 = vector.load %arg8[%c0_9, %c0_10] : memref<8x128xf32, #tpu.memory_space<vmem>>, vector<8x128xf32>
    %c0_11 = arith.constant 0 : index
    %c0_12 = arith.constant 0 : index
    %12 = vector.load %arg9[%c0_11, %c0_12] : memref<8x128xf32, #tpu.memory_space<vmem>>, vector<8x128xf32>
    %c0_i32_13 = arith.constant 0 : i32
    %c1_i32 = arith.constant 1 : i32
    %c0_i32_14 = arith.constant 0 : i32
    %13 = arith.index_cast %c0_i32_14 : i32 to index
    %c0_15 = arith.constant 0 : index
    %c0_16 = arith.constant 0 : index
    %14 = vector.load %arg2[%13, %c0_15, %c0_16] : memref<8x8x384xf32, #tpu.memory_space<vmem>>, vector<1x8x384xf32>
    %15 = vector.shape_cast %14 : vector<1x8x384xf32> to vector<8x384xf32>
    %16 = arith.index_cast %c0_i32_13 : i32 to index
    %c0_17 = arith.constant 0 : index
    %c0_18 = arith.constant 0 : index
    %17 = vector.load %arg10[%16, %c0_17, %c0_18] : memref<2x128x384xf32, #tpu.memory_space<vmem>>, vector<1x128x384xf32>
    %18 = vector.shape_cast %17 : vector<1x128x384xf32> to vector<128x384xf32>
    %cst = arith.constant dense<0.000000e+00> : vector<8x384xf32>
    %19 = tpu.matmul %11, %18, %cst {dimension_numbers = #tpu.dot_dimension_numbers<[1], [0], [0], [1], [0, 0, 1, 1], [], []>} : vector<8x128xf32>, vector<128x384xf32>, vector<8x384xf32> -> vector<8x384xf32>
    %20 = vector.extract_strided_slice %15 {offsets = [0, 0], sizes = [8, 128], strides = [1, 1]} : vector<8x384xf32> to vector<8x128xf32>
    %21 = vector.extract_strided_slice %19 {offsets = [0, 0], sizes = [8, 128], strides = [1, 1]} : vector<8x384xf32> to vector<8x128xf32>
    %22 = arith.addf %20, %21 : vector<8x128xf32>
    %23 = arith.negf %22 : vector<8x128xf32>
    %24 = math.exp %23 : vector<8x128xf32>
    %cst_19 = arith.constant 1.000000e+00 : f32
    %25 = vector.broadcast %cst_19 : f32 to vector<8x128xf32>
    %26 = arith.addf %25, %24 : vector<8x128xf32>
    %27 = arith.divf %25, %26 : vector<8x128xf32>
    %28 = vector.extract_strided_slice %15 {offsets = [0, 128], sizes = [8, 128], strides = [1, 1]} : vector<8x384xf32> to vector<8x128xf32>
    %29 = vector.extract_strided_slice %19 {offsets = [0, 128], sizes = [8, 128], strides = [1, 1]} : vector<8x384xf32> to vector<8x128xf32>
    %30 = arith.addf %28, %29 : vector<8x128xf32>
    %31 = arith.negf %30 : vector<8x128xf32>
    %32 = math.exp %31 : vector<8x128xf32>
    %cst_20 = arith.constant 1.000000e+00 : f32
    %33 = vector.broadcast %cst_20 : f32 to vector<8x128xf32>
    %34 = arith.addf %33, %32 : vector<8x128xf32>
    %35 = arith.divf %33, %34 : vector<8x128xf32>
    %36 = vector.extract_strided_slice %15 {offsets = [0, 256], sizes = [8, 128], strides = [1, 1]} : vector<8x384xf32> to vector<8x128xf32>
    %37 = vector.extract_strided_slice %19 {offsets = [0, 256], sizes = [8, 128], strides = [1, 1]} : vector<8x384xf32> to vector<8x128xf32>
    %38 = vector.broadcast %8 : vector<1x128xf32> to vector<8x128xf32>
    %39 = arith.addf %37, %38 : vector<8x128xf32>
    %40 = arith.mulf %27, %39 : vector<8x128xf32>
    %41 = arith.addf %36, %40 : vector<8x128xf32>
    %42 = math.tanh %41 : vector<8x128xf32>
    %cst_21 = arith.constant 1.000000e+00 : f32
    %43 = vector.broadcast %cst_21 : f32 to vector<8x128xf32>
    %44 = arith.subf %43, %35 : vector<8x128xf32>
    %45 = arith.mulf %44, %42 : vector<8x128xf32>
    %46 = arith.mulf %35, %11 : vector<8x128xf32>
    %47 = arith.addf %45, %46 : vector<8x128xf32>
    %48 = arith.addi %4, %c0_i32_14 : i32
    %49 = vector.broadcast %48 : i32 to vector<8x1xi32>
    %50 = arith.cmpi sgt, %3, %49 : vector<8x1xi32>
    %51 = vector.shape_cast %50 : vector<8x1xi1> to vector<8x1xi1>
    %52 = vector.broadcast %51 : vector<8x1xi1> to vector<8x128xi1>
    %53 = arith.select %52, %47, %11 : vector<8x128xi1>, vector<8x128xf32>
    %cst_22 = arith.constant 0.000000e+00 : f32
    %54 = vector.shape_cast %50 : vector<8x1xi1> to vector<8x1xi1>
    %55 = vector.broadcast %54 : vector<8x1xi1> to vector<8x128xi1>
    %56 = vector.broadcast %cst_22 : f32 to vector<8x128xf32>
    %57 = arith.select %55, %53, %56 : vector<8x128xi1>, vector<8x128xf32>
    %58 = arith.index_cast %c0_i32_14 : i32 to index
    %c0_23 = arith.constant 0 : index
    %c0_24 = arith.constant 0 : index
    %59 = vector.load %arg6[%58, %c0_23, %c0_24] : memref<8x8x128xf32, #tpu.memory_space<vmem>>, vector<1x8x128xf32>
    %60 = vector.shape_cast %59 : vector<1x8x128xf32> to vector<8x128xf32>
    %61 = vector.shape_cast %57 : vector<8x128xf32> to vector<1x8x128xf32>
    tpu.vector_store %arg6[%58, %c0_23, %c0_24], %61 {strides = array<i32>} : memref<8x8x128xf32, #tpu.memory_space<vmem>>, vector<1x8x128xf32>,
    %c7_i32 = arith.constant 7 : i32
    %62 = arith.subi %c7_i32, %c0_i32_14 : i32
    %63 = arith.index_cast %62 : i32 to index
    %c0_25 = arith.constant 0 : index
    %c0_26 = arith.constant 0 : index
    %64 = vector.load %arg3[%63, %c0_25, %c0_26] : memref<8x8x384xf32, #tpu.memory_space<vmem>>, vector<1x8x384xf32>
    %65 = vector.shape_cast %64 : vector<1x8x384xf32> to vector<8x384xf32>
    %66 = arith.index_cast %c1_i32 : i32 to index
    %c0_27 = arith.constant 0 : index
    %c0_28 = arith.constant 0 : index
    %67 = vector.load %arg10[%66, %c0_27, %c0_28] : memref<2x128x384xf32, #tpu.memory_space<vmem>>, vector<1x128x384xf32>
    %68 = vector.shape_cast %67 : vector<1x128x384xf32> to vector<128x384xf32>
    %cst_29 = arith.constant dense<0.000000e+00> : vector<8x384xf32>
    %69 = tpu.matmul %12, %68, %cst_29 {dimension_numbers = #tpu.dot_dimension_numbers<[1], [0], [0], [1], [0, 0, 1, 1], [], []>} : vector<8x128xf32>, vector<128x384xf32>, vector<8x384xf32> -> vector<8x384xf32>
    %70 = vector.extract_strided_slice %65 {offsets = [0, 0], sizes = [8, 128], strides = [1, 1]} : vector<8x384xf32> to vector<8x128xf32>
    %71 = vector.extract_strided_slice %69 {offsets = [0, 0], sizes = [8, 128], strides = [1, 1]} : vector<8x384xf32> to vector<8x128xf32>
    %72 = arith.addf %70, %71 : vector<8x128xf32>
    %73 = arith.negf %72 : vector<8x128xf32>
    %74 = math.exp %73 : vector<8x128xf32>
    %cst_30 = arith.constant 1.000000e+00 : f32
    %75 = vector.broadcast %cst_30 : f32 to vector<8x128xf32>
    %76 = arith.addf %75, %74 : vector<8x128xf32>
    %77 = arith.divf %75, %76 : vector<8x128xf32>
    %78 = vector.extract_strided_slice %65 {offsets = [0, 128], sizes = [8, 128], strides = [1, 1]} : vector<8x384xf32> to vector<8x128xf32>
    %79 = vector.extract_strided_slice %69 {offsets = [0, 128], sizes = [8, 128], strides = [1, 1]} : vector<8x384xf32> to vector<8x128xf32>
    %80 = arith.addf %78, %79 : vector<8x128xf32>
    %81 = arith.negf %80 : vector<8x128xf32>
    %82 = math.exp %81 : vector<8x128xf32>
    %cst_31 = arith.constant 1.000000e+00 : f32
    %83 = vector.broadcast %cst_31 : f32 to vector<8x128xf32>
    %84 = arith.addf %83, %82 : vector<8x128xf32>
    %85 = arith.divf %83, %84 : vector<8x128xf32>
    %86 = vector.extract_strided_slice %65 {offsets = [0, 256], sizes = [8, 128], strides = [1, 1]} : vector<8x384xf32> to vector<8x128xf32>
    %87 = vector.extract_strided_slice %69 {offsets = [0, 256], sizes = [8, 128], strides = [1, 1]} : vector<8x384xf32> to vector<8x128xf32>
    %88 = vector.broadcast %10 : vector<1x128xf32> to vector<8x128xf32>
    %89 = arith.addf %87, %88 : vector<8x128xf32>
    %90 = arith.mulf %77, %89 : vector<8x128xf32>
    %91 = arith.addf %86, %90 : vector<8x128xf32>
    %92 = math.tanh %91 : vector<8x128xf32>
    %cst_32 = arith.constant 1.000000e+00 : f32
    %93 = vector.broadcast %cst_32 : f32 to vector<8x128xf32>
    %94 = arith.subf %93, %85 : vector<8x128xf32>
    %95 = arith.mulf %94, %92 : vector<8x128xf32>
    %96 = arith.mulf %85, %12 : vector<8x128xf32>
    %97 = arith.addf %95, %96 : vector<8x128xf32>
    %98 = arith.addi %6, %62 : i32
    %99 = vector.broadcast %98 : i32 to vector<8x1xi32>
    %100 = arith.cmpi sgt, %3, %99 : vector<8x1xi32>
    %101 = vector.shape_cast %100 : vector<8x1xi1> to vector<8x1xi1>
    %102 = vector.broadcast %101 : vector<8x1xi1> to vector<8x128xi1>
    %103 = arith.select %102, %97, %12 : vector<8x128xi1>, vector<8x128xf32>
    %cst_33 = arith.constant 0.000000e+00 : f32
    %104 = vector.shape_cast %100 : vector<8x1xi1> to vector<8x1xi1>
    %105 = vector.broadcast %104 : vector<8x1xi1> to vector<8x128xi1>
    %106 = vector.broadcast %cst_33 : f32 to vector<8x128xf32>
    %107 = arith.select %105, %103, %106 : vector<8x128xi1>, vector<8x128xf32>
    %108 = arith.index_cast %62 : i32 to index
    %c0_34 = arith.constant 0 : index
    %c0_35 = arith.constant 0 : index
    %109 = vector.load %arg7[%108, %c0_34, %c0_35] : memref<8x8x128xf32, #tpu.memory_space<vmem>>, vector<1x8x128xf32>
    %110 = vector.shape_cast %109 : vector<1x8x128xf32> to vector<8x128xf32>
    %111 = vector.shape_cast %107 : vector<8x128xf32> to vector<1x8x128xf32>
    tpu.vector_store %arg7[%108, %c0_34, %c0_35], %111 {strides = array<i32>} : memref<8x8x128xf32, #tpu.memory_space<vmem>>, vector<1x8x128xf32>,
    %c1_i32_36 = arith.constant 1 : i32
    %112 = arith.index_cast %c1_i32_36 : i32 to index
    %c0_37 = arith.constant 0 : index
    %c0_38 = arith.constant 0 : index
    %113 = vector.load %arg2[%112, %c0_37, %c0_38] : memref<8x8x384xf32, #tpu.memory_space<vmem>>, vector<1x8x384xf32>
    %114 = vector.shape_cast %113 : vector<1x8x384xf32> to vector<8x384xf32>
    %115 = arith.index_cast %c0_i32_13 : i32 to index
    %c0_39 = arith.constant 0 : index
    %c0_40 = arith.constant 0 : index
    %116 = vector.load %arg10[%115, %c0_39, %c0_40] : memref<2x128x384xf32, #tpu.memory_space<vmem>>, vector<1x128x384xf32>
    %117 = vector.shape_cast %116 : vector<1x128x384xf32> to vector<128x384xf32>
    %cst_41 = arith.constant dense<0.000000e+00> : vector<8x384xf32>
    %118 = tpu.matmul %53, %117, %cst_41 {dimension_numbers = #tpu.dot_dimension_numbers<[1], [0], [0], [1], [0, 0, 1, 1], [], []>} : vector<8x128xf32>, vector<128x384xf32>, vector<8x384xf32> -> vector<8x384xf32>
    %119 = vector.extract_strided_slice %114 {offsets = [0, 0], sizes = [8, 128], strides = [1, 1]} : vector<8x384xf32> to vector<8x128xf32>
    %120 = vector.extract_strided_slice %118 {offsets = [0, 0], sizes = [8, 128], strides = [1, 1]} : vector<8x384xf32> to vector<8x128xf32>
    %121 = arith.addf %119, %120 : vector<8x128xf32>
    %122 = arith.negf %121 : vector<8x128xf32>
    %123 = math.exp %122 : vector<8x128xf32>
    %cst_42 = arith.constant 1.000000e+00 : f32
    %124 = vector.broadcast %cst_42 : f32 to vector<8x128xf32>
    %125 = arith.addf %124, %123 : vector<8x128xf32>
    %126 = arith.divf %124, %125 : vector<8x128xf32>
    %127 = vector.extract_strided_slice %114 {offsets = [0, 128], sizes = [8, 128], strides = [1, 1]} : vector<8x384xf32> to vector<8x128xf32>
    %128 = vector.extract_strided_slice %118 {offsets = [0, 128], sizes = [8, 128], strides = [1, 1]} : vector<8x384xf32> to vector<8x128xf32>
    %129 = arith.addf %127, %128 : vector<8x128xf32>
    %130 = arith.negf %129 : vector<8x128xf32>
    %131 = math.exp %130 : vector<8x128xf32>
    %cst_43 = arith.constant 1.000000e+00 : f32
    %132 = vector.broadcast %cst_43 : f32 to vector<8x128xf32>
    %133 = arith.addf %132, %131 : vector<8x128xf32>
    %134 = arith.divf %132, %133 : vector<8x128xf32>
    %135 = vector.extract_strided_slice %114 {offsets = [0, 256], sizes = [8, 128], strides = [1, 1]} : vector<8x384xf32> to vector<8x128xf32>
    %136 = vector.extract_strided_slice %118 {offsets = [0, 256], sizes = [8, 128], strides = [1, 1]} : vector<8x384xf32> to vector<8x128xf32>
    %137 = vector.broadcast %8 : vector<1x128xf32> to vector<8x128xf32>
    %138 = arith.addf %136, %137 : vector<8x128xf32>
    %139 = arith.mulf %126, %138 : vector<8x128xf32>
    %140 = arith.addf %135, %139 : vector<8x128xf32>
    %141 = math.tanh %140 : vector<8x128xf32>
    %cst_44 = arith.constant 1.000000e+00 : f32
    %142 = vector.broadcast %cst_44 : f32 to vector<8x128xf32>
    %143 = arith.subf %142, %134 : vector<8x128xf32>
    %144 = arith.mulf %143, %141 : vector<8x128xf32>
    %145 = arith.mulf %134, %53 : vector<8x128xf32>
    %146 = arith.addf %144, %145 : vector<8x128xf32>
    %147 = arith.addi %4, %c1_i32_36 : i32
    %148 = vector.broadcast %147 : i32 to vector<8x1xi32>
    %149 = arith.cmpi sgt, %3, %148 : vector<8x1xi32>
    %150 = vector.shape_cast %149 : vector<8x1xi1> to vector<8x1xi1>
    %151 = vector.broadcast %150 : vector<8x1xi1> to vector<8x128xi1>
    %152 = arith.select %151, %146, %53 : vector<8x128xi1>, vector<8x128xf32>
    %cst_45 = arith.constant 0.000000e+00 : f32
    %153 = vector.shape_cast %149 : vector<8x1xi1> to vector<8x1xi1>
    %154 = vector.broadcast %153 : vector<8x1xi1> to vector<8x128xi1>
    %155 = vector.broadcast %cst_45 : f32 to vector<8x128xf32>
    %156 = arith.select %154, %152, %155 : vector<8x128xi1>, vector<8x128xf32>
    %157 = arith.index_cast %c1_i32_36 : i32 to index
    %c0_46 = arith.constant 0 : index
    %c0_47 = arith.constant 0 : index
    %158 = vector.load %arg6[%157, %c0_46, %c0_47] : memref<8x8x128xf32, #tpu.memory_space<vmem>>, vector<1x8x128xf32>
    %159 = vector.shape_cast %158 : vector<1x8x128xf32> to vector<8x128xf32>
    %160 = vector.shape_cast %156 : vector<8x128xf32> to vector<1x8x128xf32>
    tpu.vector_store %arg6[%157, %c0_46, %c0_47], %160 {strides = array<i32>} : memref<8x8x128xf32, #tpu.memory_space<vmem>>, vector<1x8x128xf32>,
    %c7_i32_48 = arith.constant 7 : i32
    %161 = arith.subi %c7_i32_48, %c1_i32_36 : i32
    %162 = arith.index_cast %161 : i32 to index
    %c0_49 = arith.constant 0 : index
    %c0_50 = arith.constant 0 : index
    %163 = vector.load %arg3[%162, %c0_49, %c0_50] : memref<8x8x384xf32, #tpu.memory_space<vmem>>, vector<1x8x384xf32>
    %164 = vector.shape_cast %163 : vector<1x8x384xf32> to vector<8x384xf32>
    %165 = arith.index_cast %c1_i32 : i32 to index
    %c0_51 = arith.constant 0 : index
    %c0_52 = arith.constant 0 : index
    %166 = vector.load %arg10[%165, %c0_51, %c0_52] : memref<2x128x384xf32, #tpu.memory_space<vmem>>, vector<1x128x384xf32>
    %167 = vector.shape_cast %166 : vector<1x128x384xf32> to vector<128x384xf32>
    %cst_53 = arith.constant dense<0.000000e+00> : vector<8x384xf32>
    %168 = tpu.matmul %103, %167, %cst_53 {dimension_numbers = #tpu.dot_dimension_numbers<[1], [0], [0], [1], [0, 0, 1, 1], [], []>} : vector<8x128xf32>, vector<128x384xf32>, vector<8x384xf32> -> vector<8x384xf32>
    %169 = vector.extract_strided_slice %164 {offsets = [0, 0], sizes = [8, 128], strides = [1, 1]} : vector<8x384xf32> to vector<8x128xf32>
    %170 = vector.extract_strided_slice %168 {offsets = [0, 0], sizes = [8, 128], strides = [1, 1]} : vector<8x384xf32> to vector<8x128xf32>
    %171 = arith.addf %169, %170 : vector<8x128xf32>
    %172 = arith.negf %171 : vector<8x128xf32>
    %173 = math.exp %172 : vector<8x128xf32>
    %cst_54 = arith.constant 1.000000e+00 : f32
    %174 = vector.broadcast %cst_54 : f32 to vector<8x128xf32>
    %175 = arith.addf %174, %173 : vector<8x128xf32>
    %176 = arith.divf %174, %175 : vector<8x128xf32>
    %177 = vector.extract_strided_slice %164 {offsets = [0, 128], sizes = [8, 128], strides = [1, 1]} : vector<8x384xf32> to vector<8x128xf32>
    %178 = vector.extract_strided_slice %168 {offsets = [0, 128], sizes = [8, 128], strides = [1, 1]} : vector<8x384xf32> to vector<8x128xf32>
    %179 = arith.addf %177, %178 : vector<8x128xf32>
    %180 = arith.negf %179 : vector<8x128xf32>
    %181 = math.exp %180 : vector<8x128xf32>
    %cst_55 = arith.constant 1.000000e+00 : f32
    %182 = vector.broadcast %cst_55 : f32 to vector<8x128xf32>
    %183 = arith.addf %182, %181 : vector<8x128xf32>
    %184 = arith.divf %182, %183 : vector<8x128xf32>
    %185 = vector.extract_strided_slice %164 {offsets = [0, 256], sizes = [8, 128], strides = [1, 1]} : vector<8x384xf32> to vector<8x128xf32>
    %186 = vector.extract_strided_slice %168 {offsets = [0, 256], sizes = [8, 128], strides = [1, 1]} : vector<8x384xf32> to vector<8x128xf32>
    %187 = vector.broadcast %10 : vector<1x128xf32> to vector<8x128xf32>
    %188 = arith.addf %186, %187 : vector<8x128xf32>
    %189 = arith.mulf %176, %188 : vector<8x128xf32>
    %190 = arith.addf %185, %189 : vector<8x128xf32>
    %191 = math.tanh %190 : vector<8x128xf32>
    %cst_56 = arith.constant 1.000000e+00 : f32
    %192 = vector.broadcast %cst_56 : f32 to vector<8x128xf32>
    %193 = arith.subf %192, %184 : vector<8x128xf32>
    %194 = arith.mulf %193, %191 : vector<8x128xf32>
    %195 = arith.mulf %184, %103 : vector<8x128xf32>
    %196 = arith.addf %194, %195 : vector<8x128xf32>
    %197 = arith.addi %6, %161 : i32
    %198 = vector.broadcast %197 : i32 to vector<8x1xi32>
    %199 = arith.cmpi sgt, %3, %198 : vector<8x1xi32>
    %200 = vector.shape_cast %199 : vector<8x1xi1> to vector<8x1xi1>
    %201 = vector.broadcast %200 : vector<8x1xi1> to vector<8x128xi1>
    %202 = arith.select %201, %196, %103 : vector<8x128xi1>, vector<8x128xf32>
    %cst_57 = arith.constant 0.000000e+00 : f32
    %203 = vector.shape_cast %199 : vector<8x1xi1> to vector<8x1xi1>
    %204 = vector.broadcast %203 : vector<8x1xi1> to vector<8x128xi1>
    %205 = vector.broadcast %cst_57 : f32 to vector<8x128xf32>
    %206 = arith.select %204, %202, %205 : vector<8x128xi1>, vector<8x128xf32>
    %207 = arith.index_cast %161 : i32 to index
    %c0_58 = arith.constant 0 : index
    %c0_59 = arith.constant 0 : index
    %208 = vector.load %arg7[%207, %c0_58, %c0_59] : memref<8x8x128xf32, #tpu.memory_space<vmem>>, vector<1x8x128xf32>
    %209 = vector.shape_cast %208 : vector<1x8x128xf32> to vector<8x128xf32>
    %210 = vector.shape_cast %206 : vector<8x128xf32> to vector<1x8x128xf32>
    tpu.vector_store %arg7[%207, %c0_58, %c0_59], %210 {strides = array<i32>} : memref<8x8x128xf32, #tpu.memory_space<vmem>>, vector<1x8x128xf32>,
    %c2_i32 = arith.constant 2 : i32
    %211 = arith.index_cast %c2_i32 : i32 to index
    %c0_60 = arith.constant 0 : index
    %c0_61 = arith.constant 0 : index
    %212 = vector.load %arg2[%211, %c0_60, %c0_61] : memref<8x8x384xf32, #tpu.memory_space<vmem>>, vector<1x8x384xf32>
    %213 = vector.shape_cast %212 : vector<1x8x384xf32> to vector<8x384xf32>
    %214 = arith.index_cast %c0_i32_13 : i32 to index
    %c0_62 = arith.constant 0 : index
    %c0_63 = arith.constant 0 : index
    %215 = vector.load %arg10[%214, %c0_62, %c0_63] : memref<2x128x384xf32, #tpu.memory_space<vmem>>, vector<1x128x384xf32>
    %216 = vector.shape_cast %215 : vector<1x128x384xf32> to vector<128x384xf32>
    %cst_64 = arith.constant dense<0.000000e+00> : vector<8x384xf32>
    %217 = tpu.matmul %152, %216, %cst_64 {dimension_numbers = #tpu.dot_dimension_numbers<[1], [0], [0], [1], [0, 0, 1, 1], [], []>} : vector<8x128xf32>, vector<128x384xf32>, vector<8x384xf32> -> vector<8x384xf32>
    %218 = vector.extract_strided_slice %213 {offsets = [0, 0], sizes = [8, 128], strides = [1, 1]} : vector<8x384xf32> to vector<8x128xf32>
    %219 = vector.extract_strided_slice %217 {offsets = [0, 0], sizes = [8, 128], strides = [1, 1]} : vector<8x384xf32> to vector<8x128xf32>
    %220 = arith.addf %218, %219 : vector<8x128xf32>
    %221 = arith.negf %220 : vector<8x128xf32>
    %222 = math.exp %221 : vector<8x128xf32>
    %cst_65 = arith.constant 1.000000e+00 : f32
    %223 = vector.broadcast %cst_65 : f32 to vector<8x128xf32>
    %224 = arith.addf %223, %222 : vector<8x128xf32>
    %225 = arith.divf %223, %224 : vector<8x128xf32>
    %226 = vector.extract_strided_slice %213 {offsets = [0, 128], sizes = [8, 128], strides = [1, 1]} : vector<8x384xf32> to vector<8x128xf32>
    %227 = vector.extract_strided_slice %217 {offsets = [0, 128], sizes = [8, 128], strides = [1, 1]} : vector<8x384xf32> to vector<8x128xf32>
    %228 = arith.addf %226, %227 : vector<8x128xf32>
    %229 = arith.negf %228 : vector<8x128xf32>
    %230 = math.exp %229 : vector<8x128xf32>
    %cst_66 = arith.constant 1.000000e+00 : f32
    %231 = vector.broadcast %cst_66 : f32 to vector<8x128xf32>
    %232 = arith.addf %231, %230 : vector<8x128xf32>
    %233 = arith.divf %231, %232 : vector<8x128xf32>
    %234 = vector.extract_strided_slice %213 {offsets = [0, 256], sizes = [8, 128], strides = [1, 1]} : vector<8x384xf32> to vector<8x128xf32>
    %235 = vector.extract_strided_slice %217 {offsets = [0, 256], sizes = [8, 128], strides = [1, 1]} : vector<8x384xf32> to vector<8x128xf32>
    %236 = vector.broadcast %8 : vector<1x128xf32> to vector<8x128xf32>
    %237 = arith.addf %235, %236 : vector<8x128xf32>
    %238 = arith.mulf %225, %237 : vector<8x128xf32>
    %239 = arith.addf %234, %238 : vector<8x128xf32>
    %240 = math.tanh %239 : vector<8x128xf32>
    %cst_67 = arith.constant 1.000000e+00 : f32
    %241 = vector.broadcast %cst_67 : f32 to vector<8x128xf32>
    %242 = arith.subf %241, %233 : vector<8x128xf32>
    %243 = arith.mulf %242, %240 : vector<8x128xf32>
    %244 = arith.mulf %233, %152 : vector<8x128xf32>
    %245 = arith.addf %243, %244 : vector<8x128xf32>
    %246 = arith.addi %4, %c2_i32 : i32
    %247 = vector.broadcast %246 : i32 to vector<8x1xi32>
    %248 = arith.cmpi sgt, %3, %247 : vector<8x1xi32>
    %249 = vector.shape_cast %248 : vector<8x1xi1> to vector<8x1xi1>
    %250 = vector.broadcast %249 : vector<8x1xi1> to vector<8x128xi1>
    %251 = arith.select %250, %245, %152 : vector<8x128xi1>, vector<8x128xf32>
    %cst_68 = arith.constant 0.000000e+00 : f32
    %252 = vector.shape_cast %248 : vector<8x1xi1> to vector<8x1xi1>
    %253 = vector.broadcast %252 : vector<8x1xi1> to vector<8x128xi1>
    %254 = vector.broadcast %cst_68 : f32 to vector<8x128xf32>
    %255 = arith.select %253, %251, %254 : vector<8x128xi1>, vector<8x128xf32>
    %256 = arith.index_cast %c2_i32 : i32 to index
    %c0_69 = arith.constant 0 : index
    %c0_70 = arith.constant 0 : index
    %257 = vector.load %arg6[%256, %c0_69, %c0_70] : memref<8x8x128xf32, #tpu.memory_space<vmem>>, vector<1x8x128xf32>
    %258 = vector.shape_cast %257 : vector<1x8x128xf32> to vector<8x128xf32>
    %259 = vector.shape_cast %255 : vector<8x128xf32> to vector<1x8x128xf32>
    tpu.vector_store %arg6[%256, %c0_69, %c0_70], %259 {strides = array<i32>} : memref<8x8x128xf32, #tpu.memory_space<vmem>>, vector<1x8x128xf32>,
    %c7_i32_71 = arith.constant 7 : i32
    %260 = arith.subi %c7_i32_71, %c2_i32 : i32
    %261 = arith.index_cast %260 : i32 to index
    %c0_72 = arith.constant 0 : index
    %c0_73 = arith.constant 0 : index
    %262 = vector.load %arg3[%261, %c0_72, %c0_73] : memref<8x8x384xf32, #tpu.memory_space<vmem>>, vector<1x8x384xf32>
    %263 = vector.shape_cast %262 : vector<1x8x384xf32> to vector<8x384xf32>
    %264 = arith.index_cast %c1_i32 : i32 to index
    %c0_74 = arith.constant 0 : index
    %c0_75 = arith.constant 0 : index
    %265 = vector.load %arg10[%264, %c0_74, %c0_75] : memref<2x128x384xf32, #tpu.memory_space<vmem>>, vector<1x128x384xf32>
    %266 = vector.shape_cast %265 : vector<1x128x384xf32> to vector<128x384xf32>
    %cst_76 = arith.constant dense<0.000000e+00> : vector<8x384xf32>
    %267 = tpu.matmul %202, %266, %cst_76 {dimension_numbers = #tpu.dot_dimension_numbers<[1], [0], [0], [1], [0, 0, 1, 1], [], []>} : vector<8x128xf32>, vector<128x384xf32>, vector<8x384xf32> -> vector<8x384xf32>
    %268 = vector.extract_strided_slice %263 {offsets = [0, 0], sizes = [8, 128], strides = [1, 1]} : vector<8x384xf32> to vector<8x128xf32>
    %269 = vector.extract_strided_slice %267 {offsets = [0, 0], sizes = [8, 128], strides = [1, 1]} : vector<8x384xf32> to vector<8x128xf32>
    %270 = arith.addf %268, %269 : vector<8x128xf32>
    %271 = arith.negf %270 : vector<8x128xf32>
    %272 = math.exp %271 : vector<8x128xf32>
    %cst_77 = arith.constant 1.000000e+00 : f32
    %273 = vector.broadcast %cst_77 : f32 to vector<8x128xf32>
    %274 = arith.addf %273, %272 : vector<8x128xf32>
    %275 = arith.divf %273, %274 : vector<8x128xf32>
    %276 = vector.extract_strided_slice %263 {offsets = [0, 128], sizes = [8, 128], strides = [1, 1]} : vector<8x384xf32> to vector<8x128xf32>
    %277 = vector.extract_strided_slice %267 {offsets = [0, 128], sizes = [8, 128], strides = [1, 1]} : vector<8x384xf32> to vector<8x128xf32>
    %278 = arith.addf %276, %277 : vector<8x128xf32>
    %279 = arith.negf %278 : vector<8x128xf32>
    %280 = math.exp %279 : vector<8x128xf32>
    %cst_78 = arith.constant 1.000000e+00 : f32
    %281 = vector.broadcast %cst_78 : f32 to vector<8x128xf32>
    %282 = arith.addf %281, %280 : vector<8x128xf32>
    %283 = arith.divf %281, %282 : vector<8x128xf32>
    %284 = vector.extract_strided_slice %263 {offsets = [0, 256], sizes = [8, 128], strides = [1, 1]} : vector<8x384xf32> to vector<8x128xf32>
    %285 = vector.extract_strided_slice %267 {offsets = [0, 256], sizes = [8, 128], strides = [1, 1]} : vector<8x384xf32> to vector<8x128xf32>
    %286 = vector.broadcast %10 : vector<1x128xf32> to vector<8x128xf32>
    %287 = arith.addf %285, %286 : vector<8x128xf32>
    %288 = arith.mulf %275, %287 : vector<8x128xf32>
    %289 = arith.addf %284, %288 : vector<8x128xf32>
    %290 = math.tanh %289 : vector<8x128xf32>
    %cst_79 = arith.constant 1.000000e+00 : f32
    %291 = vector.broadcast %cst_79 : f32 to vector<8x128xf32>
    %292 = arith.subf %291, %283 : vector<8x128xf32>
    %293 = arith.mulf %292, %290 : vector<8x128xf32>
    %294 = arith.mulf %283, %202 : vector<8x128xf32>
    %295 = arith.addf %293, %294 : vector<8x128xf32>
    %296 = arith.addi %6, %260 : i32
    %297 = vector.broadcast %296 : i32 to vector<8x1xi32>
    %298 = arith.cmpi sgt, %3, %297 : vector<8x1xi32>
    %299 = vector.shape_cast %298 : vector<8x1xi1> to vector<8x1xi1>
    %300 = vector.broadcast %299 : vector<8x1xi1> to vector<8x128xi1>
    %301 = arith.select %300, %295, %202 : vector<8x128xi1>, vector<8x128xf32>
    %cst_80 = arith.constant 0.000000e+00 : f32
    %302 = vector.shape_cast %298 : vector<8x1xi1> to vector<8x1xi1>
    %303 = vector.broadcast %302 : vector<8x1xi1> to vector<8x128xi1>
    %304 = vector.broadcast %cst_80 : f32 to vector<8x128xf32>
    %305 = arith.select %303, %301, %304 : vector<8x128xi1>, vector<8x128xf32>
    %306 = arith.index_cast %260 : i32 to index
    %c0_81 = arith.constant 0 : index
    %c0_82 = arith.constant 0 : index
    %307 = vector.load %arg7[%306, %c0_81, %c0_82] : memref<8x8x128xf32, #tpu.memory_space<vmem>>, vector<1x8x128xf32>
    %308 = vector.shape_cast %307 : vector<1x8x128xf32> to vector<8x128xf32>
    %309 = vector.shape_cast %305 : vector<8x128xf32> to vector<1x8x128xf32>
    tpu.vector_store %arg7[%306, %c0_81, %c0_82], %309 {strides = array<i32>} : memref<8x8x128xf32, #tpu.memory_space<vmem>>, vector<1x8x128xf32>,
    %c3_i32 = arith.constant 3 : i32
    %310 = arith.index_cast %c3_i32 : i32 to index
    %c0_83 = arith.constant 0 : index
    %c0_84 = arith.constant 0 : index
    %311 = vector.load %arg2[%310, %c0_83, %c0_84] : memref<8x8x384xf32, #tpu.memory_space<vmem>>, vector<1x8x384xf32>
    %312 = vector.shape_cast %311 : vector<1x8x384xf32> to vector<8x384xf32>
    %313 = arith.index_cast %c0_i32_13 : i32 to index
    %c0_85 = arith.constant 0 : index
    %c0_86 = arith.constant 0 : index
    %314 = vector.load %arg10[%313, %c0_85, %c0_86] : memref<2x128x384xf32, #tpu.memory_space<vmem>>, vector<1x128x384xf32>
    %315 = vector.shape_cast %314 : vector<1x128x384xf32> to vector<128x384xf32>
    %cst_87 = arith.constant dense<0.000000e+00> : vector<8x384xf32>
    %316 = tpu.matmul %251, %315, %cst_87 {dimension_numbers = #tpu.dot_dimension_numbers<[1], [0], [0], [1], [0, 0, 1, 1], [], []>} : vector<8x128xf32>, vector<128x384xf32>, vector<8x384xf32> -> vector<8x384xf32>
    %317 = vector.extract_strided_slice %312 {offsets = [0, 0], sizes = [8, 128], strides = [1, 1]} : vector<8x384xf32> to vector<8x128xf32>
    %318 = vector.extract_strided_slice %316 {offsets = [0, 0], sizes = [8, 128], strides = [1, 1]} : vector<8x384xf32> to vector<8x128xf32>
    %319 = arith.addf %317, %318 : vector<8x128xf32>
    %320 = arith.negf %319 : vector<8x128xf32>
    %321 = math.exp %320 : vector<8x128xf32>
    %cst_88 = arith.constant 1.000000e+00 : f32
    %322 = vector.broadcast %cst_88 : f32 to vector<8x128xf32>
    %323 = arith.addf %322, %321 : vector<8x128xf32>
    %324 = arith.divf %322, %323 : vector<8x128xf32>
    %325 = vector.extract_strided_slice %312 {offsets = [0, 128], sizes = [8, 128], strides = [1, 1]} : vector<8x384xf32> to vector<8x128xf32>
    %326 = vector.extract_strided_slice %316 {offsets = [0, 128], sizes = [8, 128], strides = [1, 1]} : vector<8x384xf32> to vector<8x128xf32>
    %327 = arith.addf %325, %326 : vector<8x128xf32>
    %328 = arith.negf %327 : vector<8x128xf32>
    %329 = math.exp %328 : vector<8x128xf32>
    %cst_89 = arith.constant 1.000000e+00 : f32
    %330 = vector.broadcast %cst_89 : f32 to vector<8x128xf32>
    %331 = arith.addf %330, %329 : vector<8x128xf32>
    %332 = arith.divf %330, %331 : vector<8x128xf32>
    %333 = vector.extract_strided_slice %312 {offsets = [0, 256], sizes = [8, 128], strides = [1, 1]} : vector<8x384xf32> to vector<8x128xf32>
    %334 = vector.extract_strided_slice %316 {offsets = [0, 256], sizes = [8, 128], strides = [1, 1]} : vector<8x384xf32> to vector<8x128xf32>
    %335 = vector.broadcast %8 : vector<1x128xf32> to vector<8x128xf32>
    %336 = arith.addf %334, %335 : vector<8x128xf32>
    %337 = arith.mulf %324, %336 : vector<8x128xf32>
    %338 = arith.addf %333, %337 : vector<8x128xf32>
    %339 = math.tanh %338 : vector<8x128xf32>
    %cst_90 = arith.constant 1.000000e+00 : f32
    %340 = vector.broadcast %cst_90 : f32 to vector<8x128xf32>
    %341 = arith.subf %340, %332 : vector<8x128xf32>
    %342 = arith.mulf %341, %339 : vector<8x128xf32>
    %343 = arith.mulf %332, %251 : vector<8x128xf32>
    %344 = arith.addf %342, %343 : vector<8x128xf32>
    %345 = arith.addi %4, %c3_i32 : i32
    %346 = vector.broadcast %345 : i32 to vector<8x1xi32>
    %347 = arith.cmpi sgt, %3, %346 : vector<8x1xi32>
    %348 = vector.shape_cast %347 : vector<8x1xi1> to vector<8x1xi1>
    %349 = vector.broadcast %348 : vector<8x1xi1> to vector<8x128xi1>
    %350 = arith.select %349, %344, %251 : vector<8x128xi1>, vector<8x128xf32>
    %cst_91 = arith.constant 0.000000e+00 : f32
    %351 = vector.shape_cast %347 : vector<8x1xi1> to vector<8x1xi1>
    %352 = vector.broadcast %351 : vector<8x1xi1> to vector<8x128xi1>
    %353 = vector.broadcast %cst_91 : f32 to vector<8x128xf32>
    %354 = arith.select %352, %350, %353 : vector<8x128xi1>, vector<8x128xf32>
    %355 = arith.index_cast %c3_i32 : i32 to index
    %c0_92 = arith.constant 0 : index
    %c0_93 = arith.constant 0 : index
    %356 = vector.load %arg6[%355, %c0_92, %c0_93] : memref<8x8x128xf32, #tpu.memory_space<vmem>>, vector<1x8x128xf32>
    %357 = vector.shape_cast %356 : vector<1x8x128xf32> to vector<8x128xf32>
    %358 = vector.shape_cast %354 : vector<8x128xf32> to vector<1x8x128xf32>
    tpu.vector_store %arg6[%355, %c0_92, %c0_93], %358 {strides = array<i32>} : memref<8x8x128xf32, #tpu.memory_space<vmem>>, vector<1x8x128xf32>,
    %c7_i32_94 = arith.constant 7 : i32
    %359 = arith.subi %c7_i32_94, %c3_i32 : i32
    %360 = arith.index_cast %359 : i32 to index
    %c0_95 = arith.constant 0 : index
    %c0_96 = arith.constant 0 : index
    %361 = vector.load %arg3[%360, %c0_95, %c0_96] : memref<8x8x384xf32, #tpu.memory_space<vmem>>, vector<1x8x384xf32>
    %362 = vector.shape_cast %361 : vector<1x8x384xf32> to vector<8x384xf32>
    %363 = arith.index_cast %c1_i32 : i32 to index
    %c0_97 = arith.constant 0 : index
    %c0_98 = arith.constant 0 : index
    %364 = vector.load %arg10[%363, %c0_97, %c0_98] : memref<2x128x384xf32, #tpu.memory_space<vmem>>, vector<1x128x384xf32>
    %365 = vector.shape_cast %364 : vector<1x128x384xf32> to vector<128x384xf32>
    %cst_99 = arith.constant dense<0.000000e+00> : vector<8x384xf32>
    %366 = tpu.matmul %301, %365, %cst_99 {dimension_numbers = #tpu.dot_dimension_numbers<[1], [0], [0], [1], [0, 0, 1, 1], [], []>} : vector<8x128xf32>, vector<128x384xf32>, vector<8x384xf32> -> vector<8x384xf32>
    %367 = vector.extract_strided_slice %362 {offsets = [0, 0], sizes = [8, 128], strides = [1, 1]} : vector<8x384xf32> to vector<8x128xf32>
    %368 = vector.extract_strided_slice %366 {offsets = [0, 0], sizes = [8, 128], strides = [1, 1]} : vector<8x384xf32> to vector<8x128xf32>
    %369 = arith.addf %367, %368 : vector<8x128xf32>
    %370 = arith.negf %369 : vector<8x128xf32>
    %371 = math.exp %370 : vector<8x128xf32>
    %cst_100 = arith.constant 1.000000e+00 : f32
    %372 = vector.broadcast %cst_100 : f32 to vector<8x128xf32>
    %373 = arith.addf %372, %371 : vector<8x128xf32>
    %374 = arith.divf %372, %373 : vector<8x128xf32>
    %375 = vector.extract_strided_slice %362 {offsets = [0, 128], sizes = [8, 128], strides = [1, 1]} : vector<8x384xf32> to vector<8x128xf32>
    %376 = vector.extract_strided_slice %366 {offsets = [0, 128], sizes = [8, 128], strides = [1, 1]} : vector<8x384xf32> to vector<8x128xf32>
    %377 = arith.addf %375, %376 : vector<8x128xf32>
    %378 = arith.negf %377 : vector<8x128xf32>
    %379 = math.exp %378 : vector<8x128xf32>
    %cst_101 = arith.constant 1.000000e+00 : f32
    %380 = vector.broadcast %cst_101 : f32 to vector<8x128xf32>
    %381 = arith.addf %380, %379 : vector<8x128xf32>
    %382 = arith.divf %380, %381 : vector<8x128xf32>
    %383 = vector.extract_strided_slice %362 {offsets = [0, 256], sizes = [8, 128], strides = [1, 1]} : vector<8x384xf32> to vector<8x128xf32>
    %384 = vector.extract_strided_slice %366 {offsets = [0, 256], sizes = [8, 128], strides = [1, 1]} : vector<8x384xf32> to vector<8x128xf32>
    %385 = vector.broadcast %10 : vector<1x128xf32> to vector<8x128xf32>
    %386 = arith.addf %384, %385 : vector<8x128xf32>
    %387 = arith.mulf %374, %386 : vector<8x128xf32>
    %388 = arith.addf %383, %387 : vector<8x128xf32>
    %389 = math.tanh %388 : vector<8x128xf32>
    %cst_102 = arith.constant 1.000000e+00 : f32
    %390 = vector.broadcast %cst_102 : f32 to vector<8x128xf32>
    %391 = arith.subf %390, %382 : vector<8x128xf32>
    %392 = arith.mulf %391, %389 : vector<8x128xf32>
    %393 = arith.mulf %382, %301 : vector<8x128xf32>
    %394 = arith.addf %392, %393 : vector<8x128xf32>
    %395 = arith.addi %6, %359 : i32
    %396 = vector.broadcast %395 : i32 to vector<8x1xi32>
    %397 = arith.cmpi sgt, %3, %396 : vector<8x1xi32>
    %398 = vector.shape_cast %397 : vector<8x1xi1> to vector<8x1xi1>
    %399 = vector.broadcast %398 : vector<8x1xi1> to vector<8x128xi1>
    %400 = arith.select %399, %394, %301 : vector<8x128xi1>, vector<8x128xf32>
    %cst_103 = arith.constant 0.000000e+00 : f32
    %401 = vector.shape_cast %397 : vector<8x1xi1> to vector<8x1xi1>
    %402 = vector.broadcast %401 : vector<8x1xi1> to vector<8x128xi1>
    %403 = vector.broadcast %cst_103 : f32 to vector<8x128xf32>
    %404 = arith.select %402, %400, %403 : vector<8x128xi1>, vector<8x128xf32>
    %405 = arith.index_cast %359 : i32 to index
    %c0_104 = arith.constant 0 : index
    %c0_105 = arith.constant 0 : index
    %406 = vector.load %arg7[%405, %c0_104, %c0_105] : memref<8x8x128xf32, #tpu.memory_space<vmem>>, vector<1x8x128xf32>
    %407 = vector.shape_cast %406 : vector<1x8x128xf32> to vector<8x128xf32>
    %408 = vector.shape_cast %404 : vector<8x128xf32> to vector<1x8x128xf32>
    tpu.vector_store %arg7[%405, %c0_104, %c0_105], %408 {strides = array<i32>} : memref<8x8x128xf32, #tpu.memory_space<vmem>>, vector<1x8x128xf32>,
    %c4_i32 = arith.constant 4 : i32
    %409 = arith.index_cast %c4_i32 : i32 to index
    %c0_106 = arith.constant 0 : index
    %c0_107 = arith.constant 0 : index
    %410 = vector.load %arg2[%409, %c0_106, %c0_107] : memref<8x8x384xf32, #tpu.memory_space<vmem>>, vector<1x8x384xf32>
    %411 = vector.shape_cast %410 : vector<1x8x384xf32> to vector<8x384xf32>
    %412 = arith.index_cast %c0_i32_13 : i32 to index
    %c0_108 = arith.constant 0 : index
    %c0_109 = arith.constant 0 : index
    %413 = vector.load %arg10[%412, %c0_108, %c0_109] : memref<2x128x384xf32, #tpu.memory_space<vmem>>, vector<1x128x384xf32>
    %414 = vector.shape_cast %413 : vector<1x128x384xf32> to vector<128x384xf32>
    %cst_110 = arith.constant dense<0.000000e+00> : vector<8x384xf32>
    %415 = tpu.matmul %350, %414, %cst_110 {dimension_numbers = #tpu.dot_dimension_numbers<[1], [0], [0], [1], [0, 0, 1, 1], [], []>} : vector<8x128xf32>, vector<128x384xf32>, vector<8x384xf32> -> vector<8x384xf32>
    %416 = vector.extract_strided_slice %411 {offsets = [0, 0], sizes = [8, 128], strides = [1, 1]} : vector<8x384xf32> to vector<8x128xf32>
    %417 = vector.extract_strided_slice %415 {offsets = [0, 0], sizes = [8, 128], strides = [1, 1]} : vector<8x384xf32> to vector<8x128xf32>
    %418 = arith.addf %416, %417 : vector<8x128xf32>
    %419 = arith.negf %418 : vector<8x128xf32>
    %420 = math.exp %419 : vector<8x128xf32>
    %cst_111 = arith.constant 1.000000e+00 : f32
    %421 = vector.broadcast %cst_111 : f32 to vector<8x128xf32>
    %422 = arith.addf %421, %420 : vector<8x128xf32>
    %423 = arith.divf %421, %422 : vector<8x128xf32>
    %424 = vector.extract_strided_slice %411 {offsets = [0, 128], sizes = [8, 128], strides = [1, 1]} : vector<8x384xf32> to vector<8x128xf32>
    %425 = vector.extract_strided_slice %415 {offsets = [0, 128], sizes = [8, 128], strides = [1, 1]} : vector<8x384xf32> to vector<8x128xf32>
    %426 = arith.addf %424, %425 : vector<8x128xf32>
    %427 = arith.negf %426 : vector<8x128xf32>
    %428 = math.exp %427 : vector<8x128xf32>
    %cst_112 = arith.constant 1.000000e+00 : f32
    %429 = vector.broadcast %cst_112 : f32 to vector<8x128xf32>
    %430 = arith.addf %429, %428 : vector<8x128xf32>
    %431 = arith.divf %429, %430 : vector<8x128xf32>
    %432 = vector.extract_strided_slice %411 {offsets = [0, 256], sizes = [8, 128], strides = [1, 1]} : vector<8x384xf32> to vector<8x128xf32>
    %433 = vector.extract_strided_slice %415 {offsets = [0, 256], sizes = [8, 128], strides = [1, 1]} : vector<8x384xf32> to vector<8x128xf32>
    %434 = vector.broadcast %8 : vector<1x128xf32> to vector<8x128xf32>
    %435 = arith.addf %433, %434 : vector<8x128xf32>
    %436 = arith.mulf %423, %435 : vector<8x128xf32>
    %437 = arith.addf %432, %436 : vector<8x128xf32>
    %438 = math.tanh %437 : vector<8x128xf32>
    %cst_113 = arith.constant 1.000000e+00 : f32
    %439 = vector.broadcast %cst_113 : f32 to vector<8x128xf32>
    %440 = arith.subf %439, %431 : vector<8x128xf32>
    %441 = arith.mulf %440, %438 : vector<8x128xf32>
    %442 = arith.mulf %431, %350 : vector<8x128xf32>
    %443 = arith.addf %441, %442 : vector<8x128xf32>
    %444 = arith.addi %4, %c4_i32 : i32
    %445 = vector.broadcast %444 : i32 to vector<8x1xi32>
    %446 = arith.cmpi sgt, %3, %445 : vector<8x1xi32>
    %447 = vector.shape_cast %446 : vector<8x1xi1> to vector<8x1xi1>
    %448 = vector.broadcast %447 : vector<8x1xi1> to vector<8x128xi1>
    %449 = arith.select %448, %443, %350 : vector<8x128xi1>, vector<8x128xf32>
    %cst_114 = arith.constant 0.000000e+00 : f32
    %450 = vector.shape_cast %446 : vector<8x1xi1> to vector<8x1xi1>
    %451 = vector.broadcast %450 : vector<8x1xi1> to vector<8x128xi1>
    %452 = vector.broadcast %cst_114 : f32 to vector<8x128xf32>
    %453 = arith.select %451, %449, %452 : vector<8x128xi1>, vector<8x128xf32>
    %454 = arith.index_cast %c4_i32 : i32 to index
    %c0_115 = arith.constant 0 : index
    %c0_116 = arith.constant 0 : index
    %455 = vector.load %arg6[%454, %c0_115, %c0_116] : memref<8x8x128xf32, #tpu.memory_space<vmem>>, vector<1x8x128xf32>
    %456 = vector.shape_cast %455 : vector<1x8x128xf32> to vector<8x128xf32>
    %457 = vector.shape_cast %453 : vector<8x128xf32> to vector<1x8x128xf32>
    tpu.vector_store %arg6[%454, %c0_115, %c0_116], %457 {strides = array<i32>} : memref<8x8x128xf32, #tpu.memory_space<vmem>>, vector<1x8x128xf32>,
    %c7_i32_117 = arith.constant 7 : i32
    %458 = arith.subi %c7_i32_117, %c4_i32 : i32
    %459 = arith.index_cast %458 : i32 to index
    %c0_118 = arith.constant 0 : index
    %c0_119 = arith.constant 0 : index
    %460 = vector.load %arg3[%459, %c0_118, %c0_119] : memref<8x8x384xf32, #tpu.memory_space<vmem>>, vector<1x8x384xf32>
    %461 = vector.shape_cast %460 : vector<1x8x384xf32> to vector<8x384xf32>
    %462 = arith.index_cast %c1_i32 : i32 to index
    %c0_120 = arith.constant 0 : index
    %c0_121 = arith.constant 0 : index
    %463 = vector.load %arg10[%462, %c0_120, %c0_121] : memref<2x128x384xf32, #tpu.memory_space<vmem>>, vector<1x128x384xf32>
    %464 = vector.shape_cast %463 : vector<1x128x384xf32> to vector<128x384xf32>
    %cst_122 = arith.constant dense<0.000000e+00> : vector<8x384xf32>
    %465 = tpu.matmul %400, %464, %cst_122 {dimension_numbers = #tpu.dot_dimension_numbers<[1], [0], [0], [1], [0, 0, 1, 1], [], []>} : vector<8x128xf32>, vector<128x384xf32>, vector<8x384xf32> -> vector<8x384xf32>
    %466 = vector.extract_strided_slice %461 {offsets = [0, 0], sizes = [8, 128], strides = [1, 1]} : vector<8x384xf32> to vector<8x128xf32>
    %467 = vector.extract_strided_slice %465 {offsets = [0, 0], sizes = [8, 128], strides = [1, 1]} : vector<8x384xf32> to vector<8x128xf32>
    %468 = arith.addf %466, %467 : vector<8x128xf32>
    %469 = arith.negf %468 : vector<8x128xf32>
    %470 = math.exp %469 : vector<8x128xf32>
    %cst_123 = arith.constant 1.000000e+00 : f32
    %471 = vector.broadcast %cst_123 : f32 to vector<8x128xf32>
    %472 = arith.addf %471, %470 : vector<8x128xf32>
    %473 = arith.divf %471, %472 : vector<8x128xf32>
    %474 = vector.extract_strided_slice %461 {offsets = [0, 128], sizes = [8, 128], strides = [1, 1]} : vector<8x384xf32> to vector<8x128xf32>
    %475 = vector.extract_strided_slice %465 {offsets = [0, 128], sizes = [8, 128], strides = [1, 1]} : vector<8x384xf32> to vector<8x128xf32>
    %476 = arith.addf %474, %475 : vector<8x128xf32>
    %477 = arith.negf %476 : vector<8x128xf32>
    %478 = math.exp %477 : vector<8x128xf32>
    %cst_124 = arith.constant 1.000000e+00 : f32
    %479 = vector.broadcast %cst_124 : f32 to vector<8x128xf32>
    %480 = arith.addf %479, %478 : vector<8x128xf32>
    %481 = arith.divf %479, %480 : vector<8x128xf32>
    %482 = vector.extract_strided_slice %461 {offsets = [0, 256], sizes = [8, 128], strides = [1, 1]} : vector<8x384xf32> to vector<8x128xf32>
    %483 = vector.extract_strided_slice %465 {offsets = [0, 256], sizes = [8, 128], strides = [1, 1]} : vector<8x384xf32> to vector<8x128xf32>
    %484 = vector.broadcast %10 : vector<1x128xf32> to vector<8x128xf32>
    %485 = arith.addf %483, %484 : vector<8x128xf32>
    %486 = arith.mulf %473, %485 : vector<8x128xf32>
    %487 = arith.addf %482, %486 : vector<8x128xf32>
    %488 = math.tanh %487 : vector<8x128xf32>
    %cst_125 = arith.constant 1.000000e+00 : f32
    %489 = vector.broadcast %cst_125 : f32 to vector<8x128xf32>
    %490 = arith.subf %489, %481 : vector<8x128xf32>
    %491 = arith.mulf %490, %488 : vector<8x128xf32>
    %492 = arith.mulf %481, %400 : vector<8x128xf32>
    %493 = arith.addf %491, %492 : vector<8x128xf32>
    %494 = arith.addi %6, %458 : i32
    %495 = vector.broadcast %494 : i32 to vector<8x1xi32>
    %496 = arith.cmpi sgt, %3, %495 : vector<8x1xi32>
    %497 = vector.shape_cast %496 : vector<8x1xi1> to vector<8x1xi1>
    %498 = vector.broadcast %497 : vector<8x1xi1> to vector<8x128xi1>
    %499 = arith.select %498, %493, %400 : vector<8x128xi1>, vector<8x128xf32>
    %cst_126 = arith.constant 0.000000e+00 : f32
    %500 = vector.shape_cast %496 : vector<8x1xi1> to vector<8x1xi1>
    %501 = vector.broadcast %500 : vector<8x1xi1> to vector<8x128xi1>
    %502 = vector.broadcast %cst_126 : f32 to vector<8x128xf32>
    %503 = arith.select %501, %499, %502 : vector<8x128xi1>, vector<8x128xf32>
    %504 = arith.index_cast %458 : i32 to index
    %c0_127 = arith.constant 0 : index
    %c0_128 = arith.constant 0 : index
    %505 = vector.load %arg7[%504, %c0_127, %c0_128] : memref<8x8x128xf32, #tpu.memory_space<vmem>>, vector<1x8x128xf32>
    %506 = vector.shape_cast %505 : vector<1x8x128xf32> to vector<8x128xf32>
    %507 = vector.shape_cast %503 : vector<8x128xf32> to vector<1x8x128xf32>
    tpu.vector_store %arg7[%504, %c0_127, %c0_128], %507 {strides = array<i32>} : memref<8x8x128xf32, #tpu.memory_space<vmem>>, vector<1x8x128xf32>,
    %c5_i32 = arith.constant 5 : i32
    %508 = arith.index_cast %c5_i32 : i32 to index
    %c0_129 = arith.constant 0 : index
    %c0_130 = arith.constant 0 : index
    %509 = vector.load %arg2[%508, %c0_129, %c0_130] : memref<8x8x384xf32, #tpu.memory_space<vmem>>, vector<1x8x384xf32>
    %510 = vector.shape_cast %509 : vector<1x8x384xf32> to vector<8x384xf32>
    %511 = arith.index_cast %c0_i32_13 : i32 to index
    %c0_131 = arith.constant 0 : index
    %c0_132 = arith.constant 0 : index
    %512 = vector.load %arg10[%511, %c0_131, %c0_132] : memref<2x128x384xf32, #tpu.memory_space<vmem>>, vector<1x128x384xf32>
    %513 = vector.shape_cast %512 : vector<1x128x384xf32> to vector<128x384xf32>
    %cst_133 = arith.constant dense<0.000000e+00> : vector<8x384xf32>
    %514 = tpu.matmul %449, %513, %cst_133 {dimension_numbers = #tpu.dot_dimension_numbers<[1], [0], [0], [1], [0, 0, 1, 1], [], []>} : vector<8x128xf32>, vector<128x384xf32>, vector<8x384xf32> -> vector<8x384xf32>
    %515 = vector.extract_strided_slice %510 {offsets = [0, 0], sizes = [8, 128], strides = [1, 1]} : vector<8x384xf32> to vector<8x128xf32>
    %516 = vector.extract_strided_slice %514 {offsets = [0, 0], sizes = [8, 128], strides = [1, 1]} : vector<8x384xf32> to vector<8x128xf32>
    %517 = arith.addf %515, %516 : vector<8x128xf32>
    %518 = arith.negf %517 : vector<8x128xf32>
    %519 = math.exp %518 : vector<8x128xf32>
    %cst_134 = arith.constant 1.000000e+00 : f32
    %520 = vector.broadcast %cst_134 : f32 to vector<8x128xf32>
    %521 = arith.addf %520, %519 : vector<8x128xf32>
    %522 = arith.divf %520, %521 : vector<8x128xf32>
    %523 = vector.extract_strided_slice %510 {offsets = [0, 128], sizes = [8, 128], strides = [1, 1]} : vector<8x384xf32> to vector<8x128xf32>
    %524 = vector.extract_strided_slice %514 {offsets = [0, 128], sizes = [8, 128], strides = [1, 1]} : vector<8x384xf32> to vector<8x128xf32>
    %525 = arith.addf %523, %524 : vector<8x128xf32>
    %526 = arith.negf %525 : vector<8x128xf32>
    %527 = math.exp %526 : vector<8x128xf32>
    %cst_135 = arith.constant 1.000000e+00 : f32
    %528 = vector.broadcast %cst_135 : f32 to vector<8x128xf32>
    %529 = arith.addf %528, %527 : vector<8x128xf32>
    %530 = arith.divf %528, %529 : vector<8x128xf32>
    %531 = vector.extract_strided_slice %510 {offsets = [0, 256], sizes = [8, 128], strides = [1, 1]} : vector<8x384xf32> to vector<8x128xf32>
    %532 = vector.extract_strided_slice %514 {offsets = [0, 256], sizes = [8, 128], strides = [1, 1]} : vector<8x384xf32> to vector<8x128xf32>
    %533 = vector.broadcast %8 : vector<1x128xf32> to vector<8x128xf32>
    %534 = arith.addf %532, %533 : vector<8x128xf32>
    %535 = arith.mulf %522, %534 : vector<8x128xf32>
    %536 = arith.addf %531, %535 : vector<8x128xf32>
    %537 = math.tanh %536 : vector<8x128xf32>
    %cst_136 = arith.constant 1.000000e+00 : f32
    %538 = vector.broadcast %cst_136 : f32 to vector<8x128xf32>
    %539 = arith.subf %538, %530 : vector<8x128xf32>
    %540 = arith.mulf %539, %537 : vector<8x128xf32>
    %541 = arith.mulf %530, %449 : vector<8x128xf32>
    %542 = arith.addf %540, %541 : vector<8x128xf32>
    %543 = arith.addi %4, %c5_i32 : i32
    %544 = vector.broadcast %543 : i32 to vector<8x1xi32>
    %545 = arith.cmpi sgt, %3, %544 : vector<8x1xi32>
    %546 = vector.shape_cast %545 : vector<8x1xi1> to vector<8x1xi1>
    %547 = vector.broadcast %546 : vector<8x1xi1> to vector<8x128xi1>
    %548 = arith.select %547, %542, %449 : vector<8x128xi1>, vector<8x128xf32>
    %cst_137 = arith.constant 0.000000e+00 : f32
    %549 = vector.shape_cast %545 : vector<8x1xi1> to vector<8x1xi1>
    %550 = vector.broadcast %549 : vector<8x1xi1> to vector<8x128xi1>
    %551 = vector.broadcast %cst_137 : f32 to vector<8x128xf32>
    %552 = arith.select %550, %548, %551 : vector<8x128xi1>, vector<8x128xf32>
    %553 = arith.index_cast %c5_i32 : i32 to index
    %c0_138 = arith.constant 0 : index
    %c0_139 = arith.constant 0 : index
    %554 = vector.load %arg6[%553, %c0_138, %c0_139] : memref<8x8x128xf32, #tpu.memory_space<vmem>>, vector<1x8x128xf32>
    %555 = vector.shape_cast %554 : vector<1x8x128xf32> to vector<8x128xf32>
    %556 = vector.shape_cast %552 : vector<8x128xf32> to vector<1x8x128xf32>
    tpu.vector_store %arg6[%553, %c0_138, %c0_139], %556 {strides = array<i32>} : memref<8x8x128xf32, #tpu.memory_space<vmem>>, vector<1x8x128xf32>,
    %c7_i32_140 = arith.constant 7 : i32
    %557 = arith.subi %c7_i32_140, %c5_i32 : i32
    %558 = arith.index_cast %557 : i32 to index
    %c0_141 = arith.constant 0 : index
    %c0_142 = arith.constant 0 : index
    %559 = vector.load %arg3[%558, %c0_141, %c0_142] : memref<8x8x384xf32, #tpu.memory_space<vmem>>, vector<1x8x384xf32>
    %560 = vector.shape_cast %559 : vector<1x8x384xf32> to vector<8x384xf32>
    %561 = arith.index_cast %c1_i32 : i32 to index
    %c0_143 = arith.constant 0 : index
    %c0_144 = arith.constant 0 : index
    %562 = vector.load %arg10[%561, %c0_143, %c0_144] : memref<2x128x384xf32, #tpu.memory_space<vmem>>, vector<1x128x384xf32>
    %563 = vector.shape_cast %562 : vector<1x128x384xf32> to vector<128x384xf32>
    %cst_145 = arith.constant dense<0.000000e+00> : vector<8x384xf32>
    %564 = tpu.matmul %499, %563, %cst_145 {dimension_numbers = #tpu.dot_dimension_numbers<[1], [0], [0], [1], [0, 0, 1, 1], [], []>} : vector<8x128xf32>, vector<128x384xf32>, vector<8x384xf32> -> vector<8x384xf32>
    %565 = vector.extract_strided_slice %560 {offsets = [0, 0], sizes = [8, 128], strides = [1, 1]} : vector<8x384xf32> to vector<8x128xf32>
    %566 = vector.extract_strided_slice %564 {offsets = [0, 0], sizes = [8, 128], strides = [1, 1]} : vector<8x384xf32> to vector<8x128xf32>
    %567 = arith.addf %565, %566 : vector<8x128xf32>
    %568 = arith.negf %567 : vector<8x128xf32>
    %569 = math.exp %568 : vector<8x128xf32>
    %cst_146 = arith.constant 1.000000e+00 : f32
    %570 = vector.broadcast %cst_146 : f32 to vector<8x128xf32>
    %571 = arith.addf %570, %569 : vector<8x128xf32>
    %572 = arith.divf %570, %571 : vector<8x128xf32>
    %573 = vector.extract_strided_slice %560 {offsets = [0, 128], sizes = [8, 128], strides = [1, 1]} : vector<8x384xf32> to vector<8x128xf32>
    %574 = vector.extract_strided_slice %564 {offsets = [0, 128], sizes = [8, 128], strides = [1, 1]} : vector<8x384xf32> to vector<8x128xf32>
    %575 = arith.addf %573, %574 : vector<8x128xf32>
    %576 = arith.negf %575 : vector<8x128xf32>
    %577 = math.exp %576 : vector<8x128xf32>
    %cst_147 = arith.constant 1.000000e+00 : f32
    %578 = vector.broadcast %cst_147 : f32 to vector<8x128xf32>
    %579 = arith.addf %578, %577 : vector<8x128xf32>
    %580 = arith.divf %578, %579 : vector<8x128xf32>
    %581 = vector.extract_strided_slice %560 {offsets = [0, 256], sizes = [8, 128], strides = [1, 1]} : vector<8x384xf32> to vector<8x128xf32>
    %582 = vector.extract_strided_slice %564 {offsets = [0, 256], sizes = [8, 128], strides = [1, 1]} : vector<8x384xf32> to vector<8x128xf32>
    %583 = vector.broadcast %10 : vector<1x128xf32> to vector<8x128xf32>
    %584 = arith.addf %582, %583 : vector<8x128xf32>
    %585 = arith.mulf %572, %584 : vector<8x128xf32>
    %586 = arith.addf %581, %585 : vector<8x128xf32>
    %587 = math.tanh %586 : vector<8x128xf32>
    %cst_148 = arith.constant 1.000000e+00 : f32
    %588 = vector.broadcast %cst_148 : f32 to vector<8x128xf32>
    %589 = arith.subf %588, %580 : vector<8x128xf32>
    %590 = arith.mulf %589, %587 : vector<8x128xf32>
    %591 = arith.mulf %580, %499 : vector<8x128xf32>
    %592 = arith.addf %590, %591 : vector<8x128xf32>
    %593 = arith.addi %6, %557 : i32
    %594 = vector.broadcast %593 : i32 to vector<8x1xi32>
    %595 = arith.cmpi sgt, %3, %594 : vector<8x1xi32>
    %596 = vector.shape_cast %595 : vector<8x1xi1> to vector<8x1xi1>
    %597 = vector.broadcast %596 : vector<8x1xi1> to vector<8x128xi1>
    %598 = arith.select %597, %592, %499 : vector<8x128xi1>, vector<8x128xf32>
    %cst_149 = arith.constant 0.000000e+00 : f32
    %599 = vector.shape_cast %595 : vector<8x1xi1> to vector<8x1xi1>
    %600 = vector.broadcast %599 : vector<8x1xi1> to vector<8x128xi1>
    %601 = vector.broadcast %cst_149 : f32 to vector<8x128xf32>
    %602 = arith.select %600, %598, %601 : vector<8x128xi1>, vector<8x128xf32>
    %603 = arith.index_cast %557 : i32 to index
    %c0_150 = arith.constant 0 : index
    %c0_151 = arith.constant 0 : index
    %604 = vector.load %arg7[%603, %c0_150, %c0_151] : memref<8x8x128xf32, #tpu.memory_space<vmem>>, vector<1x8x128xf32>
    %605 = vector.shape_cast %604 : vector<1x8x128xf32> to vector<8x128xf32>
    %606 = vector.shape_cast %602 : vector<8x128xf32> to vector<1x8x128xf32>
    tpu.vector_store %arg7[%603, %c0_150, %c0_151], %606 {strides = array<i32>} : memref<8x8x128xf32, #tpu.memory_space<vmem>>, vector<1x8x128xf32>,
    %c6_i32 = arith.constant 6 : i32
    %607 = arith.index_cast %c6_i32 : i32 to index
    %c0_152 = arith.constant 0 : index
    %c0_153 = arith.constant 0 : index
    %608 = vector.load %arg2[%607, %c0_152, %c0_153] : memref<8x8x384xf32, #tpu.memory_space<vmem>>, vector<1x8x384xf32>
    %609 = vector.shape_cast %608 : vector<1x8x384xf32> to vector<8x384xf32>
    %610 = arith.index_cast %c0_i32_13 : i32 to index
    %c0_154 = arith.constant 0 : index
    %c0_155 = arith.constant 0 : index
    %611 = vector.load %arg10[%610, %c0_154, %c0_155] : memref<2x128x384xf32, #tpu.memory_space<vmem>>, vector<1x128x384xf32>
    %612 = vector.shape_cast %611 : vector<1x128x384xf32> to vector<128x384xf32>
    %cst_156 = arith.constant dense<0.000000e+00> : vector<8x384xf32>
    %613 = tpu.matmul %548, %612, %cst_156 {dimension_numbers = #tpu.dot_dimension_numbers<[1], [0], [0], [1], [0, 0, 1, 1], [], []>} : vector<8x128xf32>, vector<128x384xf32>, vector<8x384xf32> -> vector<8x384xf32>
    %614 = vector.extract_strided_slice %609 {offsets = [0, 0], sizes = [8, 128], strides = [1, 1]} : vector<8x384xf32> to vector<8x128xf32>
    %615 = vector.extract_strided_slice %613 {offsets = [0, 0], sizes = [8, 128], strides = [1, 1]} : vector<8x384xf32> to vector<8x128xf32>
    %616 = arith.addf %614, %615 : vector<8x128xf32>
    %617 = arith.negf %616 : vector<8x128xf32>
    %618 = math.exp %617 : vector<8x128xf32>
    %cst_157 = arith.constant 1.000000e+00 : f32
    %619 = vector.broadcast %cst_157 : f32 to vector<8x128xf32>
    %620 = arith.addf %619, %618 : vector<8x128xf32>
    %621 = arith.divf %619, %620 : vector<8x128xf32>
    %622 = vector.extract_strided_slice %609 {offsets = [0, 128], sizes = [8, 128], strides = [1, 1]} : vector<8x384xf32> to vector<8x128xf32>
    %623 = vector.extract_strided_slice %613 {offsets = [0, 128], sizes = [8, 128], strides = [1, 1]} : vector<8x384xf32> to vector<8x128xf32>
    %624 = arith.addf %622, %623 : vector<8x128xf32>
    %625 = arith.negf %624 : vector<8x128xf32>
    %626 = math.exp %625 : vector<8x128xf32>
    %cst_158 = arith.constant 1.000000e+00 : f32
    %627 = vector.broadcast %cst_158 : f32 to vector<8x128xf32>
    %628 = arith.addf %627, %626 : vector<8x128xf32>
    %629 = arith.divf %627, %628 : vector<8x128xf32>
    %630 = vector.extract_strided_slice %609 {offsets = [0, 256], sizes = [8, 128], strides = [1, 1]} : vector<8x384xf32> to vector<8x128xf32>
    %631 = vector.extract_strided_slice %613 {offsets = [0, 256], sizes = [8, 128], strides = [1, 1]} : vector<8x384xf32> to vector<8x128xf32>
    %632 = vector.broadcast %8 : vector<1x128xf32> to vector<8x128xf32>
    %633 = arith.addf %631, %632 : vector<8x128xf32>
    %634 = arith.mulf %621, %633 : vector<8x128xf32>
    %635 = arith.addf %630, %634 : vector<8x128xf32>
    %636 = math.tanh %635 : vector<8x128xf32>
    %cst_159 = arith.constant 1.000000e+00 : f32
    %637 = vector.broadcast %cst_159 : f32 to vector<8x128xf32>
    %638 = arith.subf %637, %629 : vector<8x128xf32>
    %639 = arith.mulf %638, %636 : vector<8x128xf32>
    %640 = arith.mulf %629, %548 : vector<8x128xf32>
    %641 = arith.addf %639, %640 : vector<8x128xf32>
    %642 = arith.addi %4, %c6_i32 : i32
    %643 = vector.broadcast %642 : i32 to vector<8x1xi32>
    %644 = arith.cmpi sgt, %3, %643 : vector<8x1xi32>
    %645 = vector.shape_cast %644 : vector<8x1xi1> to vector<8x1xi1>
    %646 = vector.broadcast %645 : vector<8x1xi1> to vector<8x128xi1>
    %647 = arith.select %646, %641, %548 : vector<8x128xi1>, vector<8x128xf32>
    %cst_160 = arith.constant 0.000000e+00 : f32
    %648 = vector.shape_cast %644 : vector<8x1xi1> to vector<8x1xi1>
    %649 = vector.broadcast %648 : vector<8x1xi1> to vector<8x128xi1>
    %650 = vector.broadcast %cst_160 : f32 to vector<8x128xf32>
    %651 = arith.select %649, %647, %650 : vector<8x128xi1>, vector<8x128xf32>
    %652 = arith.index_cast %c6_i32 : i32 to index
    %c0_161 = arith.constant 0 : index
    %c0_162 = arith.constant 0 : index
    %653 = vector.load %arg6[%652, %c0_161, %c0_162] : memref<8x8x128xf32, #tpu.memory_space<vmem>>, vector<1x8x128xf32>
    %654 = vector.shape_cast %653 : vector<1x8x128xf32> to vector<8x128xf32>
    %655 = vector.shape_cast %651 : vector<8x128xf32> to vector<1x8x128xf32>
    tpu.vector_store %arg6[%652, %c0_161, %c0_162], %655 {strides = array<i32>} : memref<8x8x128xf32, #tpu.memory_space<vmem>>, vector<1x8x128xf32>,
    %c7_i32_163 = arith.constant 7 : i32
    %656 = arith.subi %c7_i32_163, %c6_i32 : i32
    %657 = arith.index_cast %656 : i32 to index
    %c0_164 = arith.constant 0 : index
    %c0_165 = arith.constant 0 : index
    %658 = vector.load %arg3[%657, %c0_164, %c0_165] : memref<8x8x384xf32, #tpu.memory_space<vmem>>, vector<1x8x384xf32>
    %659 = vector.shape_cast %658 : vector<1x8x384xf32> to vector<8x384xf32>
    %660 = arith.index_cast %c1_i32 : i32 to index
    %c0_166 = arith.constant 0 : index
    %c0_167 = arith.constant 0 : index
    %661 = vector.load %arg10[%660, %c0_166, %c0_167] : memref<2x128x384xf32, #tpu.memory_space<vmem>>, vector<1x128x384xf32>
    %662 = vector.shape_cast %661 : vector<1x128x384xf32> to vector<128x384xf32>
    %cst_168 = arith.constant dense<0.000000e+00> : vector<8x384xf32>
    %663 = tpu.matmul %598, %662, %cst_168 {dimension_numbers = #tpu.dot_dimension_numbers<[1], [0], [0], [1], [0, 0, 1, 1], [], []>} : vector<8x128xf32>, vector<128x384xf32>, vector<8x384xf32> -> vector<8x384xf32>
    %664 = vector.extract_strided_slice %659 {offsets = [0, 0], sizes = [8, 128], strides = [1, 1]} : vector<8x384xf32> to vector<8x128xf32>
    %665 = vector.extract_strided_slice %663 {offsets = [0, 0], sizes = [8, 128], strides = [1, 1]} : vector<8x384xf32> to vector<8x128xf32>
    %666 = arith.addf %664, %665 : vector<8x128xf32>
    %667 = arith.negf %666 : vector<8x128xf32>
    %668 = math.exp %667 : vector<8x128xf32>
    %cst_169 = arith.constant 1.000000e+00 : f32
    %669 = vector.broadcast %cst_169 : f32 to vector<8x128xf32>
    %670 = arith.addf %669, %668 : vector<8x128xf32>
    %671 = arith.divf %669, %670 : vector<8x128xf32>
    %672 = vector.extract_strided_slice %659 {offsets = [0, 128], sizes = [8, 128], strides = [1, 1]} : vector<8x384xf32> to vector<8x128xf32>
    %673 = vector.extract_strided_slice %663 {offsets = [0, 128], sizes = [8, 128], strides = [1, 1]} : vector<8x384xf32> to vector<8x128xf32>
    %674 = arith.addf %672, %673 : vector<8x128xf32>
    %675 = arith.negf %674 : vector<8x128xf32>
    %676 = math.exp %675 : vector<8x128xf32>
    %cst_170 = arith.constant 1.000000e+00 : f32
    %677 = vector.broadcast %cst_170 : f32 to vector<8x128xf32>
    %678 = arith.addf %677, %676 : vector<8x128xf32>
    %679 = arith.divf %677, %678 : vector<8x128xf32>
    %680 = vector.extract_strided_slice %659 {offsets = [0, 256], sizes = [8, 128], strides = [1, 1]} : vector<8x384xf32> to vector<8x128xf32>
    %681 = vector.extract_strided_slice %663 {offsets = [0, 256], sizes = [8, 128], strides = [1, 1]} : vector<8x384xf32> to vector<8x128xf32>
    %682 = vector.broadcast %10 : vector<1x128xf32> to vector<8x128xf32>
    %683 = arith.addf %681, %682 : vector<8x128xf32>
    %684 = arith.mulf %671, %683 : vector<8x128xf32>
    %685 = arith.addf %680, %684 : vector<8x128xf32>
    %686 = math.tanh %685 : vector<8x128xf32>
    %cst_171 = arith.constant 1.000000e+00 : f32
    %687 = vector.broadcast %cst_171 : f32 to vector<8x128xf32>
    %688 = arith.subf %687, %679 : vector<8x128xf32>
    %689 = arith.mulf %688, %686 : vector<8x128xf32>
    %690 = arith.mulf %679, %598 : vector<8x128xf32>
    %691 = arith.addf %689, %690 : vector<8x128xf32>
    %692 = arith.addi %6, %656 : i32
    %693 = vector.broadcast %692 : i32 to vector<8x1xi32>
    %694 = arith.cmpi sgt, %3, %693 : vector<8x1xi32>
    %695 = vector.shape_cast %694 : vector<8x1xi1> to vector<8x1xi1>
    %696 = vector.broadcast %695 : vector<8x1xi1> to vector<8x128xi1>
    %697 = arith.select %696, %691, %598 : vector<8x128xi1>, vector<8x128xf32>
    %cst_172 = arith.constant 0.000000e+00 : f32
    %698 = vector.shape_cast %694 : vector<8x1xi1> to vector<8x1xi1>
    %699 = vector.broadcast %698 : vector<8x1xi1> to vector<8x128xi1>
    %700 = vector.broadcast %cst_172 : f32 to vector<8x128xf32>
    %701 = arith.select %699, %697, %700 : vector<8x128xi1>, vector<8x128xf32>
    %702 = arith.index_cast %656 : i32 to index
    %c0_173 = arith.constant 0 : index
    %c0_174 = arith.constant 0 : index
    %703 = vector.load %arg7[%702, %c0_173, %c0_174] : memref<8x8x128xf32, #tpu.memory_space<vmem>>, vector<1x8x128xf32>
    %704 = vector.shape_cast %703 : vector<1x8x128xf32> to vector<8x128xf32>
    %705 = vector.shape_cast %701 : vector<8x128xf32> to vector<1x8x128xf32>
    tpu.vector_store %arg7[%702, %c0_173, %c0_174], %705 {strides = array<i32>} : memref<8x8x128xf32, #tpu.memory_space<vmem>>, vector<1x8x128xf32>,
    %c7_i32_175 = arith.constant 7 : i32
    %706 = arith.index_cast %c7_i32_175 : i32 to index
    %c0_176 = arith.constant 0 : index
    %c0_177 = arith.constant 0 : index
    %707 = vector.load %arg2[%706, %c0_176, %c0_177] : memref<8x8x384xf32, #tpu.memory_space<vmem>>, vector<1x8x384xf32>
    %708 = vector.shape_cast %707 : vector<1x8x384xf32> to vector<8x384xf32>
    %709 = arith.index_cast %c0_i32_13 : i32 to index
    %c0_178 = arith.constant 0 : index
    %c0_179 = arith.constant 0 : index
    %710 = vector.load %arg10[%709, %c0_178, %c0_179] : memref<2x128x384xf32, #tpu.memory_space<vmem>>, vector<1x128x384xf32>
    %711 = vector.shape_cast %710 : vector<1x128x384xf32> to vector<128x384xf32>
    %cst_180 = arith.constant dense<0.000000e+00> : vector<8x384xf32>
    %712 = tpu.matmul %647, %711, %cst_180 {dimension_numbers = #tpu.dot_dimension_numbers<[1], [0], [0], [1], [0, 0, 1, 1], [], []>} : vector<8x128xf32>, vector<128x384xf32>, vector<8x384xf32> -> vector<8x384xf32>
    %713 = vector.extract_strided_slice %708 {offsets = [0, 0], sizes = [8, 128], strides = [1, 1]} : vector<8x384xf32> to vector<8x128xf32>
    %714 = vector.extract_strided_slice %712 {offsets = [0, 0], sizes = [8, 128], strides = [1, 1]} : vector<8x384xf32> to vector<8x128xf32>
    %715 = arith.addf %713, %714 : vector<8x128xf32>
    %716 = arith.negf %715 : vector<8x128xf32>
    %717 = math.exp %716 : vector<8x128xf32>
    %cst_181 = arith.constant 1.000000e+00 : f32
    %718 = vector.broadcast %cst_181 : f32 to vector<8x128xf32>
    %719 = arith.addf %718, %717 : vector<8x128xf32>
    %720 = arith.divf %718, %719 : vector<8x128xf32>
    %721 = vector.extract_strided_slice %708 {offsets = [0, 128], sizes = [8, 128], strides = [1, 1]} : vector<8x384xf32> to vector<8x128xf32>
    %722 = vector.extract_strided_slice %712 {offsets = [0, 128], sizes = [8, 128], strides = [1, 1]} : vector<8x384xf32> to vector<8x128xf32>
    %723 = arith.addf %721, %722 : vector<8x128xf32>
    %724 = arith.negf %723 : vector<8x128xf32>
    %725 = math.exp %724 : vector<8x128xf32>
    %cst_182 = arith.constant 1.000000e+00 : f32
    %726 = vector.broadcast %cst_182 : f32 to vector<8x128xf32>
    %727 = arith.addf %726, %725 : vector<8x128xf32>
    %728 = arith.divf %726, %727 : vector<8x128xf32>
    %729 = vector.extract_strided_slice %708 {offsets = [0, 256], sizes = [8, 128], strides = [1, 1]} : vector<8x384xf32> to vector<8x128xf32>
    %730 = vector.extract_strided_slice %712 {offsets = [0, 256], sizes = [8, 128], strides = [1, 1]} : vector<8x384xf32> to vector<8x128xf32>
    %731 = vector.broadcast %8 : vector<1x128xf32> to vector<8x128xf32>
    %732 = arith.addf %730, %731 : vector<8x128xf32>
    %733 = arith.mulf %720, %732 : vector<8x128xf32>
    %734 = arith.addf %729, %733 : vector<8x128xf32>
    %735 = math.tanh %734 : vector<8x128xf32>
    %cst_183 = arith.constant 1.000000e+00 : f32
    %736 = vector.broadcast %cst_183 : f32 to vector<8x128xf32>
    %737 = arith.subf %736, %728 : vector<8x128xf32>
    %738 = arith.mulf %737, %735 : vector<8x128xf32>
    %739 = arith.mulf %728, %647 : vector<8x128xf32>
    %740 = arith.addf %738, %739 : vector<8x128xf32>
    %741 = arith.addi %4, %c7_i32_175 : i32
    %742 = vector.broadcast %741 : i32 to vector<8x1xi32>
    %743 = arith.cmpi sgt, %3, %742 : vector<8x1xi32>
    %744 = vector.shape_cast %743 : vector<8x1xi1> to vector<8x1xi1>
    %745 = vector.broadcast %744 : vector<8x1xi1> to vector<8x128xi1>
    %746 = arith.select %745, %740, %647 : vector<8x128xi1>, vector<8x128xf32>
    %cst_184 = arith.constant 0.000000e+00 : f32
    %747 = vector.shape_cast %743 : vector<8x1xi1> to vector<8x1xi1>
    %748 = vector.broadcast %747 : vector<8x1xi1> to vector<8x128xi1>
    %749 = vector.broadcast %cst_184 : f32 to vector<8x128xf32>
    %750 = arith.select %748, %746, %749 : vector<8x128xi1>, vector<8x128xf32>
    %751 = arith.index_cast %c7_i32_175 : i32 to index
    %c0_185 = arith.constant 0 : index
    %c0_186 = arith.constant 0 : index
    %752 = vector.load %arg6[%751, %c0_185, %c0_186] : memref<8x8x128xf32, #tpu.memory_space<vmem>>, vector<1x8x128xf32>
    %753 = vector.shape_cast %752 : vector<1x8x128xf32> to vector<8x128xf32>
    %754 = vector.shape_cast %750 : vector<8x128xf32> to vector<1x8x128xf32>
    tpu.vector_store %arg6[%751, %c0_185, %c0_186], %754 {strides = array<i32>} : memref<8x8x128xf32, #tpu.memory_space<vmem>>, vector<1x8x128xf32>,
    %c7_i32_187 = arith.constant 7 : i32
    %755 = arith.subi %c7_i32_187, %c7_i32_175 : i32
    %756 = arith.index_cast %755 : i32 to index
    %c0_188 = arith.constant 0 : index
    %c0_189 = arith.constant 0 : index
    %757 = vector.load %arg3[%756, %c0_188, %c0_189] : memref<8x8x384xf32, #tpu.memory_space<vmem>>, vector<1x8x384xf32>
    %758 = vector.shape_cast %757 : vector<1x8x384xf32> to vector<8x384xf32>
    %759 = arith.index_cast %c1_i32 : i32 to index
    %c0_190 = arith.constant 0 : index
    %c0_191 = arith.constant 0 : index
    %760 = vector.load %arg10[%759, %c0_190, %c0_191] : memref<2x128x384xf32, #tpu.memory_space<vmem>>, vector<1x128x384xf32>
    %761 = vector.shape_cast %760 : vector<1x128x384xf32> to vector<128x384xf32>
    %cst_192 = arith.constant dense<0.000000e+00> : vector<8x384xf32>
    %762 = tpu.matmul %697, %761, %cst_192 {dimension_numbers = #tpu.dot_dimension_numbers<[1], [0], [0], [1], [0, 0, 1, 1], [], []>} : vector<8x128xf32>, vector<128x384xf32>, vector<8x384xf32> -> vector<8x384xf32>
    %763 = vector.extract_strided_slice %758 {offsets = [0, 0], sizes = [8, 128], strides = [1, 1]} : vector<8x384xf32> to vector<8x128xf32>
    %764 = vector.extract_strided_slice %762 {offsets = [0, 0], sizes = [8, 128], strides = [1, 1]} : vector<8x384xf32> to vector<8x128xf32>
    %765 = arith.addf %763, %764 : vector<8x128xf32>
    %766 = arith.negf %765 : vector<8x128xf32>
    %767 = math.exp %766 : vector<8x128xf32>
    %cst_193 = arith.constant 1.000000e+00 : f32
    %768 = vector.broadcast %cst_193 : f32 to vector<8x128xf32>
    %769 = arith.addf %768, %767 : vector<8x128xf32>
    %770 = arith.divf %768, %769 : vector<8x128xf32>
    %771 = vector.extract_strided_slice %758 {offsets = [0, 128], sizes = [8, 128], strides = [1, 1]} : vector<8x384xf32> to vector<8x128xf32>
    %772 = vector.extract_strided_slice %762 {offsets = [0, 128], sizes = [8, 128], strides = [1, 1]} : vector<8x384xf32> to vector<8x128xf32>
    %773 = arith.addf %771, %772 : vector<8x128xf32>
    %774 = arith.negf %773 : vector<8x128xf32>
    %775 = math.exp %774 : vector<8x128xf32>
    %cst_194 = arith.constant 1.000000e+00 : f32
    %776 = vector.broadcast %cst_194 : f32 to vector<8x128xf32>
    %777 = arith.addf %776, %775 : vector<8x128xf32>
    %778 = arith.divf %776, %777 : vector<8x128xf32>
    %779 = vector.extract_strided_slice %758 {offsets = [0, 256], sizes = [8, 128], strides = [1, 1]} : vector<8x384xf32> to vector<8x128xf32>
    %780 = vector.extract_strided_slice %762 {offsets = [0, 256], sizes = [8, 128], strides = [1, 1]} : vector<8x384xf32> to vector<8x128xf32>
    %781 = vector.broadcast %10 : vector<1x128xf32> to vector<8x128xf32>
    %782 = arith.addf %780, %781 : vector<8x128xf32>
    %783 = arith.mulf %770, %782 : vector<8x128xf32>
    %784 = arith.addf %779, %783 : vector<8x128xf32>
    %785 = math.tanh %784 : vector<8x128xf32>
    %cst_195 = arith.constant 1.000000e+00 : f32
    %786 = vector.broadcast %cst_195 : f32 to vector<8x128xf32>
    %787 = arith.subf %786, %778 : vector<8x128xf32>
    %788 = arith.mulf %787, %785 : vector<8x128xf32>
    %789 = arith.mulf %778, %697 : vector<8x128xf32>
    %790 = arith.addf %788, %789 : vector<8x128xf32>
    %791 = arith.addi %6, %755 : i32
    %792 = vector.broadcast %791 : i32 to vector<8x1xi32>
    %793 = arith.cmpi sgt, %3, %792 : vector<8x1xi32>
    %794 = vector.shape_cast %793 : vector<8x1xi1> to vector<8x1xi1>
    %795 = vector.broadcast %794 : vector<8x1xi1> to vector<8x128xi1>
    %796 = arith.select %795, %790, %697 : vector<8x128xi1>, vector<8x128xf32>
    %cst_196 = arith.constant 0.000000e+00 : f32
    %797 = vector.shape_cast %793 : vector<8x1xi1> to vector<8x1xi1>
    %798 = vector.broadcast %797 : vector<8x1xi1> to vector<8x128xi1>
    %799 = vector.broadcast %cst_196 : f32 to vector<8x128xf32>
    %800 = arith.select %798, %796, %799 : vector<8x128xi1>, vector<8x128xf32>
    %801 = arith.index_cast %755 : i32 to index
    %c0_197 = arith.constant 0 : index
    %c0_198 = arith.constant 0 : index
    %802 = vector.load %arg7[%801, %c0_197, %c0_198] : memref<8x8x128xf32, #tpu.memory_space<vmem>>, vector<1x8x128xf32>
    %803 = vector.shape_cast %802 : vector<1x8x128xf32> to vector<8x128xf32>
    %804 = vector.shape_cast %800 : vector<8x128xf32> to vector<1x8x128xf32>
    tpu.vector_store %arg7[%801, %c0_197, %c0_198], %804 {strides = array<i32>} : memref<8x8x128xf32, #tpu.memory_space<vmem>>, vector<1x8x128xf32>,
    %c8_i32_199 = arith.constant 8 : i32
    %c0_200 = arith.constant 0 : index
    %c0_201 = arith.constant 0 : index
    %805 = vector.load %arg8[%c0_200, %c0_201] : memref<8x128xf32, #tpu.memory_space<vmem>>, vector<8x128xf32>
    tpu.vector_store %arg8[%c0_200, %c0_201], %746 {strides = array<i32>} : memref<8x128xf32, #tpu.memory_space<vmem>>, vector<8x128xf32>,
    %c0_202 = arith.constant 0 : index
    %c0_203 = arith.constant 0 : index
    %806 = vector.load %arg9[%c0_202, %c0_203] : memref<8x128xf32, #tpu.memory_space<vmem>>, vector<8x128xf32>
    tpu.vector_store %arg9[%c0_202, %c0_203], %796 {strides = array<i32>} : memref<8x128xf32, #tpu.memory_space<vmem>>, vector<8x128xf32>,
    return
  }
  func.func @transform_0(%arg0: i32) -> (i32, i32) {
    %c0_i32 = arith.constant 0 : i32
    %c0_i32_0 = arith.constant 0 : i32
    %c0_i32_1 = arith.constant 0 : i32
    return %c0_i32, %c0_i32_0 : i32, i32
  }
  func.func @transform_1(%arg0: i32) -> (i32, i32, i32) {
    %c0_i32 = arith.constant 0 : i32
    %c0_i32_0 = arith.constant 0 : i32
    %c0_i32_1 = arith.constant 0 : i32
    return %arg0, %c0_i32, %c0_i32_0 : i32, i32, i32
  }
  func.func @transform_2(%arg0: i32) -> (i32, i32, i32) {
    %c0_i32 = arith.constant 0 : i32
    %0 = arith.subi %c0_i32, %arg0 : i32
    %c0_i32_0 = arith.constant 0 : i32
    %c0_i32_1 = arith.constant 0 : i32
    %c0_i32_2 = arith.constant 0 : i32
    return %0, %c0_i32_0, %c0_i32_1 : i32, i32, i32
  }
  func.func @transform_3(%arg0: i32) -> (i32, i32, i32) {
    %c0_i32 = arith.constant 0 : i32
    %c0_i32_0 = arith.constant 0 : i32
    %c0_i32_1 = arith.constant 0 : i32
    %c0_i32_2 = arith.constant 0 : i32
    return %c0_i32, %c0_i32_0, %c0_i32_1 : i32, i32, i32
  }
  func.func @transform_5(%arg0: i32) -> (i32, i32, i32) {
    %c0_i32 = arith.constant 0 : i32
    %c0_i32_0 = arith.constant 0 : i32
    %c0_i32_1 = arith.constant 0 : i32
    return %arg0, %c0_i32, %c0_i32_0 : i32, i32, i32
  }
  func.func @transform_6(%arg0: i32) -> (i32, i32, i32) {
    %c0_i32 = arith.constant 0 : i32
    %0 = arith.subi %c0_i32, %arg0 : i32
    %c0_i32_0 = arith.constant 0 : i32
    %c0_i32_1 = arith.constant 0 : i32
    %c0_i32_2 = arith.constant 0 : i32
    return %0, %c0_i32_0, %c0_i32_1 : i32, i32, i32
  }
}

</mosaic_0001>

<bundles_post_ra>
// kernel: tpu_custom_call.1
= control target key start
LH: loop header
LB: loop body
LE: loop exit
PB: predicated region body
PF: predicated region fallthrough
CT: control target
= control target key end

     0   :  { %12 = vsyncpa [#allocation7], 0  ;;  %s7091_s0 = inlined_call_operand.vmem [shape: s32[8,1], index: 0, kind: input, shape index: {}]   ;;  %s7092_s1 = inlined_call_operand.hbm [shape: f32[8,8,384], index: 1, kind: input, shape index: {}]   ;;  %s7093_s2 = inlined_call_operand.hbm [shape: f32[8,8,384], index: 2, kind: input, shape index: {}]   ;;  %s7094_s3 = inlined_call_operand.vmem [shape: f32[2,1,128], index: 3, kind: input, shape index: {}]   ;;  %s7095_s4 = inlined_call_operand.hbm [shape: f32[2,128,384], index: 4, kind: input, shape index: {}]   ;;  %s7096_s5 = inlined_call_operand.hbm [shape: f32[8,8,128], index: 5, kind: output, shape index: {0}]   ;;  %s7097_s6 = inlined_call_operand.hbm [shape: f32[8,8,128], index: 6, kind: output, shape index: {1}]  }
   0x1   :  { %13 = vsyncpa [#allocation10], 0 }
   0x2   :  { %14 = vsyncpa [#allocation8], 0 }
   0x3   :  { %15 = vsyncpa [#allocation13], 0  ;;  %s5846_s21 = smov [#allocation6]   ;;  %s5726_s25 = scalar_lea.hbm %s7092_s1, 3072 }
   0x4   :  { %s23_s22 = sshll.u32 %s5846_s21, 4  ;;  %p5727_p0 = scmp.ne.s32.totalorder %s7092_s1, %s5726_s25  ;;  %s24_s22 = int_to_ptr.vmem [resolvable:$true] %s23_s22 }
   0x5   :  { %p5730_p1 = scmp.lt.u32.totalorder %s5726_s25, %s7092_s1 }
   0x7   :  { %p5732_p2 = pnand %p5730_p1, %p5727_p0 }
   0x9   :  { %5735 = shalt.err (!%p5732_p2)
}
   0xa   :  { %s5736_s30 = scalar_lea.vmem %s24_s22, 3072  ;;  %p5741_p4 = scmp.lt.s32.totalorder %s24_s22, %s24_s22 }
   0xb   :  { %p5737_p3 = scmp.ne.s32.totalorder %s24_s22, %s5736_s30  ;;  %p5742_p5 = scmp.lt.s32.totalorder %s5736_s30, %s5736_s30 }
   0xd   :  { %p5743_p6 = por %p5742_p5, %p5741_p4 }
   0xf   :  { %p5744_p7 = pnand %p5743_p6, %p5737_p3 }
  0x11   :  { %5747 = shalt.err (!%p5744_p7)
}
  0x12   :  { %s5847_s7 = smov 384   ;;  %s5848_s8 = smov 24  }
  0x13   :  { %29 = dma.hbm_to_vmem [thread:$0]  %s7092_s1, 3072, %s24_s22, [#allocation7], %s5847_s7, %s5847_s7, %s5848_s8  }
  0x14   :  { %s5849_s11 = smov [#allocation9]   ;;  %s5748_s15 = scalar_lea.hbm %s7093_s2, 3072 }
  0x15   :  { %s40_s12 = sshll.u32 %s5849_s11, 4  ;;  %p5749_p8 = scmp.ne.s32.totalorder %s7093_s2, %s5748_s15  ;;  %s41_s12 = int_to_ptr.vmem [resolvable:$true] %s40_s12 }
  0x16   :  { %p5752_p9 = scmp.lt.u32.totalorder %s5748_s15, %s7093_s2 }
  0x18   :  { %p5754_p10 = pnand %p5752_p9, %p5749_p8 }
  0x1a   :  { %5757 = shalt.err (!%p5754_p10)
}
  0x1b   :  { %s5758_s20 = scalar_lea.vmem %s41_s12, 3072  ;;  %p5763_p12 = scmp.lt.s32.totalorder %s41_s12, %s41_s12 }
  0x1c   :  { %p5759_p11 = scmp.ne.s32.totalorder %s41_s12, %s5758_s20  ;;  %p5764_p13 = scmp.lt.s32.totalorder %s5758_s20, %s5758_s20 }
  0x1e   :  { %p5765_p0 = por %p5764_p13, %p5763_p12 }
  0x20   :  { %p5766_p1 = pnand %p5765_p0, %p5759_p11 }
  0x22   :  { %5769 = shalt.err (!%p5766_p1)
}
  0x23   :  { %46 = dma.hbm_to_vmem [thread:$0]  %s7093_s2, 3072, %s41_s12, [#allocation10], %s5847_s7, %s5847_s7, %s5848_s8  }
  0x24   :  { %5836 = dma.done.wait [#allocation7], 3072  }
  0x25   :  { %5837 = vsyncadd [#allocation7], 4294964224 }
  0x26   :  { %5838 = dma.done.wait [#allocation10], 3072  }
  0x27   :  { %5839 = vsyncadd [#allocation10], 4294964224  ;;  %s5850_s22 = smov [#allocation4]   ;;  %s5770_s26 = scalar_lea.hbm %s7095_s4, 12288 }
  0x28   :  { %s70_s23 = sshll.u32 %s5850_s22, 4  ;;  %p5771_p2 = scmp.ne.s32.totalorder %s7095_s4, %s5770_s26  ;;  %s71_s23 = int_to_ptr.vmem [resolvable:$true] %s70_s23 }
  0x29   :  { %p5774_p3 = scmp.lt.u32.totalorder %s5770_s26, %s7095_s4 }
  0x2b   :  { %p5776_p4 = pnand %p5774_p3, %p5771_p2 }
  0x2d   :  { %5779 = shalt.err (!%p5776_p4)  }
  0x2e   :  { %s5780_s2 = scalar_lea.vmem %s71_s23, 12288  ;;  %p5785_p6 = scmp.lt.s32.totalorder %s71_s23, %s71_s23 }
  0x2f   :  { %p5781_p5 = scmp.ne.s32.totalorder %s71_s23, %s5780_s2  ;;  %p5786_p7 = scmp.lt.s32.totalorder %s5780_s2, %s5780_s2 }
  0x31   :  { %p5787_p8 = por %p5786_p7, %p5785_p6 }
  0x33   :  { %p5788_p9 = pnand %p5787_p8, %p5781_p5 }
  0x35   :  { %5791 = shalt.err (!%p5788_p9)  }
  0x36   :  { %73 = dma.hbm_to_vmem [thread:$0]  %s7095_s4, 12288, %s71_s23, [#allocation5] }
  0x37   :  { %5840 = dma.done.wait [#allocation5], 12288 }
  0x38   :  { %5841 = vsyncadd [#allocation5], 4294955008  ;;  %v5851_v0 = vmov 0.0|0.0   ;;  %v7098_v1 = vmov 0.0   ;;  %vm5853_vm0 = vmmov 0   ;;  %v5854_v2 = vmov 0  }
  0x39   :  { %4683 = vmatprep.subr.bf16.mxu1 %v5851_v0  ;;  %205 = vmatprep.mubr.f32.mxu0 %v7098_v1  ;;  %v94_v3 = vld [vmem:[#allocation4 + $0x8] sm:$0xff]  ;;  %v97_v4 = vld [vmem:[#allocation4 + $0x20] sm:$0xff]  ;;  %v96_v7 = vld [vmem:[#allocation4 + $0x18] sm:$0xff] }
  0x3a   :  { %4123 = vmatprep.mubr.msk.f32.mxu1 %vm5853_vm0, %v7098_v1  ;;  %5560 = vset.pattern.permute.xlu0 %v5854_v2  ;;  %v93_v5 = vld [vmem:[#allocation4] sm:$0xff]  ;;  %v5936_v6 = vpack.c.bf16 %v97_v4, %v94_v3  ;;  %v100_v8 = vld [vmem:[#allocation4 + $0x38] sm:$0xff]  ;;  %v103_v9 = vld [vmem:[#allocation4 + $0x50] sm:$0xff] }
  0x3b   :  { %5561 = vset.pattern.permute.xlu1 %v5854_v2  ;;  %v5938_v10 = vpack.c.bf16 %v96_v7, %v93_v5  ;;  %v5940_v11 = vpack.c.bf16 %v103_v9, %v100_v8  ;;  %v99_v12 = vld [vmem:[#allocation4 + $0x30] sm:$0xff]  ;;  %v102_v13 = vld [vmem:[#allocation4 + $0x48] sm:$0xff]  ;;  %v109_v15 = vld [vmem:[#allocation4 + $0x80] sm:$0xff] }
  0x3c   :  { %v106_v14 = vld [vmem:[#allocation4 + $0x68] sm:$0xff]  ;;  %4652 = vmatprep.subr.bf16.mxu0 %v5936_v6  ;;  %v5944_v16 = vpack.c.bf16 %v102_v13, %v99_v12  ;;  %v105_v18 = vld [vmem:[#allocation4 + $0x60] sm:$0xff]  ;;  %v108_v19 = vld [vmem:[#allocation4 + $0x78] sm:$0xff] }
  0x3d   :  { %4654 = vmatpush1.bf16.msra.mxu0 %v5938_v10  ;;  %v5947_v17 = vpack.c.bf16 %v109_v15, %v106_v14  ;;  %v112_v20 = vld [vmem:[#allocation4 + $0x98] sm:$0xff]  ;;  %v115_v21 = vld [vmem:[#allocation4 + $0xb0] sm:$0xff]  ;;  %v5950_v22 = vpack.c.bf16 %v108_v19, %v105_v18  ;;  %v114_v25 = vld [vmem:[#allocation4 + $0xa8] sm:$0xff] }
  0x3e   :  { %4656 = vmatprep.subr.bf16.mxu0 %v5940_v11  ;;  %v111_v23 = vld [vmem:[#allocation4 + $0x90] sm:$0xff]  ;;  %v5953_v24 = vpack.c.bf16 %v115_v21, %v112_v20  ;;  %v98_v27 = vld [vmem:[#allocation4 + $0x28] sm:$0xff]  ;;  %v121_v29 = vld [vmem:[#allocation4 + $0xe0] sm:$0xff] }
  0x3f   :  { %v95_v26 = vld [vmem:[#allocation4 + $0x10] sm:$0xff]  ;;  %v118_v28 = vld [vmem:[#allocation4 + $0xc8] sm:$0xff]  ;;  %v101_v31 = vld [vmem:[#allocation4 + $0x40] sm:$0xff]  ;;  %v5958_v33 = vpack.c.bf16 %v114_v25, %v111_v23 }
  0x40   :  { %v5955_v30 = vpack.c.bf16 %v98_v27, %v95_v26  ;;  %v104_v32 = vld [vmem:[#allocation4 + $0x58] sm:$0xff]  ;;  %v117_v34 = vld [vmem:[#allocation4 + $0xc0] sm:$0xff]  ;;  %v5964_v36 = vpack.c.bf16 %v121_v29, %v118_v28  ;;  %v107_v38 = vld [vmem:[#allocation4 + $0x70] sm:$0xff] }
  0x41   :  { %4658 = vmatpush1.bf16.msra.mxu0 %v5944_v16  ;;  %v5961_v35 = vpack.c.bf16 %v104_v32, %v101_v31  ;;  %v120_v37 = vld [vmem:[#allocation4 + $0xd8] sm:$0xff]  ;;  %v110_v39 = vld [vmem:[#allocation4 + $0x88] sm:$0xff]  ;;  %v127_v41 = vld [vmem:[#allocation4 + $0x110] sm:$0xff] }
  0x42   :  { %4660 = vmatprep.subr.bf16.mxu0 %v5947_v17  ;;  %4685 = vmatpush3.bf16.msra.mxu1 %v5955_v30  ;;  %v124_v40 = vld [vmem:[#allocation4 + $0xf8] sm:$0xff]  ;;  %v5968_v42 = vpack.c.bf16 %v120_v37, %v117_v34  ;;  %v123_v43 = vld [vmem:[#allocation4 + $0xf0] sm:$0xff]  ;;  %v5971_v44 = vpack.c.bf16 %v110_v39, %v107_v38  ;;  %v126_v46 = vld [vmem:[#allocation4 + $0x108] sm:$0xff] }
  0x43   :  { %4686 = vmatprep.subr.bf16.mxu1 %v5851_v0  ;;  %v5974_v45 = vpack.c.bf16 %v127_v41, %v124_v40  ;;  %v113_v47 = vld [vmem:[#allocation4 + $0xa0] sm:$0xff]  ;;  %v116_v48 = vld [vmem:[#allocation4 + $0xb8] sm:$0xff]  ;;  %v130_v49 = vld [vmem:[#allocation4 + $0x128] sm:$0xff]  ;;  %v5978_v51 = vpack.c.bf16 %v126_v46, %v123_v43 }
  0x44   :  { %v133_v50 = vld [vmem:[#allocation4 + $0x140] sm:$0xff]  ;;  %v5981_v53 = vpack.c.bf16 %v116_v48, %v113_v47  ;;  %v132_v55 = vld [vmem:[#allocation4 + $0x138] sm:$0xff]  ;;  %v119_v56 = vld [vmem:[#allocation4 + $0xd0] sm:$0xff] }
  0x45   :  { %4662 = vmatpush1.bf16.msra.mxu0 %v5950_v22  ;;  %v129_v52 = vld [vmem:[#allocation4 + $0x120] sm:$0xff]  ;;  %v5984_v54 = vpack.c.bf16 %v133_v50, %v130_v49  ;;  %v122_v57 = vld [vmem:[#allocation4 + $0xe8] sm:$0xff]  ;;  %v136_v58 = vld [vmem:[#allocation4 + $0x158] sm:$0xff] }
  0x46   :  { %4664 = vmatprep.subr.bf16.mxu0 %v5953_v24  ;;  %4688 = vmatpush3.bf16.msra.mxu1 %v5961_v35  ;;  %v139_v59 = vld [vmem:[#allocation4 + $0x170] sm:$0xff]  ;;  %v5988_v60 = vpack.c.bf16 %v132_v55, %v129_v52  ;;  %v5991_v62 = vpack.c.bf16 %v122_v57, %v119_v56  ;;  %v138_v3 = vld [vmem:[#allocation4 + $0x168] sm:$0xff]  ;;  %v125_v4 = vld [vmem:[#allocation4 + $0x100] sm:$0xff] }
  0x47   :  { %4689 = vmatprep.subr.bf16.mxu1 %v5851_v0  ;;  %v135_v61 = vld [vmem:[#allocation4 + $0x150] sm:$0xff]  ;;  %v5994_v63 = vpack.c.bf16 %v139_v59, %v136_v58  ;;  %v128_v5 = vld [vmem:[#allocation4 + $0x118] sm:$0xff]  ;;  %v326_v7 = vld [vmem:[#allocation4 + $0x188] sm:$0xff] }
  0x48   :  { %v329_v8 = vld [vmem:[#allocation4 + $0x1a0] sm:$0xff]  ;;  %v5998_v9 = vpack.c.bf16 %v138_v3, %v135_v61  ;;  %v6001_v13 = vpack.c.bf16 %v128_v5, %v125_v4  ;;  %v328_v15 = vld [vmem:[#allocation4 + $0x198] sm:$0xff]  ;;  %v131_v18 = vld [vmem:[#allocation4 + $0x130] sm:$0xff] }
  0x49   :  { %4666 = vmatpush1.bf16.msra.mxu0 %v5958_v33  ;;  %v325_v12 = vld [vmem:[#allocation4 + $0x180] sm:$0xff]  ;;  %v6004_v14 = vpack.c.bf16 %v329_v8, %v326_v7  ;;  %v134_v19 = vld [vmem:[#allocation4 + $0x148] sm:$0xff]  ;;  %v332_v20 = vld [vmem:[#allocation4 + $0x1b8] sm:$0xff] }
  0x4a   :  { %4668 = vmatprep.subr.bf16.mxu0 %v5964_v36  ;;  %4691 = vmatpush3.bf16.msra.mxu1 %v5971_v44  ;;  %v335_v21 = vld [vmem:[#allocation4 + $0x1d0] sm:$0xff]  ;;  %v6008_v23 = vpack.c.bf16 %v328_v15, %v325_v12  ;;  %v6011_v26 = vpack.c.bf16 %v134_v19, %v131_v18  ;;  %v6016_v27 = vld [vmem:[%s7091_s0] sm:$0xff]  ;;  %v334_v29 = vld [vmem:[#allocation4 + $0x1c8] sm:$0xff] }
  0x4b   :  { %4692 = vmatprep.subr.bf16.mxu1 %v5851_v0  ;;  %v331_v25 = vld [vmem:[#allocation4 + $0x1b0] sm:$0xff]  ;;  %v6019_v28 = vpack.c.bf16 %v335_v21, %v332_v20  ;;  %v137_v31 = vld [vmem:[#allocation4 + $0x160] sm:$0xff]  ;;  %v140_v32 = vld [vmem:[#allocation4 + $0x178] sm:$0xff]  ;;  %vm311_vm1 = vcmp.gt.s32.totalorder %v6016_v27, 0  ;;  %vm544_vm2 = vcmp.gt.s32.totalorder %v6016_v27, 7  ;;  %vm1225_vm3 = vcmp.gt.s32.totalorder %v6016_v27, 2 }
  0x4c   :  { %v338_v34 = vld [vmem:[#allocation4 + $0x1e8] sm:$0xff]  ;;  %v341_v37 = vld [vmem:[#allocation4 + $0x200] sm:$0xff]  ;;  %v6025_v38 = vsel %vm311_vm1, 1, %v5854_v2  ;;  %v6030_v39 = vpack.c.bf16 %v334_v29, %v331_v25  ;;  %v6033_v41 = vpack.c.bf16 %v140_v32, %v137_v31  ;;  %v6036_v43 = vsel %vm544_vm2, 1, %v5854_v2  ;;  %v340_v47 = vld [vmem:[#allocation4 + $0x1f8] sm:$0xff] }
  0x4d   :  { %4670 = vmatpush1.bf16.msra.mxu0 %v5968_v42  ;;  %314 = vperm.xlu0 %5560, %v6025_v38   ;;  %v337_v40 = vld [vmem:[#allocation4 + $0x1e0] sm:$0xff]  ;;  %v6039_v46 = vpack.c.bf16 %v341_v37, %v338_v34  ;;  %v327_v48 = vld [vmem:[#allocation4 + $0x190] sm:$0xff]  ;;  %v330_v49 = vld [vmem:[#allocation4 + $0x1a8] sm:$0xff]  ;;  %v6052_v58 = vsel %vm1225_vm3, 1, %v5854_v2  ;;  %vm1679_vm4 = vcmp.gt.s32.totalorder %v6016_v27, 3  ;;  %vm1906_vm5 = vcmp.gt.s32.totalorder %v6016_v27, 4 }
  0x4e   :  { %4672 = vmatprep.subr.bf16.mxu0 %v5974_v45  ;;  %4694 = vmatpush3.bf16.msra.mxu1 %v5981_v53  ;;  %v344_v50 = vld [vmem:[#allocation4 + $0x218] sm:$0xff]  ;;  %v347_v52 = vld [vmem:[#allocation4 + $0x230] sm:$0xff]  ;;  %v6046_v55 = vpack.c.bf16 %v340_v47, %v337_v40  ;;  %v6049_v57 = vpack.c.bf16 %v330_v49, %v327_v48  ;;  %v346_v61 = vld [vmem:[#allocation4 + $0x228] sm:$0xff]  ;;  %v6068_v18 = vsel %vm1679_vm4, 1, %v5854_v2  ;;  %v6085_v40 = vsel %vm1906_vm5, 1, %v5854_v2 }
  0x4f   :  { %4695 = vmatprep.subr.bf16.mxu1 %v5851_v0  ;;  %v343_v56 = vld [vmem:[#allocation4 + $0x210] sm:$0xff]  ;;  %v6055_v59 = vpack.c.bf16 %v347_v52, %v344_v50  ;;  %v333_v3 = vld [vmem:[#allocation4 + $0x1c0] sm:$0xff]  ;;  %v336_v4 = vld [vmem:[#allocation4 + $0x1d8] sm:$0xff]  ;;  %vm1452_vm6 = vcmp.gt.s32.totalorder %v6016_v27, 5  ;;  %vm998_vm7 = vcmp.gt.s32.totalorder %v6016_v27, 6  ;;  %vm771_vm8 = vcmp.gt.s32.totalorder %v6016_v27, 1 }
  0x50   :  { %v350_v5 = vld [vmem:[#allocation4 + $0x248] sm:$0xff]  ;;  %v353_v7 = vld [vmem:[#allocation4 + $0x260] sm:$0xff]  ;;  %v6062_v8 = vpack.c.bf16 %v346_v61, %v343_v56  ;;  %v6065_v15 = vpack.c.bf16 %v336_v4, %v333_v3  ;;  %v352_v20 = vld [vmem:[#allocation4 + $0x258] sm:$0xff] }
  0x51   :  { %4674 = vmatpush1.bf16.msra.mxu0 %v5978_v51  ;;  %547 = vperm.xlu0 %5560, %v6036_v43   ;;  %v349_v12 = vld [vmem:[#allocation4 + $0x240] sm:$0xff]  ;;  %v6071_v19 = vpack.c.bf16 %v353_v7, %v350_v5  ;;  %v339_v21 = vld [vmem:[#allocation4 + $0x1f0] sm:$0xff]  ;;  %v342_v25 = vld [vmem:[#allocation4 + $0x208] sm:$0xff]  ;;  %v6100_v5 = vsel %vm1452_vm6, 1, %v5854_v2 }
  0x52   :  { %4676 = vmatprep.subr.bf16.mxu0 %v5984_v54  ;;  %4697 = vmatpush3.bf16.msra.mxu1 %v5991_v62  ;;  %v356_v29 = vld [vmem:[#allocation4 + $0x278] sm:$0xff]  ;;  %v359_v31 = vld [vmem:[#allocation4 + $0x290] sm:$0xff]  ;;  %v6079_v32 = vpack.c.bf16 %v352_v20, %v349_v12  ;;  %v6082_v37 = vpack.c.bf16 %v342_v25, %v339_v21  ;;  %v358_v48 = vld [vmem:[#allocation4 + $0x288] sm:$0xff] }
  0x53   :  { %4698 = vmatprep.subr.bf16.mxu1 %v5851_v0  ;;  %v355_v34 = vld [vmem:[#allocation4 + $0x270] sm:$0xff]  ;;  %v6088_v47 = vpack.c.bf16 %v359_v31, %v356_v29  ;;  %v345_v49 = vld [vmem:[#allocation4 + $0x220] sm:$0xff]  ;;  %v348_v50 = vld [vmem:[#allocation4 + $0x238] sm:$0xff] }
  0x54   :  { %v362_v52 = vld [vmem:[#allocation4 + $0x2a8] sm:$0xff]  ;;  %v365_v56 = vld [vmem:[#allocation4 + $0x2c0] sm:$0xff]  ;;  %v6094_v61 = vpack.c.bf16 %v358_v48, %v355_v34  ;;  %v6097_v4 = vpack.c.bf16 %v348_v50, %v345_v49  ;;  %v364_v12 = vld [vmem:[#allocation4 + $0x2b8] sm:$0xff]  ;;  %v6115_v49 = vsel %vm998_vm7, 1, %v5854_v2 }
  0x55   :  { %4678 = vmatpush1.bf16.msra.mxu0 %v5988_v60  ;;  %1228 = vperm.xlu0 %5560, %v6052_v58   ;;  %v361_v3 = vld [vmem:[#allocation4 + $0x2a0] sm:$0xff]  ;;  %v6103_v7 = vpack.c.bf16 %v365_v56, %v362_v52  ;;  %v351_v20 = vld [vmem:[#allocation4 + $0x250] sm:$0xff]  ;;  %v354_v21 = vld [vmem:[#allocation4 + $0x268] sm:$0xff] }
  0x56   :  { %4680 = vmatprep.subr.bf16.mxu0 %v5994_v63  ;;  %4700 = vmatpush3.bf16.msra.mxu1 %v6001_v13  ;;  %v368_v25 = vld [vmem:[#allocation4 + $0x2d8] sm:$0xff]  ;;  %v371_v29 = vld [vmem:[#allocation4 + $0x2f0] sm:$0xff]  ;;  %v6109_v31 = vpack.c.bf16 %v364_v12, %v361_v3  ;;  %v6112_v48 = vpack.c.bf16 %v354_v21, %v351_v20  ;;  %v370_v52 = vld [vmem:[#allocation4 + $0x2e8] sm:$0xff] }
  0x57   :  { %4701 = vmatprep.subr.bf16.mxu1 %v5851_v0  ;;  %v367_v34 = vld [vmem:[#allocation4 + $0x2d0] sm:$0xff]  ;;  %v6118_v50 = vpack.c.bf16 %v371_v29, %v368_v25  ;;  %v357_v56 = vld [vmem:[#allocation4 + $0x280] sm:$0xff]  ;;  %v366_v21 = vld [vmem:[#allocation4 + $0x2c8] sm:$0xff] }
  0x58   :  { %v6123_v3 = vpack.c.bf16 %v370_v52, %v367_v34  ;;  %v363_v20 = vld [vmem:[#allocation4 + $0x2b0] sm:$0xff]  ;;  %v369_v29 = vld [vmem:[#allocation4 + $0x2e0] sm:$0xff]  ;;  %v372_v34 = vld [vmem:[#allocation4 + $0x2f8] sm:$0xff] }
  0x59   :  { %4682 = vmatpush1.bf16.msra.mxu0 %v5998_v9  ;;  %1682 = vperm.xlu0 %5560, %v6068_v18   ;;  %v6133_v25 = vpack.c.bf16 %v366_v21, %v363_v20  ;;  %v6139_v52 = vpack.c.bf16 %v372_v34, %v369_v29  ;;  %v322_v27 = vld [vmem:[#allocation9 + $0xb0] sm:$0xff] }
  0x5a   :  { %4708 = vmatprep.subr.bf16.mxu0 %v6004_v14  ;;  %4703 = vmatpush3.bf16.msra.mxu1 %v6011_v26 }
  0x5b   :  { %4704 = vmatprep.subr.bf16.mxu1 %v5851_v0 }
  0x5c   :  { %206 = vmatmul.mubr.f32.vlgmr.msra.gmra.mrb[0].mxu0 %v7098_v1 }
  0x5d   :  { %4710 = vmatpush1.bf16.msra.mxu0 %v6008_v23  ;;  %437 = vmatprep.mubr.f32.mxu0 %v7098_v1 }
  0x5e   :  { %4712 = vmatprep.subr.bf16.mxu0 %v6019_v28  ;;  %4706 = vmatpush3.bf16.msra.mxu1 %v6033_v41 }
  0x5f   :  { %4739 = vmatprep.subr.bf16.mxu1 %v5851_v0  ;;  %2136 = vperm.xlu0 %5560, %v6085_v40  }
  0x61   :  { %4714 = vmatpush1.bf16.msra.mxu0 %v6030_v39  ;;  %4124 = vmatmul.mubr.f32.vlgmr.msra.gmra.mrb[0].mxu1 %v7098_v1 }
  0x62   :  { %4716 = vmatprep.subr.bf16.mxu0 %v6039_v46  ;;  %4741 = vmatpush3.bf16.msra.mxu1 %v6049_v57 }
  0x63   :  { %4742 = vmatprep.subr.bf16.mxu1 %v5851_v0  ;;  %4158 = vmatprep.mubr.msk.f32.mxu1 %vm5853_vm0, %v7098_v1  ;;  %v360_v1 = vld [vmem:[#allocation4 + $0x298] sm:$0xff] }
  0x64   :  { %2590 = vperm.xlu0 %5560, %v6100_v5   ;;  %v6126_v12 = vpack.c.bf16 %v360_v1, %v357_v56  ;;  %v7100_v1 = vmov 0.0  }
  0x65   :  { %4718 = vmatpush1.bf16.msra.mxu0 %v6046_v55 }
  0x66   :  { %4720 = vmatprep.subr.bf16.mxu0 %v6055_v59  ;;  %4744 = vmatpush3.bf16.msra.mxu1 %v6065_v15 }
  0x67   :  { %4745 = vmatprep.subr.bf16.mxu1 %v5851_v0 }
  0x68   :  { %3044 = vperm.xlu0 %5560, %v6115_v49  }
  0x69   :  { %4722 = vmatpush1.bf16.msra.mxu0 %v6062_v8 }
  0x6a   :  { %4724 = vmatprep.subr.bf16.mxu0 %v6071_v19  ;;  %4747 = vmatpush3.bf16.msra.mxu1 %v6082_v37 }
  0x6b   :  { %4748 = vmatprep.subr.bf16.mxu1 %v5851_v0 }
  0x6c   :  { %3498 = vperm.xlu0 %5560, %v6036_v43  }
  0x6d   :  { %4726 = vmatpush1.bf16.msra.mxu0 %v6079_v32 }
  0x6e   :  { %4728 = vmatprep.subr.bf16.mxu0 %v6088_v47  ;;  %4750 = vmatpush3.bf16.msra.mxu1 %v6097_v4 }
  0x6f   :  { %4751 = vmatprep.subr.bf16.mxu1 %v5851_v0 }
  0x71   :  { %4730 = vmatpush1.bf16.msra.mxu0 %v6094_v61 }
  0x72   :  { %4732 = vmatprep.subr.bf16.mxu0 %v6103_v7  ;;  %4753 = vmatpush3.bf16.msra.mxu1 %v6112_v48 }
  0x73   :  { %4754 = vmatprep.subr.bf16.mxu1 %v5851_v0 }
  0x75   :  { %4734 = vmatpush1.bf16.msra.mxu0 %v6109_v31 }
  0x76   :  { %4736 = vmatprep.subr.bf16.mxu0 %v6118_v50  ;;  %4756 = vmatpush3.bf16.msra.mxu1 %v6126_v12 }
  0x77   :  { %4757 = vmatprep.subr.bf16.mxu1 %v5851_v0 }
  0x79   :  { %4738 = vmatpush1.bf16.msra.mxu0 %v6123_v3 }
  0x7a   :  { %4764 = vmatprep.subr.bf16.mxu0 %v5936_v6  ;;  %4759 = vmatpush3.bf16.msra.mxu1 %v6133_v25  ;;  %v772_v6 = vsel %vm771_vm8, 1, %v5854_v2 }
  0x7b   :  { %4760 = vmatprep.subr.bf16.mxu1 %v5851_v0  ;;  %774 = vperm.xlu1 %5561, %v772_v6  }
  0x7c   :  { %438 = vmatmul.mubr.f32.vlgmr.msra.gmra.mrb[2].mxu0 %v7100_v1 }
  0x7d   :  { %4766 = vmatpush1.bf16.msra.mxu0 %v5938_v10  ;;  %670 = vmatprep.mubr.f32.mxu0 %v7100_v1  ;;  %v90_v10 = vld [vmem:[#allocation6] sm:$0xff] }
  0x7e   :  { %4768 = vmatprep.subr.bf16.mxu0 %v5940_v11  ;;  %4762 = vmatpush3.bf16.msra.mxu1 %v6139_v52 }
  0x7f   :  { %4795 = vmatprep.subr.bf16.mxu1 %v5851_v0  ;;  %1001 = vperm.xlu1 %5561, %v6115_v49  }
  0x81   :  { %4770 = vmatpush1.bf16.msra.mxu0 %v5944_v16  ;;  %4159 = vmatmul.mubr.f32.vlgmr.msra.gmra.mrb[2].mxu1 %v7100_v1 }
  0x82   :  { %4772 = vmatprep.subr.bf16.mxu0 %v5947_v17  ;;  %4797 = vmatpush3.bf16.msra.mxu1 %v5955_v30  ;;  %v91_v17 = vld [vmem:[#allocation6 + $0x8] sm:$0xff] }
  0x83   :  { %4798 = vmatprep.subr.bf16.mxu1 %v5851_v0  ;;  %4193 = vmatprep.mubr.msk.f32.mxu1 %vm5853_vm0, %v7100_v1 }
  0x84   :  { %1455 = vperm.xlu1 %5561, %v6100_v5  }
  0x85   :  { %4774 = vmatpush1.bf16.msra.mxu0 %v5950_v22 }
  0x86   :  { %4776 = vmatprep.subr.bf16.mxu0 %v5953_v24  ;;  %4800 = vmatpush3.bf16.msra.mxu1 %v5961_v35 }
  0x87   :  { %4801 = vmatprep.subr.bf16.mxu1 %v5851_v0 }
  0x88   :  { %1909 = vperm.xlu1 %5561, %v6085_v40  }
  0x89   :  { %4778 = vmatpush1.bf16.msra.mxu0 %v5958_v33 }
  0x8a   :  { %4780 = vmatprep.subr.bf16.mxu0 %v5964_v36  ;;  %4803 = vmatpush3.bf16.msra.mxu1 %v5971_v44 }
  0x8b   :  { %4804 = vmatprep.subr.bf16.mxu1 %v5851_v0 }
  0x8c   :  { %2363 = vperm.xlu1 %5561, %v6068_v18  }
  0x8d   :  { %4782 = vmatpush1.bf16.msra.mxu0 %v5968_v42 }
  0x8e   :  { %4784 = vmatprep.subr.bf16.mxu0 %v5974_v45  ;;  %4806 = vmatpush3.bf16.msra.mxu1 %v5981_v53 }
  0x8f   :  { %4807 = vmatprep.subr.bf16.mxu1 %v5851_v0 }
  0x90   :  { %2817 = vperm.xlu1 %5561, %v6052_v58  }
  0x91   :  { %4786 = vmatpush1.bf16.msra.mxu0 %v5978_v51  ;;  %v6191_v51 = vld [vmem:[%s7094_s3] ss:$0 sm:$0xff] }
  0x92   :  { %4788 = vmatprep.subr.bf16.mxu0 %v5984_v54  ;;  %4809 = vmatpush3.bf16.msra.mxu1 %v5991_v62  ;;  %v92_v62 = vld [vmem:[#allocation6 + $0x10] sm:$0xff] }
  0x93   :  { %4810 = vmatprep.subr.bf16.mxu1 %v5851_v0 }
  0x94   :  { %3271 = vperm.xlu1 %5561, %v772_v6  }
  0x95   :  { %4790 = vmatpush1.bf16.msra.mxu0 %v5988_v60 }
  0x96   :  { %4792 = vmatprep.subr.bf16.mxu0 %v5994_v63  ;;  %4812 = vmatpush3.bf16.msra.mxu1 %v6001_v13 }
  0x97   :  { %4813 = vmatprep.subr.bf16.mxu1 %v5851_v0 }
  0x98   :  { %3723 = vperm.xlu1 %5561, %v6025_v38  }
  0x99   :  { %4794 = vmatpush1.bf16.msra.mxu0 %v5998_v9  ;;  %v321_v9 = vld [vmem:[#allocation9 + $0xa8] sm:$0xff] }
  0x9a   :  { %4820 = vmatprep.subr.bf16.mxu0 %v6004_v14  ;;  %4815 = vmatpush3.bf16.msra.mxu1 %v6011_v26 }
  0x9b   :  { %4816 = vmatprep.subr.bf16.mxu1 %v5851_v0 }
  0x9e   :  { %4818 = vmatpush3.bf16.msra.mxu1 %v6033_v41 }
  0x9f   :  { %4851 = vmatprep.subr.bf16.mxu1 %v5851_v0 }
  0xcc   :  { %v315_v20 = vpop.permute.xlu0 %314 }
  0xcd   :  { %vm316_vm9 = vcmp.eq.s32.totalorder %v315_v20, 1  ;;  %v1038_v20 = vld [vmem:[#allocation4 + $0xd0] sm:$0xff] }
 0x12f   :  { %v207_v11 = vpop.f32.mrb[0].mxu0 }
 0x130   :  { %v282_v16 = vadd.f32 %v207_v11, %v90_v10  ;;  %v209_v22 = vpop.f32.mrb[1].mxu0 }
 0x131   :  { %v289_v24 = vadd.f32 %v209_v22, %v91_v17  ;;  %v1021_v22 = vld [vmem:[#allocation4 + $0x48] sm:$0xff] }
 0x132   :  { %v3780_v2 = vmul.f32 -1.442695, %v282_v16 }
 0x133   :  { %v3781_v33 = vmul.f32 -1.442695, %v289_v24 }
 0x134   :  { %5562 = vpow2.f32 %v3780_v2  ;;  %v278_v35 = vpop.f32.mrb[0].mxu1  ;;  %v1020_v2 = vld [vmem:[#allocation4 + $0x40] sm:$0xff] }
 0x135   :  { %v4125_v36 = vpop.f32.mrb[1].mxu1  ;;  %5564 = vpow2.f32 %v3781_v33  ;;  %v302_v54 = vadd.f32 %v6191_v51, %v278_v35  ;;  %v1023_v33 = vld [vmem:[#allocation4 + $0x58] sm:$0xff] }
 0x136   :  { %v6256_v35 = vpack.c.bf16 %v1023_v33, %v1020_v2  ;;  %v1025_v36 = vld [vmem:[#allocation4 + $0x68] sm:$0xff]  ;;  %v1059_v33 = vld [vmem:[#allocation4 + $0x178] sm:$0xff] }
 0x13e   :  { %v5563_v42 = vpop.eup %5562 }
 0x13f   :  { %v286_v44 = vadd.f32 1.0, %v5563_v42  ;;  %v5565_v45 = vpop.eup %5564  ;;  %v1028_v42 = vld [vmem:[#allocation4 + $0x80] sm:$0xff] }
 0x140   :  { %v293_v53 = vadd.f32 1.0, %v5565_v45  ;;  %v1024_v45 = vld [vmem:[#allocation4 + $0x60] sm:$0xff] }
 0x141   :  { %5566 = vrcp.f32 %v286_v44  ;;  %v6260_v44 = vpack.c.bf16 %v1028_v42, %v1025_v36  ;;  %v1240_v42 = vld [vmem:[#allocation4 + $0x188] sm:$0xff] }
 0x142   :  { %5568 = vrcp.f32 %v293_v53  ;;  %v1027_v53 = vld [vmem:[#allocation4 + $0x78] sm:$0xff] }
 0x14b   :  { %v5567_v60 = vpop.eup %5566 }
 0x14c   :  { %v303_v63 = vmul.f32 %v5567_v60, %v302_v54  ;;  %v5569_v58 = vpop.eup %5568  ;;  %v1026_v54 = vld [vmem:[#allocation4 + $0x70] sm:$0xff]  ;;  %v6263_v60 = vpack.c.bf16 %v1027_v53, %v1024_v45  ;;  %v1243_v45 = vld [vmem:[#allocation4 + $0x1a0] sm:$0xff] }
 0x14d   :  { %v306_v49 = vsub.f32 1.0, %v5569_v58  ;;  %v308_v29 = vmul.f32 0.0, %v5569_v58  ;;  %v6320_v53 = vpack.c.bf16 %v1243_v45, %v1240_v42  ;;  %v1242_v45 = vld [vmem:[#allocation4 + $0x198] sm:$0xff] }
 0x14e   :  { %v304_v13 = vadd.f32 %v303_v63, %v92_v62  ;;  %v1029_v62 = vld [vmem:[#allocation4 + $0x88] sm:$0xff] }
 0x14f   :  { %v439_v14 = vpop.f32.mrb[2].mxu0  ;;  %v6266_v63 = vpack.c.bf16 %v1029_v62, %v1026_v54  ;;  %v555_v54 = vld [vmem:[#allocation6 + $0x18] sm:$0xff] }
 0x150   :  { %5570 = vtanh.f32 %v304_v13  ;;  %v514_v26 = vadd.f32 %v439_v14, %v321_v9  ;;  %v441_v38 = vpop.f32.mrb[3].mxu0  ;;  %v1031_v9 = vld [vmem:[#allocation4 + $0x98] sm:$0xff]  ;;  %v1034_v13 = vld [vmem:[#allocation4 + $0xb0] sm:$0xff] }
 0x151   :  { %v521_v43 = vadd.f32 %v441_v38, %v322_v27  ;;  %v6270_v14 = vpack.c.bf16 %v1034_v13, %v1031_v9  ;;  %v1033_v27 = vld [vmem:[#allocation4 + $0xa8] sm:$0xff]  ;;  %v1032_v38 = vld [vmem:[#allocation4 + $0xa0] sm:$0xff] }
 0x152   :  { %v3783_v41 = vmul.f32 -1.442695, %v514_v26  ;;  %v1030_v26 = vld [vmem:[#allocation4 + $0x90] sm:$0xff] }
 0x153   :  { %v3784_v18 = vmul.f32 -1.442695, %v521_v43  ;;  %v1035_v43 = vld [vmem:[#allocation4 + $0xb8] sm:$0xff] }
 0x154   :  { %5572 = vpow2.f32 %v3783_v41  ;;  %v510_v40 = vpop.f32.mrb[2].mxu1  ;;  %v6273_v41 = vpack.c.bf16 %v1033_v27, %v1030_v26  ;;  %v6276_v58 = vpack.c.bf16 %v1035_v43, %v1032_v38  ;;  %v556_v26 = vld [vmem:[#allocation6 + $0x20] sm:$0xff] }
 0x155   :  { %v4160_v5 = vpop.f32.mrb[3].mxu1  ;;  %5574 = vpow2.f32 %v3784_v18  ;;  %v1037_v18 = vld [vmem:[#allocation4 + $0xc8] sm:$0xff] }
 0x15a   :  { %v5571_v56 = vpop.eup %5570 }
 0x15b   :  { %v307_v21 = vmul.f32 %v5571_v56, %v306_v49  ;;  %v1036_v49 = vld [vmem:[#allocation4 + $0xc0] sm:$0xff]  ;;  %v1039_v56 = vld [vmem:[#allocation4 + $0xd8] sm:$0xff] }
 0x15d   :  { %v309_v34 = vadd.f32 %v308_v29, %v307_v21  ;;  %v6283_v21 = vpack.c.bf16 %v1039_v56, %v1036_v49  ;;  %v1041_v29 = vld [vmem:[#allocation4 + $0xe8] sm:$0xff] }
 0x15e   :  { %v5573_v6 = vpop.eup %5572 }
 0x15f   :  { %v518_v10 = vadd.f32 1.0, %v5573_v6  ;;  %3815 = vmatmul.mubr.msk.f32.vlgmr.msra.gmra.mrb[4].mxu0 %vm316_vm9, %v309_v34  ;;  %4194 = vmatmul.mubr.msk.f32.vlgmr.msra.gmra.mrb[4].mxu1 %vm316_vm9, %v309_v34  ;;  %v6194_v11 = vsel %vm316_vm9, %v309_v34, 0.0  ;;  %v5575_v16 = vpop.eup %5574  ;;  %v6286_v34 = vpack.c.bf16 %v1041_v29, %v1038_v20  ;;  %v1043_v6 = vld [vmem:[#allocation4 + $0xf8] sm:$0xff] }
 0x160   :  { %4822 = vmatpush1.bf16.msra.mxu0 %v6008_v23  ;;  %4853 = vmatpush3.bf16.msra.mxu1 %v6049_v57  ;;  %319 = vst [vmem:[#allocation11] sm:$0xff] %v6194_v11  ;;  %v6211_v23 = vld [vmem:[%s7094_s3 + $0x1] ss:$0 sm:$0xff] }
 0x161   :  { %5576 = vrcp.f32 %v518_v10  ;;  %4824 = vmatprep.subr.bf16.mxu0 %v6019_v28  ;;  %4854 = vmatprep.subr.bf16.mxu1 %v5851_v0  ;;  %v525_v28 = vadd.f32 1.0, %v5575_v16  ;;  %v534_v57 = vadd.f32 %v6211_v23, %v510_v40  ;;  %v1040_v40 = vld [vmem:[#allocation4 + $0xe0] sm:$0xff]  ;;  %v1046_v10 = vld [vmem:[#allocation4 + $0x110] sm:$0xff] }
 0x162   :  { %897 = vmatprep.mubr.f32.mxu0 %v7100_v1  ;;  %4228 = vmatprep.mubr.msk.f32.mxu1 %vm5853_vm0, %v7100_v1  ;;  %v6280_v5 = vpack.c.bf16 %v1040_v40, %v1037_v18  ;;  %v6290_v16 = vpack.c.bf16 %v1046_v10, %v1043_v6 }
 0x163   :  { %5578 = vrcp.f32 %v525_v28  ;;  %v1042_v28 = vld [vmem:[#allocation4 + $0xf0] sm:$0xff] }
 0x164   :  { %4826 = vmatpush1.bf16.msra.mxu0 %v6030_v39  ;;  %4856 = vmatpush3.bf16.msra.mxu1 %v6065_v15 }
 0x165   :  { %4828 = vmatprep.subr.bf16.mxu0 %v6039_v46  ;;  %4857 = vmatprep.subr.bf16.mxu1 %v5851_v0  ;;  %v323_v46 = vld [vmem:[#allocation9 + $0xb8] sm:$0xff] }
 0x168   :  { %4830 = vmatpush1.bf16.msra.mxu0 %v6046_v55  ;;  %4859 = vmatpush3.bf16.msra.mxu1 %v6082_v37  ;;  %v548_v37 = vpop.permute.xlu0 %547 }
 0x169   :  { %4832 = vmatprep.subr.bf16.mxu0 %v6055_v59  ;;  %4860 = vmatprep.subr.bf16.mxu1 %v5851_v0  ;;  %vm549_vm10 = vcmp.eq.s32.totalorder %v548_v37, 1  ;;  %v1050_v37 = vld [vmem:[#allocation4 + $0x130] sm:$0xff] }
 0x16b   :  { %v5577_v39 = vpop.eup %5576 }
 0x16c   :  { %v535_v15 = vmul.f32 %v5577_v39, %v534_v57  ;;  %4834 = vmatpush1.bf16.msra.mxu0 %v6062_v8  ;;  %4862 = vmatpush3.bf16.msra.mxu1 %v6097_v4  ;;  %v1013_v4 = vld [vmem:[#allocation4 + $0x8] sm:$0xff]  ;;  %v1044_v39 = vld [vmem:[#allocation4 + $0x100] sm:$0xff] }
 0x16d   :  { %4836 = vmatprep.subr.bf16.mxu0 %v6071_v19  ;;  %4863 = vmatprep.subr.bf16.mxu1 %v5851_v0  ;;  %v5579_v55 = vpop.eup %5578  ;;  %v1045_v57 = vld [vmem:[#allocation4 + $0x108] sm:$0xff] }
 0x16e   :  { %v536_v17 = vadd.f32 %v535_v15, %v323_v46  ;;  %v538_v59 = vsub.f32 1.0, %v5579_v55  ;;  %v6293_v46 = vpack.c.bf16 %v1045_v57, %v1042_v28  ;;  %v1047_v15 = vld [vmem:[#allocation4 + $0x118] sm:$0xff]  ;;  %v557_v28 = vld [vmem:[#allocation6 + $0x28] sm:$0xff] }
 0x170   :  { %5580 = vtanh.f32 %v536_v17  ;;  %4838 = vmatpush1.bf16.msra.mxu0 %v6079_v32  ;;  %4865 = vmatpush3.bf16.msra.mxu1 %v6112_v48  ;;  %v540_v32 = vmul.f32 0.0, %v5579_v55  ;;  %v1012_v48 = vld [vmem:[#allocation4] sm:$0xff]  ;;  %v6296_v17 = vpack.c.bf16 %v1047_v15, %v1044_v39  ;;  %v1049_v55 = vld [vmem:[#allocation4 + $0x128] sm:$0xff]  ;;  %v782_v39 = vld [vmem:[#allocation9 + $0x90] sm:$0xff] }
 0x171   :  { %4840 = vmatprep.subr.bf16.mxu0 %v6088_v47  ;;  %4866 = vmatprep.subr.bf16.mxu1 %v5851_v0 }
 0x174   :  { %4842 = vmatpush1.bf16.msra.mxu0 %v6094_v61  ;;  %4868 = vmatpush3.bf16.msra.mxu1 %v6126_v12  ;;  %v1022_v12 = vld [vmem:[#allocation4 + $0x50] sm:$0xff] }
 0x175   :  { %4844 = vmatprep.subr.bf16.mxu0 %v6103_v7  ;;  %4869 = vmatprep.subr.bf16.mxu1 %v5851_v0  ;;  %v1016_v7 = vld [vmem:[#allocation4 + $0x20] sm:$0xff] }
 0x178   :  { %4846 = vmatpush1.bf16.msra.mxu0 %v6109_v31  ;;  %4871 = vmatpush3.bf16.msra.mxu1 %v6133_v25  ;;  %v6245_v31 = vpack.c.bf16 %v1016_v7, %v1013_v4  ;;  %v1053_v4 = vld [vmem:[#allocation4 + $0x148] sm:$0xff] }
 0x179   :  { %4848 = vmatprep.subr.bf16.mxu0 %v6118_v50  ;;  %4872 = vmatprep.subr.bf16.mxu1 %v5851_v0  ;;  %v1015_v50 = vld [vmem:[#allocation4 + $0x18] sm:$0xff]  ;;  %v6306_v7 = vpack.c.bf16 %v1053_v4, %v1050_v37 }
 0x17a   :  { %v5581_v8 = vpop.eup %5580 }
 0x17b   :  { %v539_v19 = vmul.f32 %v5581_v8, %v538_v59  ;;  %v1052_v59 = vld [vmem:[#allocation4 + $0x140] sm:$0xff] }
 0x17c   :  { %4850 = vmatpush1.bf16.msra.mxu0 %v6123_v3  ;;  %4874 = vmatpush3.bf16.msra.mxu1 %v6139_v52  ;;  %v6247_v3 = vpack.c.bf16 %v1015_v50, %v1012_v48  ;;  %v1018_v52 = vld [vmem:[#allocation4 + $0x30] sm:$0xff]  ;;  %v6300_v8 = vpack.c.bf16 %v1052_v59, %v1049_v55  ;;  %v1055_v48 = vld [vmem:[#allocation4 + $0x158] sm:$0xff] }
 0x17d   :  { %v541_v47 = vadd.f32 %v540_v32, %v539_v19  ;;  %4907 = vmatprep.subr.bf16.mxu1 %v5851_v0  ;;  %4876 = vmatprep.subr.bf16.mxu0 %v6245_v31  ;;  %v6253_v24 = vpack.c.bf16 %v1021_v22, %v1018_v52  ;;  %v1048_v19 = vld [vmem:[#allocation4 + $0x120] sm:$0xff]  ;;  %v1051_v32 = vld [vmem:[#allocation4 + $0x138] sm:$0xff]  ;;  %v1058_v50 = vld [vmem:[#allocation4 + $0x170] sm:$0xff] }
 0x17e   :  { %v1057_v52 = vld [vmem:[#allocation4 + $0x168] sm:$0xff]  ;;  %v1056_v22 = vld [vmem:[#allocation4 + $0x160] sm:$0xff] }
 0x17f   :  { %3817 = vmatmul.mubr.msk.f32.vlgmr.msra.gmra.mrb[6].mxu0 %vm549_vm10, %v541_v47  ;;  %4229 = vmatmul.mubr.msk.f32.vlgmr.msra.gmra.mrb[6].mxu1 %vm549_vm10, %v541_v47  ;;  %v6237_v61 = vsel %vm549_vm10, %v541_v47, 0.0  ;;  %v6303_v47 = vpack.c.bf16 %v1051_v32, %v1048_v19  ;;  %v6316_v36 = vpack.c.bf16 %v1059_v33, %v1056_v22  ;;  %v783_v32 = vld [vmem:[#allocation9 + $0x98] sm:$0xff]  ;;  %v1239_v33 = vld [vmem:[#allocation4 + $0x180] sm:$0xff] }
 0x180   :  { %4909 = vmatpush3.bf16.msra.mxu1 %v5955_v30  ;;  %1124 = vmatprep.mubr.f32.mxu0 %v7100_v1  ;;  %553 = vst [vmem:[#allocation12 + $0x38] sm:$0xff] %v6237_v61  ;;  %v1019_v30 = vld [vmem:[#allocation4 + $0x38] sm:$0xff] }
 0x181   :  { %4910 = vmatprep.subr.bf16.mxu1 %v5851_v0  ;;  %4263 = vmatprep.mubr.msk.f32.mxu1 %vm5853_vm0, %v7100_v1  ;;  %v6251_v25 = vpack.c.bf16 %v1022_v12, %v1019_v30  ;;  %v6310_v30 = vpack.c.bf16 %v1058_v50, %v1055_v48  ;;  %v1054_v12 = vld [vmem:[#allocation4 + $0x150] sm:$0xff] }
 0x182   :  { %4878 = vmatpush1.bf16.msra.mxu0 %v6247_v3  ;;  %v6313_v2 = vpack.c.bf16 %v1057_v52, %v1054_v12 }
 0x183   :  { %4880 = vmatprep.subr.bf16.mxu0 %v6251_v25 }
 0x184   :  { %4912 = vmatpush3.bf16.msra.mxu1 %v6256_v35 }
 0x185   :  { %4913 = vmatprep.subr.bf16.mxu1 %v5851_v0 }
 0x186   :  { %4882 = vmatpush1.bf16.msra.mxu0 %v6253_v24 }
 0x187   :  { %4884 = vmatprep.subr.bf16.mxu0 %v6260_v44 }
 0x188   :  { %4915 = vmatpush3.bf16.msra.mxu1 %v6266_v63 }
 0x189   :  { %4916 = vmatprep.subr.bf16.mxu1 %v5851_v0 }
 0x18a   :  { %4886 = vmatpush1.bf16.msra.mxu0 %v6263_v60 }
 0x18b   :  { %4888 = vmatprep.subr.bf16.mxu0 %v6270_v14 }
 0x18c   :  { %4918 = vmatpush3.bf16.msra.mxu1 %v6276_v58 }
 0x18d   :  { %4919 = vmatprep.subr.bf16.mxu1 %v5851_v0 }
 0x18e   :  { %4890 = vmatpush1.bf16.msra.mxu0 %v6273_v41 }
 0x18f   :  { %4892 = vmatprep.subr.bf16.mxu0 %v6280_v5 }
 0x190   :  { %4921 = vmatpush3.bf16.msra.mxu1 %v6286_v34 }
 0x191   :  { %4922 = vmatprep.subr.bf16.mxu1 %v5851_v0 }
 0x192   :  { %4894 = vmatpush1.bf16.msra.mxu0 %v6283_v21 }
 0x193   :  { %4896 = vmatprep.subr.bf16.mxu0 %v6290_v16 }
 0x194   :  { %4924 = vmatpush3.bf16.msra.mxu1 %v6296_v17 }
 0x195   :  { %4925 = vmatprep.subr.bf16.mxu1 %v5851_v0 }
 0x196   :  { %4898 = vmatpush1.bf16.msra.mxu0 %v6293_v46 }
 0x197   :  { %4900 = vmatprep.subr.bf16.mxu0 %v6300_v8 }
 0x198   :  { %4927 = vmatpush3.bf16.msra.mxu1 %v6306_v7 }
 0x199   :  { %4928 = vmatprep.subr.bf16.mxu1 %v5851_v0 }
 0x19a   :  { %4902 = vmatpush1.bf16.msra.mxu0 %v6303_v47 }
 0x19b   :  { %4904 = vmatprep.subr.bf16.mxu0 %v6310_v30 }
 0x19c   :  { %4930 = vmatpush3.bf16.msra.mxu1 %v6316_v36 }
 0x19d   :  { %4963 = vmatprep.subr.bf16.mxu1 %v5851_v0 }
 0x19e   :  { %4906 = vmatpush1.bf16.msra.mxu0 %v6313_v2 }
 0x19f   :  { %4932 = vmatprep.subr.bf16.mxu0 %v6320_v53 }
 0x232   :  { %v672_v62 = vpop.f32.mrb[4].mxu0  ;;  %v743_v9 = vpop.f32.mrb[4].mxu1 }
 0x233   :  { %v747_v13 = vadd.f32 %v672_v62, %v555_v54  ;;  %v674_v27 = vpop.f32.mrb[5].mxu0  ;;  %v4195_v38 = vpop.f32.mrb[5].mxu1  ;;  %v761_v6 = vadd.f32 %v6191_v51, %v743_v9  ;;  %v1241_v54 = vld [vmem:[#allocation4 + $0x190] sm:$0xff]  ;;  %v1244_v62 = vld [vmem:[#allocation4 + $0x1a8] sm:$0xff] }
 0x234   :  { %v754_v18 = vadd.f32 %v674_v27, %v556_v26  ;;  %v775_v9 = vpop.permute.xlu1 %774  ;;  %v1246_v27 = vld [vmem:[#allocation4 + $0x1b8] sm:$0xff]  ;;  %v1249_v38 = vld [vmem:[#allocation4 + $0x1d0] sm:$0xff] }
 0x235   :  { %v3786_v43 = vmul.f32 -1.442695, %v747_v13  ;;  %vm776_vm11 = vcmp.eq.s32.totalorder %v775_v9, 1  ;;  %v1259_v9 = vld [vmem:[#allocation4 + $0x220] sm:$0xff] }
 0x236   :  { %v3787_v40 = vmul.f32 -1.442695, %v754_v18  ;;  %v6328_v18 = vpack.c.bf16 %v1242_v45, %v1239_v33  ;;  %v1257_v45 = vld [vmem:[#allocation4 + $0x210] sm:$0xff] }
 0x237   :  { %5582 = vpow2.f32 %v3786_v43 }
 0x238   :  { %5584 = vpow2.f32 %v3787_v40  ;;  %v6330_v40 = vpack.c.bf16 %v1244_v62, %v1241_v54  ;;  %v1260_v62 = vld [vmem:[#allocation4 + $0x228] sm:$0xff] }
 0x241   :  { %v5583_v49 = vpop.eup %5582 }
 0x242   :  { %v751_v56 = vadd.f32 1.0, %v5583_v49  ;;  %v5585_v20 = vpop.eup %5584  ;;  %v1245_v49 = vld [vmem:[#allocation4 + $0x1b0] sm:$0xff] }
 0x243   :  { %v758_v29 = vadd.f32 1.0, %v5585_v20  ;;  %v6332_v20 = vpack.c.bf16 %v1249_v38, %v1246_v27  ;;  %v1267_v27 = vld [vmem:[#allocation4 + $0x260] sm:$0xff] }
 0x244   :  { %5586 = vrcp.f32 %v751_v56 }
 0x245   :  { %5588 = vrcp.f32 %v758_v29  ;;  %v1248_v29 = vld [vmem:[#allocation4 + $0x1c8] sm:$0xff] }
 0x24e   :  { %v5587_v10 = vpop.eup %5586 }
 0x24f   :  { %v762_v57 = vmul.f32 %v5587_v10, %v761_v6  ;;  %v5589_v12 = vpop.eup %5588  ;;  %v1247_v6 = vld [vmem:[#allocation4 + $0x1c0] sm:$0xff]  ;;  %v1250_v10 = vld [vmem:[#allocation4 + $0x1d8] sm:$0xff] }
 0x250   :  { %v765_v22 = vsub.f32 1.0, %v5589_v12  ;;  %v767_v26 = vmul.f32 %v5589_v12, %v6194_v11  ;;  %v1258_v12 = vld [vmem:[#allocation4 + $0x218] sm:$0xff] }
 0x251   :  { %v763_v15 = vadd.f32 %v762_v57, %v557_v28 }
 0x252   :  { %v899_v55 = vpop.f32.mrb[6].mxu0  ;;  %v6325_v59 = vpop.f32.mrb[6].mxu1 }
 0x253   :  { %5590 = vtanh.f32 %v763_v15  ;;  %v974_v19 = vadd.f32 %v899_v55, %v782_v39  ;;  %v901_v37 = vpop.f32.mrb[7].mxu0  ;;  %v4230_v4 = vpop.f32.mrb[7].mxu1  ;;  %v1252_v15 = vld [vmem:[#allocation4 + $0x1e8] sm:$0xff]  ;;  %v1255_v55 = vld [vmem:[#allocation4 + $0x200] sm:$0xff] }
 0x254   :  { %v981_v50 = vadd.f32 %v901_v37, %v783_v32  ;;  %v6343_v32 = vpack.c.bf16 %v1250_v10, %v1247_v6  ;;  %v6347_v37 = vpack.c.bf16 %v1255_v55, %v1252_v15  ;;  %v1254_v4 = vld [vmem:[#allocation4 + $0x1f8] sm:$0xff]  ;;  %v784_v55 = vld [vmem:[#allocation9 + $0xa0] sm:$0xff] }
 0x255   :  { %v3788_v48 = vmul.f32 -1.442695, %v974_v19  ;;  %v6341_v19 = vpack.c.bf16 %v1248_v29, %v1245_v49  ;;  %v988_v29 = vadd.f32 %v6211_v23, %v6325_v59  ;;  %v1266_v10 = vld [vmem:[#allocation4 + $0x258] sm:$0xff] }
 0x256   :  { %v3789_v52 = vmul.f32 -1.442695, %v981_v50  ;;  %v1256_v50 = vld [vmem:[#allocation4 + $0x208] sm:$0xff] }
 0x257   :  { %5592 = vpow2.f32 %v3788_v48  ;;  %v1253_v48 = vld [vmem:[#allocation4 + $0x1f0] sm:$0xff] }
 0x258   :  { %5594 = vpow2.f32 %v3789_v52  ;;  %v1261_v52 = vld [vmem:[#allocation4 + $0x230] sm:$0xff] }
 0x259   :  { %v6360_v54 = vpack.c.bf16 %v1261_v52, %v1258_v12  ;;  %v1269_v12 = vld [vmem:[#allocation4 + $0x270] sm:$0xff] }
 0x25d   :  { %v5591_v42 = vpop.eup %5590 }
 0x25e   :  { %v766_v13 = vmul.f32 %v5591_v42, %v765_v22  ;;  %v6356_v42 = vpack.c.bf16 %v1256_v50, %v1253_v48 }
 0x260   :  { %v768_v43 = vadd.f32 %v767_v26, %v766_v13  ;;  %v1262_v13 = vld [vmem:[#allocation4 + $0x238] sm:$0xff]  ;;  %v1264_v26 = vld [vmem:[#allocation4 + $0x248] sm:$0xff] }
 0x261   :  { %v5593_v56 = vpop.eup %5592  ;;  %v6366_v49 = vpack.c.bf16 %v1262_v13, %v1259_v9  ;;  %v6372_v6 = vpack.c.bf16 %v1267_v27, %v1264_v26  ;;  %v1274_v9 = vld [vmem:[#allocation4 + $0x298] sm:$0xff]  ;;  %v1276_v13 = vld [vmem:[#allocation4 + $0x2a8] sm:$0xff]  ;;  %v1279_v26 = vld [vmem:[#allocation4 + $0x2c0] sm:$0xff] }
 0x262   :  { %v6335_v28 = vsel %vm776_vm11, %v768_v43, %v6194_v11  ;;  %v778_v57 = vsel %vm776_vm11, %v768_v43, 0.0  ;;  %v978_v39 = vadd.f32 1.0, %v5593_v56  ;;  %v1251_v11 = vld [vmem:[#allocation4 + $0x1e0] sm:$0xff]  ;;  %v5595_v22 = vpop.eup %5594  ;;  %v6364_v43 = vpack.c.bf16 %v1260_v62, %v1257_v45  ;;  %v1272_v45 = vld [vmem:[#allocation4 + $0x288] sm:$0xff] }
 0x263   :  { %780 = vst [vmem:[#allocation11 + $0x8] sm:$0xff] %v778_v57  ;;  %1125 = vmatmul.mubr.f32.vlgmr.msra.gmra.mrb[8].mxu0 %v6335_v28  ;;  %4264 = vmatmul.mubr.f32.vlgmr.msra.gmra.mrb[8].mxu1 %v6335_v28  ;;  %v6354_v33 = vpack.c.bf16 %v1254_v4, %v1251_v11  ;;  %v985_v38 = vadd.f32 1.0, %v5595_v22  ;;  %v1263_v56 = vld [vmem:[#allocation4 + $0x240] sm:$0xff]  ;;  %v1265_v57 = vld [vmem:[#allocation4 + $0x250] sm:$0xff]  ;;  %v1270_v11 = vld [vmem:[#allocation4 + $0x278] sm:$0xff]  ;;  %v6386_v27 = vpack.c.bf16 %v1272_v45, %v1269_v12 }
 0x264   :  { %5596 = vrcp.f32 %v978_v39  ;;  %4934 = vmatpush1.bf16.msra.mxu0 %v6328_v18  ;;  %4965 = vmatpush3.bf16.msra.mxu1 %v6330_v40  ;;  %v1268_v39 = vld [vmem:[#allocation4 + $0x268] sm:$0xff]  ;;  %v1273_v4 = vld [vmem:[#allocation4 + $0x290] sm:$0xff]  ;;  %v6376_v59 = vpack.c.bf16 %v1266_v10, %v1263_v56  ;;  %v1271_v62 = vld [vmem:[#allocation4 + $0x280] sm:$0xff] }
 0x265   :  { %4936 = vmatprep.subr.bf16.mxu0 %v6332_v20  ;;  %4966 = vmatprep.subr.bf16.mxu1 %v5851_v0  ;;  %5598 = vrcp.f32 %v985_v38  ;;  %v6378_v50 = vpack.c.bf16 %v1268_v39, %v1265_v57  ;;  %v6382_v22 = vpack.c.bf16 %v1273_v4, %v1270_v11  ;;  %v6388_v38 = vpack.c.bf16 %v1274_v9, %v1271_v62  ;;  %v1275_v56 = vld [vmem:[#allocation4 + $0x2a0] sm:$0xff]  ;;  %v1278_v10 = vld [vmem:[#allocation4 + $0x2b8] sm:$0xff]  ;;  %v1277_v57 = vld [vmem:[#allocation4 + $0x2b0] sm:$0xff] }
 0x266   :  { %1351 = vmatprep.mubr.f32.mxu0 %v7100_v1  ;;  %4298 = vmatprep.mubr.msk.f32.mxu1 %vm5853_vm0, %v7100_v1  ;;  %v1280_v39 = vld [vmem:[#allocation4 + $0x2c8] sm:$0xff]  ;;  %v6396_v11 = vpack.c.bf16 %v1278_v10, %v1275_v56  ;;  %v1283_v62 = vld [vmem:[#allocation4 + $0x2e0] sm:$0xff]  ;;  %v1286_v9 = vld [vmem:[#allocation4 + $0x2f8] sm:$0xff] }
 0x267   :  { %v6398_v4 = vpack.c.bf16 %v1280_v39, %v1277_v57  ;;  %v1284_v45 = vld [vmem:[#allocation4 + $0x2e8] sm:$0xff] }
 0x268   :  { %4938 = vmatpush1.bf16.msra.mxu0 %v6341_v19  ;;  %4968 = vmatpush3.bf16.msra.mxu1 %v6343_v32 }
 0x269   :  { %4940 = vmatprep.subr.bf16.mxu0 %v6347_v37  ;;  %4969 = vmatprep.subr.bf16.mxu1 %v5851_v0 }
 0x26c   :  { %4942 = vmatpush1.bf16.msra.mxu0 %v6354_v33  ;;  %4971 = vmatpush3.bf16.msra.mxu1 %v6356_v42 }
 0x26d   :  { %4944 = vmatprep.subr.bf16.mxu0 %v6360_v54  ;;  %4972 = vmatprep.subr.bf16.mxu1 %v5851_v0 }
 0x26e   :  { %v5597_v15 = vpop.eup %5596 }
 0x26f   :  { %v989_v48 = vmul.f32 %v5597_v15, %v988_v29  ;;  %v6392_v29 = vpack.c.bf16 %v1279_v26, %v1276_v13  ;;  %v1282_v15 = vld [vmem:[#allocation4 + $0x2d8] sm:$0xff]  ;;  %v5599_v12 = vpop.eup %5598  ;;  %v6408_v26 = vpack.c.bf16 %v1286_v9, %v1283_v62  ;;  %v1237_v62 = vld [vmem:[#allocation9 + $0x80] sm:$0xff] }
 0x270   :  { %4946 = vmatpush1.bf16.msra.mxu0 %v6364_v43  ;;  %4974 = vmatpush3.bf16.msra.mxu1 %v6366_v49  ;;  %v992_v56 = vsub.f32 1.0, %v5599_v12  ;;  %v994_v39 = vmul.f32 %v5599_v12, %v6237_v61 }
 0x271   :  { %v990_v52 = vadd.f32 %v989_v48, %v784_v55  ;;  %4948 = vmatprep.subr.bf16.mxu0 %v6372_v6  ;;  %4975 = vmatprep.subr.bf16.mxu1 %v5851_v0  ;;  %v1285_v55 = vld [vmem:[#allocation4 + $0x2f0] sm:$0xff] }
 0x272   :  { %v1281_v48 = vld [vmem:[#allocation4 + $0x2d0] sm:$0xff] }
 0x273   :  { %5600 = vtanh.f32 %v990_v52  ;;  %v6402_v52 = vpack.c.bf16 %v1285_v55, %v1282_v15  ;;  %v6406_v13 = vpack.c.bf16 %v1284_v45, %v1281_v48  ;;  %v1002_v15 = vpop.permute.xlu1 %1001 }
 0x274   :  { %4950 = vmatpush1.bf16.msra.mxu0 %v6376_v59  ;;  %4977 = vmatpush3.bf16.msra.mxu1 %v6378_v50  ;;  %vm1003_vm12 = vcmp.eq.s32.totalorder %v1002_v15, 1 }
 0x275   :  { %4952 = vmatprep.subr.bf16.mxu0 %v6382_v22  ;;  %4978 = vmatprep.subr.bf16.mxu1 %v5851_v0 }
 0x278   :  { %4954 = vmatpush1.bf16.msra.mxu0 %v6386_v27  ;;  %4980 = vmatpush3.bf16.msra.mxu1 %v6388_v38 }
 0x279   :  { %4956 = vmatprep.subr.bf16.mxu0 %v6392_v29  ;;  %4981 = vmatprep.subr.bf16.mxu1 %v5851_v0 }
 0x27c   :  { %4958 = vmatpush1.bf16.msra.mxu0 %v6396_v11  ;;  %4983 = vmatpush3.bf16.msra.mxu1 %v6398_v4 }
 0x27d   :  { %v5601_v10 = vpop.eup %5600  ;;  %4960 = vmatprep.subr.bf16.mxu0 %v6402_v52  ;;  %4984 = vmatprep.subr.bf16.mxu1 %v5851_v0 }
 0x27e   :  { %v993_v57 = vmul.f32 %v5601_v10, %v992_v56 }
 0x280   :  { %4962 = vmatpush1.bf16.msra.mxu0 %v6406_v13  ;;  %4986 = vmatpush3.bf16.msra.mxu1 %v6408_v26  ;;  %v995_v55 = vadd.f32 %v994_v39, %v993_v57 }
 0x281   :  { %4988 = vmatprep.subr.bf16.mxu0 %v6245_v31  ;;  %5019 = vmatprep.subr.bf16.mxu1 %v5851_v0  ;;  %v1471_v31 = vld [vmem:[#allocation4 + $0x28] sm:$0xff] }
 0x282   :  { %v6418_v48 = vsel %vm1003_vm12, %v995_v55, %v6237_v61  ;;  %v1005_v45 = vsel %vm1003_vm12, %v995_v55, 0.0  ;;  %v1468_v61 = vld [vmem:[#allocation4 + $0x10] sm:$0xff] }
 0x283   :  { %1007 = vst [vmem:[#allocation12 + $0x30] sm:$0xff] %v1005_v45  ;;  %1352 = vmatmul.mubr.f32.vlgmr.msra.gmra.mrb[10].mxu0 %v6418_v48  ;;  %4299 = vmatmul.mubr.f32.vlgmr.msra.gmra.mrb[10].mxu1 %v6418_v48 }
 0x284   :  { %4990 = vmatpush1.bf16.msra.mxu0 %v6247_v3  ;;  %1578 = vmatprep.mubr.f32.mxu0 %v7100_v1  ;;  %v6441_v3 = vpack.c.bf16 %v1471_v31, %v1468_v61  ;;  %v1229_v31 = vpop.permute.xlu0 %1228 }
 0x285   :  { %4992 = vmatprep.subr.bf16.mxu0 %v6251_v25  ;;  %4333 = vmatprep.mubr.msk.f32.mxu1 %vm5853_vm0, %v7100_v1  ;;  %v1009_v25 = vld [vmem:[#allocation6 + $0x30] sm:$0xff]  ;;  %vm1230_vm13 = vcmp.eq.s32.totalorder %v1229_v31, 1  ;;  %v1949_v31 = vld [vmem:[#allocation4 + $0xe8] sm:$0xff] }
 0x286   :  { %5021 = vmatpush3.bf16.msra.mxu1 %v6441_v3 }
 0x287   :  { %5022 = vmatprep.subr.bf16.mxu1 %v5851_v0 }
 0x288   :  { %4994 = vmatpush1.bf16.msra.mxu0 %v6253_v24 }
 0x289   :  { %4996 = vmatprep.subr.bf16.mxu0 %v6260_v44 }
 0x28a   :  { %5024 = vmatpush3.bf16.msra.mxu1 %v6256_v35 }
 0x28b   :  { %5025 = vmatprep.subr.bf16.mxu1 %v5851_v0 }
 0x28c   :  { %4998 = vmatpush1.bf16.msra.mxu0 %v6263_v60  ;;  %v1010_v60 = vld [vmem:[#allocation6 + $0x38] sm:$0xff] }
 0x28d   :  { %5000 = vmatprep.subr.bf16.mxu0 %v6270_v14 }
 0x28e   :  { %5027 = vmatpush3.bf16.msra.mxu1 %v6266_v63 }
 0x28f   :  { %5028 = vmatprep.subr.bf16.mxu1 %v5851_v0 }
 0x290   :  { %5002 = vmatpush1.bf16.msra.mxu0 %v6273_v41 }
 0x291   :  { %5004 = vmatprep.subr.bf16.mxu0 %v6280_v5 }
 0x292   :  { %5030 = vmatpush3.bf16.msra.mxu1 %v6276_v58 }
 0x293   :  { %5031 = vmatprep.subr.bf16.mxu1 %v5851_v0 }
 0x294   :  { %5006 = vmatpush1.bf16.msra.mxu0 %v6283_v21 }
 0x295   :  { %5008 = vmatprep.subr.bf16.mxu0 %v6290_v16 }
 0x296   :  { %5033 = vmatpush3.bf16.msra.mxu1 %v6286_v34 }
 0x297   :  { %5034 = vmatprep.subr.bf16.mxu1 %v5851_v0 }
 0x298   :  { %5010 = vmatpush1.bf16.msra.mxu0 %v6293_v46 }
 0x299   :  { %5012 = vmatprep.subr.bf16.mxu0 %v6300_v8 }
 0x29a   :  { %5036 = vmatpush3.bf16.msra.mxu1 %v6296_v17 }
 0x29b   :  { %5037 = vmatprep.subr.bf16.mxu1 %v5851_v0 }
 0x29c   :  { %5014 = vmatpush1.bf16.msra.mxu0 %v6303_v47  ;;  %v1011_v47 = vld [vmem:[#allocation6 + $0x40] sm:$0xff] }
 0x29d   :  { %5016 = vmatprep.subr.bf16.mxu0 %v6310_v30  ;;  %v1236_v30 = vld [vmem:[#allocation9 + $0x78] sm:$0xff] }
 0x29e   :  { %5039 = vmatpush3.bf16.msra.mxu1 %v6306_v7 }
 0x29f   :  { %5040 = vmatprep.subr.bf16.mxu1 %v5851_v0 }
 0x2a0   :  { %5018 = vmatpush1.bf16.msra.mxu0 %v6313_v2 }
 0x2a1   :  { %5044 = vmatprep.subr.bf16.mxu0 %v6320_v53 }
 0x2a2   :  { %5042 = vmatpush3.bf16.msra.mxu1 %v6316_v36 }
 0x2a3   :  { %5075 = vmatprep.subr.bf16.mxu1 %v5851_v0 }
 0x336   :  { %v1126_v24 = vpop.f32.mrb[8].mxu0  ;;  %v1197_v35 = vpop.f32.mrb[8].mxu1 }
 0x337   :  { %v1201_v44 = vadd.f32 %v1126_v24, %v1009_v25  ;;  %v1128_v63 = vpop.f32.mrb[9].mxu0  ;;  %v4265_v14 = vpop.f32.mrb[9].mxu1  ;;  %v1215_v17 = vadd.f32 %v6191_v51, %v1197_v35 }
 0x338   :  { %v1208_v58 = vadd.f32 %v1128_v63, %v1010_v60  ;;  %v1238_v63 = vld [vmem:[#allocation9 + $0x88] sm:$0xff] }
 0x339   :  { %v3790_v41 = vmul.f32 -1.442695, %v1201_v44 }
 0x33a   :  { %v3791_v5 = vmul.f32 -1.442695, %v1208_v58 }
 0x33b   :  { %5602 = vpow2.f32 %v3790_v41  ;;  %v1931_v41 = vld [vmem:[#allocation4 + $0x58] sm:$0xff] }
 0x33c   :  { %5604 = vpow2.f32 %v3791_v5  ;;  %v1933_v5 = vld [vmem:[#allocation4 + $0x68] sm:$0xff] }
 0x345   :  { %v5603_v21 = vpop.eup %5602 }
 0x346   :  { %v1205_v34 = vadd.f32 1.0, %v5603_v21  ;;  %v5605_v16 = vpop.eup %5604  ;;  %v1936_v21 = vld [vmem:[#allocation4 + $0x80] sm:$0xff] }
 0x347   :  { %v1212_v46 = vadd.f32 1.0, %v5605_v16  ;;  %v1932_v16 = vld [vmem:[#allocation4 + $0x60] sm:$0xff] }
 0x348   :  { %5606 = vrcp.f32 %v1205_v34  ;;  %v6527_v34 = vpack.c.bf16 %v1936_v21, %v1933_v5  ;;  %v2151_v5 = vld [vmem:[#allocation4 + $0x1a0] sm:$0xff] }
 0x349   :  { %5608 = vrcp.f32 %v1212_v46  ;;  %v1935_v46 = vld [vmem:[#allocation4 + $0x78] sm:$0xff] }
 0x352   :  { %v5607_v8 = vpop.eup %5606 }
 0x353   :  { %v1216_v7 = vmul.f32 %v5607_v8, %v1215_v17  ;;  %v5609_v39 = vpop.eup %5608  ;;  %v1934_v17 = vld [vmem:[#allocation4 + $0x70] sm:$0xff]  ;;  %v6530_v8 = vpack.c.bf16 %v1935_v46, %v1932_v16  ;;  %v1463_v16 = vld [vmem:[#allocation6 + $0x48] sm:$0xff] }
 0x354   :  { %v1219_v55 = vsub.f32 1.0, %v5609_v39  ;;  %v1221_v61 = vmul.f32 %v5609_v39, %v6335_v28  ;;  %v1948_v39 = vld [vmem:[#allocation4 + $0xe0] sm:$0xff] }
 0x355   :  { %v1217_v2 = vadd.f32 %v1216_v7, %v1011_v47  ;;  %v1937_v47 = vld [vmem:[#allocation4 + $0x88] sm:$0xff] }
 0x356   :  { %v1353_v36 = vpop.f32.mrb[10].mxu0  ;;  %v1424_v53 = vpop.f32.mrb[10].mxu1  ;;  %v6533_v7 = vpack.c.bf16 %v1937_v47, %v1934_v17 }
 0x357   :  { %5610 = vtanh.f32 %v1217_v2  ;;  %v1428_v12 = vadd.f32 %v1353_v36, %v1236_v30  ;;  %v1355_v9 = vpop.f32.mrb[11].mxu0  ;;  %v4300_v56 = vpop.f32.mrb[11].mxu1  ;;  %v1939_v30 = vld [vmem:[#allocation4 + $0x98] sm:$0xff]  ;;  %v1942_v2 = vld [vmem:[#allocation4 + $0xb0] sm:$0xff] }
 0x358   :  { %v1435_v57 = vadd.f32 %v1355_v9, %v1237_v62  ;;  %v6537_v36 = vpack.c.bf16 %v1942_v2, %v1939_v30  ;;  %v1940_v62 = vld [vmem:[#allocation4 + $0xa0] sm:$0xff]  ;;  %v1943_v56 = vld [vmem:[#allocation4 + $0xb8] sm:$0xff]  ;;  %v1464_v30 = vld [vmem:[#allocation6 + $0x50] sm:$0xff] }
 0x359   :  { %v3792_v10 = vmul.f32 -1.442695, %v1428_v12  ;;  %v1941_v12 = vld [vmem:[#allocation4 + $0xa8] sm:$0xff] }
 0x35a   :  { %v3793_v15 = vmul.f32 -1.442695, %v1435_v57  ;;  %v1945_v57 = vld [vmem:[#allocation4 + $0xc8] sm:$0xff] }
 0x35b   :  { %5612 = vpow2.f32 %v3792_v10  ;;  %v6543_v10 = vpack.c.bf16 %v1943_v56, %v1940_v62 }
 0x35c   :  { %5614 = vpow2.f32 %v3793_v15  ;;  %v6547_v15 = vpack.c.bf16 %v1948_v39, %v1945_v57 }
 0x361   :  { %v5611_v51 = vpop.eup %5610 }
 0x362   :  { %v1220_v45 = vmul.f32 %v5611_v51, %v1219_v55  ;;  %v1944_v55 = vld [vmem:[#allocation4 + $0xc0] sm:$0xff]  ;;  %v1947_v51 = vld [vmem:[#allocation4 + $0xd8] sm:$0xff] }
 0x364   :  { %v1222_v25 = vadd.f32 %v1221_v61, %v1220_v45  ;;  %v1946_v45 = vld [vmem:[#allocation4 + $0xd0] sm:$0xff]  ;;  %v6550_v61 = vpack.c.bf16 %v1947_v51, %v1944_v55 }
 0x365   :  { %v5613_v24 = vpop.eup %5612 }
 0x366   :  { %v1432_v35 = vadd.f32 1.0, %v5613_v24  ;;  %v6462_v44 = vsel %vm1230_vm13, %v1222_v25, %v6335_v28  ;;  %v1232_v60 = vsel %vm1230_vm13, %v1222_v25, 0.0  ;;  %v5615_v28 = vpop.eup %5614  ;;  %v6553_v25 = vpack.c.bf16 %v1949_v31, %v1946_v45  ;;  %v1951_v24 = vld [vmem:[#allocation4 + $0xf8] sm:$0xff]  ;;  %v6594_v45 = vld [vmem:[%s7094_s3] ss:$0 sm:$0xff] }
 0x367   :  { %1234 = vst [vmem:[#allocation11 + $0x10] sm:$0xff] %v1232_v60  ;;  %1579 = vmatmul.mubr.f32.vlgmr.msra.gmra.mrb[12].mxu0 %v6462_v44  ;;  %4334 = vmatmul.mubr.f32.vlgmr.msra.gmra.mrb[12].mxu1 %v6462_v44 }
 0x368   :  { %5616 = vrcp.f32 %v1432_v35  ;;  %5046 = vmatpush1.bf16.msra.mxu0 %v6328_v18  ;;  %5077 = vmatpush3.bf16.msra.mxu1 %v6330_v40  ;;  %v1439_v18 = vadd.f32 1.0, %v5615_v28  ;;  %v1442_v40 = vadd.f32 %v6211_v23, %v1424_v53  ;;  %v1938_v53 = vld [vmem:[#allocation4 + $0x90] sm:$0xff] }
 0x369   :  { %5048 = vmatprep.subr.bf16.mxu0 %v6332_v20  ;;  %5078 = vmatprep.subr.bf16.mxu1 %v5851_v0  ;;  %v6540_v9 = vpack.c.bf16 %v1941_v12, %v1938_v53  ;;  %v1954_v35 = vld [vmem:[#allocation4 + $0x110] sm:$0xff] }
 0x36a   :  { %1805 = vmatprep.mubr.f32.mxu0 %v7100_v1  ;;  %4368 = vmatprep.mubr.msk.f32.mxu1 %vm5853_vm0, %v7100_v1  ;;  %5618 = vrcp.f32 %v1439_v18  ;;  %v6557_v60 = vpack.c.bf16 %v1954_v35, %v1951_v24  ;;  %v1950_v28 = vld [vmem:[#allocation4 + $0xf0] sm:$0xff]  ;;  %v1953_v18 = vld [vmem:[#allocation4 + $0x108] sm:$0xff]  ;;  %v1465_v35 = vld [vmem:[#allocation6 + $0x58] sm:$0xff] }
 0x36c   :  { %5050 = vmatpush1.bf16.msra.mxu0 %v6341_v19  ;;  %5080 = vmatpush3.bf16.msra.mxu1 %v6343_v32 }
 0x36d   :  { %5052 = vmatprep.subr.bf16.mxu0 %v6347_v37  ;;  %5081 = vmatprep.subr.bf16.mxu1 %v5851_v0 }
 0x370   :  { %5054 = vmatpush1.bf16.msra.mxu0 %v6354_v33  ;;  %5083 = vmatpush3.bf16.msra.mxu1 %v6356_v42 }
 0x371   :  { %5056 = vmatprep.subr.bf16.mxu0 %v6360_v54  ;;  %5084 = vmatprep.subr.bf16.mxu1 %v5851_v0 }
 0x372   :  { %v5617_v20 = vpop.eup %5616 }
 0x373   :  { %v1443_v19 = vmul.f32 %v5617_v20, %v1442_v40  ;;  %v1952_v40 = vld [vmem:[#allocation4 + $0x100] sm:$0xff]  ;;  %v6560_v20 = vpack.c.bf16 %v1953_v18, %v1950_v28 }
 0x374   :  { %5058 = vmatpush1.bf16.msra.mxu0 %v6364_v43  ;;  %5086 = vmatpush3.bf16.msra.mxu1 %v6366_v49  ;;  %v5619_v23 = vpop.eup %5618  ;;  %v1456_v43 = vpop.permute.xlu1 %1455  ;;  %v1690_v18 = vld [vmem:[#allocation9 + $0x60] sm:$0xff] }
 0x375   :  { %v1444_v32 = vadd.f32 %v1443_v19, %v1238_v63  ;;  %5060 = vmatprep.subr.bf16.mxu0 %v6372_v6  ;;  %5087 = vmatprep.subr.bf16.mxu1 %v5851_v0  ;;  %v1446_v37 = vsub.f32 1.0, %v5619_v23  ;;  %v1448_v54 = vmul.f32 %v5619_v23, %v6418_v48  ;;  %vm1457_vm14 = vcmp.eq.s32.totalorder %v1456_v43, 1  ;;  %v1955_v63 = vld [vmem:[#allocation4 + $0x118] sm:$0xff]  ;;  %v1960_v23 = vld [vmem:[#allocation4 + $0x140] sm:$0xff] }
 0x376   :  { %v6563_v19 = vpack.c.bf16 %v1955_v63, %v1952_v40 }
 0x377   :  { %5620 = vtanh.f32 %v1444_v32  ;;  %v1957_v32 = vld [vmem:[#allocation4 + $0x128] sm:$0xff] }
 0x378   :  { %5062 = vmatpush1.bf16.msra.mxu0 %v6376_v59  ;;  %5089 = vmatpush3.bf16.msra.mxu1 %v6378_v50  ;;  %v1921_v50 = vld [vmem:[#allocation4 + $0x8] sm:$0xff] }
 0x379   :  { %5064 = vmatprep.subr.bf16.mxu0 %v6382_v22  ;;  %5090 = vmatprep.subr.bf16.mxu1 %v5851_v0  ;;  %v1924_v22 = vld [vmem:[#allocation4 + $0x20] sm:$0xff] }
 0x37c   :  { %5066 = vmatpush1.bf16.msra.mxu0 %v6386_v27  ;;  %5092 = vmatpush3.bf16.msra.mxu1 %v6388_v38  ;;  %v6512_v27 = vpack.c.bf16 %v1924_v22, %v1921_v50  ;;  %v1920_v38 = vld [vmem:[#allocation4] sm:$0xff]  ;;  %v1963_v50 = vld [vmem:[#allocation4 + $0x158] sm:$0xff]  ;;  %v1966_v22 = vld [vmem:[#allocation4 + $0x170] sm:$0xff] }
 0x37d   :  { %5068 = vmatprep.subr.bf16.mxu0 %v6392_v29  ;;  %5093 = vmatprep.subr.bf16.mxu1 %v5851_v0  ;;  %v1923_v29 = vld [vmem:[#allocation4 + $0x18] sm:$0xff] }
 0x380   :  { %5070 = vmatpush1.bf16.msra.mxu0 %v6396_v11  ;;  %5095 = vmatpush3.bf16.msra.mxu1 %v6398_v4  ;;  %v6514_v11 = vpack.c.bf16 %v1923_v29, %v1920_v38  ;;  %v1927_v4 = vld [vmem:[#allocation4 + $0x38] sm:$0xff]  ;;  %v6577_v38 = vpack.c.bf16 %v1966_v22, %v1963_v50  ;;  %v1962_v29 = vld [vmem:[#allocation4 + $0x150] sm:$0xff] }
 0x381   :  { %v5621_v33 = vpop.eup %5620  ;;  %5072 = vmatprep.subr.bf16.mxu0 %v6402_v52  ;;  %5096 = vmatprep.subr.bf16.mxu1 %v5851_v0  ;;  %v1930_v52 = vld [vmem:[#allocation4 + $0x50] sm:$0xff] }
 0x382   :  { %v1447_v42 = vmul.f32 %v5621_v33, %v1446_v37  ;;  %v6567_v37 = vpack.c.bf16 %v1960_v23, %v1957_v32  ;;  %v1956_v33 = vld [vmem:[#allocation4 + $0x120] sm:$0xff] }
 0x384   :  { %5074 = vmatpush1.bf16.msra.mxu0 %v6406_v13  ;;  %5098 = vmatpush3.bf16.msra.mxu1 %v6408_v26  ;;  %v1449_v49 = vadd.f32 %v1448_v54, %v1447_v42  ;;  %v6518_v13 = vpack.c.bf16 %v1930_v52, %v1927_v4  ;;  %v1926_v26 = vld [vmem:[#allocation4 + $0x30] sm:$0xff]  ;;  %v1959_v42 = vld [vmem:[#allocation4 + $0x138] sm:$0xff]  ;;  %v1965_v4 = vld [vmem:[#allocation4 + $0x168] sm:$0xff] }
 0x385   :  { %5131 = vmatprep.subr.bf16.mxu1 %v5851_v0  ;;  %5100 = vmatprep.subr.bf16.mxu0 %v6512_v27  ;;  %v1958_v54 = vld [vmem:[#allocation4 + $0x130] sm:$0xff]  ;;  %v6570_v43 = vpack.c.bf16 %v1959_v42, %v1956_v33  ;;  %v1964_v52 = vld [vmem:[#allocation4 + $0x160] sm:$0xff]  ;;  %v1691_v33 = vld [vmem:[#allocation9 + $0x68] sm:$0xff] }
 0x386   :  { %v6503_v6 = vsel %vm1457_vm14, %v1449_v49, %v6418_v48  ;;  %v1459_v59 = vsel %vm1457_vm14, %v1449_v49, 0.0  ;;  %v1929_v48 = vld [vmem:[#allocation4 + $0x48] sm:$0xff] }
 0x387   :  { %1461 = vst [vmem:[#allocation12 + $0x28] sm:$0xff] %v1459_v59  ;;  %1806 = vmatmul.mubr.f32.vlgmr.msra.gmra.mrb[14].mxu0 %v6503_v6  ;;  %4369 = vmatmul.mubr.f32.vlgmr.msra.gmra.mrb[14].mxu1 %v6503_v6  ;;  %v6520_v14 = vpack.c.bf16 %v1929_v48, %v1926_v26  ;;  %v1961_v49 = vld [vmem:[#allocation4 + $0x148] sm:$0xff]  ;;  %v6580_v26 = vpack.c.bf16 %v1965_v4, %v1962_v29  ;;  %v1967_v48 = vld [vmem:[#allocation4 + $0x178] sm:$0xff] }
 0x388   :  { %5133 = vmatpush3.bf16.msra.mxu1 %v6441_v3  ;;  %2032 = vmatprep.mubr.f32.mxu0 %v7100_v1  ;;  %v1928_v3 = vld [vmem:[#allocation4 + $0x40] sm:$0xff]  ;;  %v6573_v59 = vpack.c.bf16 %v1961_v49, %v1958_v54 }
 0x389   :  { %5134 = vmatprep.subr.bf16.mxu1 %v5851_v0  ;;  %4403 = vmatprep.mubr.msk.f32.mxu1 %vm5853_vm0, %v7100_v1  ;;  %v6523_v58 = vpack.c.bf16 %v1931_v41, %v1928_v3  ;;  %v6583_v3 = vpack.c.bf16 %v1967_v48, %v1964_v52  ;;  %v2148_v41 = vld [vmem:[#allocation4 + $0x188] sm:$0xff]  ;;  %v2147_v52 = vld [vmem:[#allocation4 + $0x180] sm:$0xff] }
 0x38a   :  { %5102 = vmatpush1.bf16.msra.mxu0 %v6514_v11  ;;  %v6587_v21 = vpack.c.bf16 %v2151_v5, %v2148_v41  ;;  %v2150_v41 = vld [vmem:[#allocation4 + $0x198] sm:$0xff]  ;;  %v2149_v5 = vld [vmem:[#allocation4 + $0x190] sm:$0xff] }
 0x38b   :  { %5104 = vmatprep.subr.bf16.mxu0 %v6518_v13 }
 0x38c   :  { %5136 = vmatpush3.bf16.msra.mxu1 %v6523_v58 }
 0x38d   :  { %5137 = vmatprep.subr.bf16.mxu1 %v5851_v0 }
 0x38e   :  { %5106 = vmatpush1.bf16.msra.mxu0 %v6520_v14 }
 0x38f   :  { %5108 = vmatprep.subr.bf16.mxu0 %v6527_v34 }
 0x390   :  { %5139 = vmatpush3.bf16.msra.mxu1 %v6533_v7 }
 0x391   :  { %5140 = vmatprep.subr.bf16.mxu1 %v5851_v0 }
 0x392   :  { %5110 = vmatpush1.bf16.msra.mxu0 %v6530_v8 }
 0x393   :  { %5112 = vmatprep.subr.bf16.mxu0 %v6537_v36 }
 0x394   :  { %5142 = vmatpush3.bf16.msra.mxu1 %v6543_v10 }
 0x395   :  { %5143 = vmatprep.subr.bf16.mxu1 %v5851_v0 }
 0x396   :  { %5114 = vmatpush1.bf16.msra.mxu0 %v6540_v9 }
 0x397   :  { %5116 = vmatprep.subr.bf16.mxu0 %v6547_v15 }
 0x398   :  { %5145 = vmatpush3.bf16.msra.mxu1 %v6553_v25 }
 0x399   :  { %5146 = vmatprep.subr.bf16.mxu1 %v5851_v0 }
 0x39a   :  { %5118 = vmatpush1.bf16.msra.mxu0 %v6550_v61 }
 0x39b   :  { %5120 = vmatprep.subr.bf16.mxu0 %v6557_v60 }
 0x39c   :  { %5148 = vmatpush3.bf16.msra.mxu1 %v6563_v19 }
 0x39d   :  { %5149 = vmatprep.subr.bf16.mxu1 %v5851_v0 }
 0x39e   :  { %5122 = vmatpush1.bf16.msra.mxu0 %v6560_v20 }
 0x39f   :  { %5124 = vmatprep.subr.bf16.mxu0 %v6567_v37 }
 0x3a0   :  { %5151 = vmatpush3.bf16.msra.mxu1 %v6573_v59 }
 0x3a1   :  { %5152 = vmatprep.subr.bf16.mxu1 %v5851_v0 }
 0x3a2   :  { %5126 = vmatpush1.bf16.msra.mxu0 %v6570_v43 }
 0x3a3   :  { %5128 = vmatprep.subr.bf16.mxu0 %v6577_v38 }
 0x3a4   :  { %5154 = vmatpush3.bf16.msra.mxu1 %v6583_v3 }
 0x3a5   :  { %5187 = vmatprep.subr.bf16.mxu1 %v5851_v0 }
 0x3a6   :  { %5130 = vmatpush1.bf16.msra.mxu0 %v6580_v26 }
 0x3a7   :  { %5156 = vmatprep.subr.bf16.mxu0 %v6587_v21 }
 0x43a   :  { %v1580_v46 = vpop.f32.mrb[12].mxu0  ;;  %v1651_v17 = vpop.f32.mrb[12].mxu1 }
 0x43b   :  { %v1655_v47 = vadd.f32 %v1580_v46, %v1463_v16  ;;  %v1582_v2 = vpop.f32.mrb[13].mxu0  ;;  %v4335_v53 = vpop.f32.mrb[13].mxu1  ;;  %v1669_v31 = vadd.f32 %v6594_v45, %v1651_v17  ;;  %v2152_v16 = vld [vmem:[#allocation4 + $0x1a8] sm:$0xff] }
 0x43c   :  { %v1662_v62 = vadd.f32 %v1582_v2, %v1464_v30  ;;  %v2157_v30 = vld [vmem:[#allocation4 + $0x1d0] sm:$0xff]  ;;  %v1683_v2 = vpop.permute.xlu0 %1682 }
 0x43d   :  { %v3794_v12 = vmul.f32 -1.442695, %v1655_v47  ;;  %v2154_v47 = vld [vmem:[#allocation4 + $0x1b8] sm:$0xff]  ;;  %vm1684_vm15 = vcmp.eq.s32.totalorder %v1683_v2, 1 }
 0x43e   :  { %v3795_v56 = vmul.f32 -1.442695, %v1662_v62  ;;  %v6602_v62 = vpack.c.bf16 %v2152_v16, %v2149_v5  ;;  %v2168_v5 = vld [vmem:[#allocation4 + $0x228] sm:$0xff]  ;;  %v2167_v16 = vld [vmem:[#allocation4 + $0x220] sm:$0xff] }
 0x43f   :  { %5622 = vpow2.f32 %v3794_v12  ;;  %v6600_v12 = vpack.c.bf16 %v2150_v41, %v2147_v52 }
 0x440   :  { %5624 = vpow2.f32 %v3795_v56  ;;  %v2153_v56 = vld [vmem:[#allocation4 + $0x1b0] sm:$0xff] }
 0x449   :  { %v5623_v57 = vpop.eup %5622 }
 0x44a   :  { %v1659_v39 = vadd.f32 1.0, %v5623_v57  ;;  %v5625_v55 = vpop.eup %5624 }
 0x44b   :  { %v1666_v51 = vadd.f32 1.0, %v5625_v55  ;;  %v2156_v55 = vld [vmem:[#allocation4 + $0x1c8] sm:$0xff] }
 0x44c   :  { %5626 = vrcp.f32 %v1659_v39  ;;  %v6604_v39 = vpack.c.bf16 %v2157_v30, %v2154_v47  ;;  %v2175_v47 = vld [vmem:[#allocation4 + $0x260] sm:$0xff] }
 0x44d   :  { %5628 = vrcp.f32 %v1666_v51  ;;  %v2155_v51 = vld [vmem:[#allocation4 + $0x1c0] sm:$0xff] }
 0x456   :  { %v5627_v24 = vpop.eup %5626 }
 0x457   :  { %v1670_v28 = vmul.f32 %v5627_v24, %v1669_v31  ;;  %v5629_v22 = vpop.eup %5628  ;;  %v2158_v31 = vld [vmem:[#allocation4 + $0x1d8] sm:$0xff] }
 0x458   :  { %v1673_v4 = vsub.f32 1.0, %v5629_v22  ;;  %v1675_v17 = vmul.f32 %v5629_v22, %v6462_v44  ;;  %v2169_v22 = vld [vmem:[#allocation4 + $0x230] sm:$0xff] }
 0x459   :  { %v1671_v40 = vadd.f32 %v1670_v28, %v1465_v35 }
 0x45a   :  { %v1807_v63 = vpop.f32.mrb[14].mxu0  ;;  %v6597_v32 = vpop.f32.mrb[14].mxu1 }
 0x45b   :  { %5630 = vtanh.f32 %v1671_v40  ;;  %v1882_v23 = vadd.f32 %v1807_v63, %v1690_v18  ;;  %v1809_v42 = vpop.f32.mrb[15].mxu0  ;;  %v4370_v54 = vpop.f32.mrb[15].mxu1  ;;  %v2160_v18 = vld [vmem:[#allocation4 + $0x1e8] sm:$0xff]  ;;  %v2163_v40 = vld [vmem:[#allocation4 + $0x200] sm:$0xff]  ;;  %v6613_v63 = vpack.c.bf16 %v2156_v55, %v2153_v56 }
 0x45c   :  { %v1889_v50 = vadd.f32 %v1809_v42, %v1691_v33  ;;  %v2159_v33 = vld [vmem:[#allocation4 + $0x1e0] sm:$0xff]  ;;  %v2162_v42 = vld [vmem:[#allocation4 + $0x1f8] sm:$0xff]  ;;  %v2161_v54 = vld [vmem:[#allocation4 + $0x1f0] sm:$0xff] }
 0x45d   :  { %v3796_v49 = vmul.f32 -1.442695, %v1882_v23  ;;  %v6615_v23 = vpack.c.bf16 %v2158_v31, %v2155_v51  ;;  %v2171_v56 = vld [vmem:[#allocation4 + $0x240] sm:$0xff]  ;;  %v2174_v31 = vld [vmem:[#allocation4 + $0x258] sm:$0xff] }
 0x45e   :  { %v3797_v29 = vmul.f32 -1.442695, %v1889_v50  ;;  %v2166_v50 = vld [vmem:[#allocation4 + $0x218] sm:$0xff] }
 0x45f   :  { %5632 = vpow2.f32 %v3796_v49  ;;  %v2164_v49 = vld [vmem:[#allocation4 + $0x208] sm:$0xff]  ;;  %v6632_v41 = vpack.c.bf16 %v2169_v22, %v2166_v50  ;;  %v2177_v50 = vld [vmem:[#allocation4 + $0x270] sm:$0xff] }
 0x460   :  { %5634 = vpow2.f32 %v3797_v29  ;;  %v6628_v52 = vpack.c.bf16 %v2164_v49, %v2161_v54 }
 0x465   :  { %v5631_v48 = vpop.eup %5630 }
 0x466   :  { %v1674_v46 = vmul.f32 %v5631_v48, %v1673_v4  ;;  %v6626_v4 = vpack.c.bf16 %v2162_v42, %v2159_v33  ;;  %v2165_v48 = vld [vmem:[#allocation4 + $0x210] sm:$0xff]  ;;  %v2178_v33 = vld [vmem:[#allocation4 + $0x278] sm:$0xff] }
 0x467   :  { %v6636_v2 = vpack.c.bf16 %v2168_v5, %v2165_v48  ;;  %v2181_v42 = vld [vmem:[#allocation4 + $0x290] sm:$0xff]  ;;  %v2180_v48 = vld [vmem:[#allocation4 + $0x288] sm:$0xff]  ;;  %v2179_v5 = vld [vmem:[#allocation4 + $0x280] sm:$0xff] }
 0x468   :  { %v1676_v53 = vadd.f32 %v1675_v17, %v1674_v46  ;;  %v2170_v46 = vld [vmem:[#allocation4 + $0x238] sm:$0xff]  ;;  %v2172_v17 = vld [vmem:[#allocation4 + $0x248] sm:$0xff] }
 0x469   :  { %v5633_v57 = vpop.eup %5632  ;;  %v6649_v51 = vpack.c.bf16 %v2175_v47, %v2172_v17  ;;  %v2187_v17 = vld [vmem:[#allocation4 + $0x2c0] sm:$0xff]  ;;  %v6663_v47 = vpack.c.bf16 %v2180_v48, %v2177_v50  ;;  %v2192_v48 = vld [vmem:[#allocation4 + $0x2e8] sm:$0xff] }
 0x46a   :  { %v1886_v24 = vadd.f32 1.0, %v5633_v57  ;;  %v6607_v35 = vsel %vm1684_vm15, %v1676_v53, %v6462_v44  ;;  %v1686_v28 = vsel %vm1684_vm15, %v1676_v53, 0.0  ;;  %v6619_v44 = vpack.c.bf16 %v2163_v40, %v2160_v18  ;;  %v5635_v29 = vpop.eup %5634  ;;  %v6643_v57 = vld [vmem:[%s7094_s3 + $0x1] ss:$0 sm:$0xff]  ;;  %v1692_v40 = vld [vmem:[#allocation9 + $0x70] sm:$0xff] }
 0x46b   :  { %1688 = vst [vmem:[#allocation11 + $0x18] sm:$0xff] %v1686_v28  ;;  %2033 = vmatmul.mubr.f32.vlgmr.msra.gmra.mrb[16].mxu0 %v6607_v35  ;;  %4404 = vmatmul.mubr.f32.vlgmr.msra.gmra.mrb[16].mxu1 %v6607_v35  ;;  %v1893_v30 = vadd.f32 1.0, %v5635_v29  ;;  %v6638_v53 = vpack.c.bf16 %v2170_v46, %v2167_v16  ;;  %v1896_v55 = vadd.f32 %v6643_v57, %v6597_v32  ;;  %v2176_v28 = vld [vmem:[#allocation4 + $0x268] sm:$0xff]  ;;  %v2182_v16 = vld [vmem:[#allocation4 + $0x298] sm:$0xff] }
 0x46c   :  { %5636 = vrcp.f32 %v1886_v24  ;;  %5158 = vmatpush1.bf16.msra.mxu0 %v6600_v12  ;;  %5189 = vmatpush3.bf16.msra.mxu1 %v6602_v62  ;;  %v2173_v24 = vld [vmem:[#allocation4 + $0x250] sm:$0xff]  ;;  %v6653_v32 = vpack.c.bf16 %v2174_v31, %v2171_v56  ;;  %v6659_v29 = vpack.c.bf16 %v2181_v42, %v2178_v33  ;;  %v2184_v46 = vld [vmem:[#allocation4 + $0x2a8] sm:$0xff]  ;;  %v2183_v56 = vld [vmem:[#allocation4 + $0x2a0] sm:$0xff] }
 0x46d   :  { %5160 = vmatprep.subr.bf16.mxu0 %v6604_v39  ;;  %5190 = vmatprep.subr.bf16.mxu1 %v5851_v0  ;;  %5638 = vrcp.f32 %v1893_v30  ;;  %v6655_v49 = vpack.c.bf16 %v2176_v28, %v2173_v24  ;;  %v6665_v30 = vpack.c.bf16 %v2182_v16, %v2179_v5  ;;  %v2186_v31 = vld [vmem:[#allocation4 + $0x2b8] sm:$0xff]  ;;  %v2185_v24 = vld [vmem:[#allocation4 + $0x2b0] sm:$0xff]  ;;  %v2188_v28 = vld [vmem:[#allocation4 + $0x2c8] sm:$0xff] }
 0x46e   :  { %2259 = vmatprep.mubr.f32.mxu0 %v7100_v1  ;;  %4438 = vmatprep.mubr.msk.f32.mxu1 %vm5853_vm0, %v7100_v1  ;;  %v6673_v33 = vpack.c.bf16 %v2186_v31, %v2183_v56  ;;  %v6675_v42 = vpack.c.bf16 %v2188_v28, %v2185_v24  ;;  %v2191_v5 = vld [vmem:[#allocation4 + $0x2e0] sm:$0xff]  ;;  %v2194_v16 = vld [vmem:[#allocation4 + $0x2f8] sm:$0xff] }
 0x470   :  { %5162 = vmatpush1.bf16.msra.mxu0 %v6613_v63  ;;  %5192 = vmatpush3.bf16.msra.mxu1 %v6615_v23 }
 0x471   :  { %5164 = vmatprep.subr.bf16.mxu0 %v6619_v44  ;;  %5193 = vmatprep.subr.bf16.mxu1 %v5851_v0 }
 0x474   :  { %5166 = vmatpush1.bf16.msra.mxu0 %v6626_v4  ;;  %5195 = vmatpush3.bf16.msra.mxu1 %v6628_v52 }
 0x475   :  { %5168 = vmatprep.subr.bf16.mxu0 %v6632_v41  ;;  %5196 = vmatprep.subr.bf16.mxu1 %v5851_v0 }
 0x476   :  { %v5637_v18 = vpop.eup %5636 }
 0x477   :  { %v1897_v54 = vmul.f32 %v5637_v18, %v1896_v55  ;;  %v6669_v55 = vpack.c.bf16 %v2187_v17, %v2184_v46  ;;  %v2190_v18 = vld [vmem:[#allocation4 + $0x2d8] sm:$0xff]  ;;  %v5639_v50 = vpop.eup %5638  ;;  %v6685_v17 = vpack.c.bf16 %v2194_v16, %v2191_v5  ;;  %v2145_v5 = vld [vmem:[#allocation9 + $0x50] sm:$0xff] }
 0x478   :  { %5170 = vmatpush1.bf16.msra.mxu0 %v6636_v2  ;;  %5198 = vmatpush3.bf16.msra.mxu1 %v6638_v53  ;;  %v1900_v56 = vsub.f32 1.0, %v5639_v50  ;;  %v1902_v28 = vmul.f32 %v5639_v50, %v6503_v6 }
 0x479   :  { %v1898_v22 = vadd.f32 %v1897_v54, %v1692_v40  ;;  %5172 = vmatprep.subr.bf16.mxu0 %v6649_v51  ;;  %5199 = vmatprep.subr.bf16.mxu1 %v5851_v0  ;;  %v2193_v40 = vld [vmem:[#allocation4 + $0x2f0] sm:$0xff] }
 0x47a   :  { %v2189_v54 = vld [vmem:[#allocation4 + $0x2d0] sm:$0xff] }
 0x47b   :  { %5640 = vtanh.f32 %v1898_v22  ;;  %v6679_v22 = vpack.c.bf16 %v2193_v40, %v2190_v18  ;;  %v6683_v46 = vpack.c.bf16 %v2192_v48, %v2189_v54  ;;  %v1910_v18 = vpop.permute.xlu1 %1909 }
 0x47c   :  { %5174 = vmatpush1.bf16.msra.mxu0 %v6653_v32  ;;  %5201 = vmatpush3.bf16.msra.mxu1 %v6655_v49  ;;  %vm1911_vm1 = vcmp.eq.s32.totalorder %v1910_v18, 1 }
 0x47d   :  { %5176 = vmatprep.subr.bf16.mxu0 %v6659_v29  ;;  %5202 = vmatprep.subr.bf16.mxu1 %v5851_v0 }
 0x480   :  { %5178 = vmatpush1.bf16.msra.mxu0 %v6663_v47  ;;  %5204 = vmatpush3.bf16.msra.mxu1 %v6665_v30 }
 0x481   :  { %5180 = vmatprep.subr.bf16.mxu0 %v6669_v55  ;;  %5205 = vmatprep.subr.bf16.mxu1 %v5851_v0 }
 0x484   :  { %5182 = vmatpush1.bf16.msra.mxu0 %v6673_v33  ;;  %5207 = vmatpush3.bf16.msra.mxu1 %v6675_v42 }
 0x485   :  { %v5641_v31 = vpop.eup %5640  ;;  %5184 = vmatprep.subr.bf16.mxu0 %v6679_v22  ;;  %5208 = vmatprep.subr.bf16.mxu1 %v5851_v0 }
 0x486   :  { %v1901_v24 = vmul.f32 %v5641_v31, %v1900_v56 }
 0x488   :  { %5186 = vmatpush1.bf16.msra.mxu0 %v6683_v46  ;;  %5210 = vmatpush3.bf16.msra.mxu1 %v6685_v17  ;;  %v1903_v40 = vadd.f32 %v1902_v28, %v1901_v24 }
 0x489   :  { %5212 = vmatprep.subr.bf16.mxu0 %v6512_v27  ;;  %5243 = vmatprep.subr.bf16.mxu1 %v5851_v0  ;;  %v2379_v27 = vld [vmem:[#allocation4 + $0x28] sm:$0xff] }
 0x48a   :  { %v6695_v54 = vsel %vm1911_vm1, %v1903_v40, %v6503_v6  ;;  %v1913_v48 = vsel %vm1911_vm1, %v1903_v40, 0.0  ;;  %v2376_v6 = vld [vmem:[#allocation4 + $0x10] sm:$0xff] }
 0x48b   :  { %1915 = vst [vmem:[#allocation12 + $0x20] sm:$0xff] %v1913_v48  ;;  %2260 = vmatmul.mubr.f32.vlgmr.msra.gmra.mrb[18].mxu0 %v6695_v54  ;;  %4439 = vmatmul.mubr.f32.vlgmr.msra.gmra.mrb[18].mxu1 %v6695_v54 }
 0x48c   :  { %5214 = vmatpush1.bf16.msra.mxu0 %v6514_v11  ;;  %2486 = vmatprep.mubr.f32.mxu0 %v7100_v1  ;;  %v6718_v11 = vpack.c.bf16 %v2379_v27, %v2376_v6 }
 0x48d   :  { %5216 = vmatprep.subr.bf16.mxu0 %v6518_v13  ;;  %4473 = vmatprep.mubr.msk.f32.mxu1 %vm5853_vm0, %v7100_v1  ;;  %v1917_v13 = vld [vmem:[#allocation6 + $0x60] sm:$0xff] }
 0x48e   :  { %5245 = vmatpush3.bf16.msra.mxu1 %v6718_v11 }
 0x48f   :  { %5246 = vmatprep.subr.bf16.mxu1 %v5851_v0 }
 0x490   :  { %5218 = vmatpush1.bf16.msra.mxu0 %v6520_v14 }
 0x491   :  { %5220 = vmatprep.subr.bf16.mxu0 %v6527_v34 }
 0x492   :  { %5248 = vmatpush3.bf16.msra.mxu1 %v6523_v58 }
 0x493   :  { %5249 = vmatprep.subr.bf16.mxu1 %v5851_v0 }
 0x494   :  { %5222 = vmatpush1.bf16.msra.mxu0 %v6530_v8  ;;  %v1918_v8 = vld [vmem:[#allocation6 + $0x68] sm:$0xff] }
 0x495   :  { %5224 = vmatprep.subr.bf16.mxu0 %v6537_v36 }
 0x496   :  { %5251 = vmatpush3.bf16.msra.mxu1 %v6533_v7 }
 0x497   :  { %5252 = vmatprep.subr.bf16.mxu1 %v5851_v0 }
 0x498   :  { %5226 = vmatpush1.bf16.msra.mxu0 %v6540_v9 }
 0x499   :  { %5228 = vmatprep.subr.bf16.mxu0 %v6547_v15 }
 0x49a   :  { %5254 = vmatpush3.bf16.msra.mxu1 %v6543_v10 }
 0x49b   :  { %5255 = vmatprep.subr.bf16.mxu1 %v5851_v0 }
 0x49c   :  { %5230 = vmatpush1.bf16.msra.mxu0 %v6550_v61 }
 0x49d   :  { %5232 = vmatprep.subr.bf16.mxu0 %v6557_v60 }
 0x49e   :  { %5257 = vmatpush3.bf16.msra.mxu1 %v6553_v25 }
 0x49f   :  { %5258 = vmatprep.subr.bf16.mxu1 %v5851_v0 }
 0x4a0   :  { %5234 = vmatpush1.bf16.msra.mxu0 %v6560_v20 }
 0x4a1   :  { %5236 = vmatprep.subr.bf16.mxu0 %v6567_v37 }
 0x4a2   :  { %5260 = vmatpush3.bf16.msra.mxu1 %v6563_v19 }
 0x4a3   :  { %5261 = vmatprep.subr.bf16.mxu1 %v5851_v0 }
 0x4a4   :  { %5238 = vmatpush1.bf16.msra.mxu0 %v6570_v43  ;;  %v1919_v43 = vld [vmem:[#allocation6 + $0x70] sm:$0xff] }
 0x4a5   :  { %5240 = vmatprep.subr.bf16.mxu0 %v6577_v38  ;;  %v2144_v38 = vld [vmem:[#allocation9 + $0x48] sm:$0xff] }
 0x4a6   :  { %5263 = vmatpush3.bf16.msra.mxu1 %v6573_v59 }
 0x4a7   :  { %5264 = vmatprep.subr.bf16.mxu1 %v5851_v0 }
 0x4a8   :  { %5242 = vmatpush1.bf16.msra.mxu0 %v6580_v26 }
 0x4a9   :  { %5268 = vmatprep.subr.bf16.mxu0 %v6587_v21 }
 0x4aa   :  { %5266 = vmatpush3.bf16.msra.mxu1 %v6583_v3 }
 0x4ab   :  { %5299 = vmatprep.subr.bf16.mxu1 %v5851_v0 }
 0x53e   :  { %v2034_v14 = vpop.f32.mrb[16].mxu0  ;;  %v2105_v58 = vpop.f32.mrb[16].mxu1 }
 0x53f   :  { %v2109_v34 = vadd.f32 %v2034_v14, %v1917_v13  ;;  %v2036_v7 = vpop.f32.mrb[17].mxu0  ;;  %v4405_v36 = vpop.f32.mrb[17].mxu1  ;;  %v2123_v19 = vadd.f32 %v6594_v45, %v2105_v58 }
 0x540   :  { %v2116_v10 = vadd.f32 %v2036_v7, %v1918_v8  ;;  %v2137_v13 = vpop.permute.xlu0 %2136  ;;  %v2146_v36 = vld [vmem:[#allocation9 + $0x58] sm:$0xff] }
 0x541   :  { %v3798_v9 = vmul.f32 -1.442695, %v2109_v34  ;;  %vm2138_vm2 = vcmp.eq.s32.totalorder %v2137_v13, 1  ;;  %v2854_v13 = vld [vmem:[#allocation4 + $0xd0] sm:$0xff] }
 0x542   :  { %v3799_v15 = vmul.f32 -1.442695, %v2116_v10 }
 0x543   :  { %5642 = vpow2.f32 %v3798_v9  ;;  %v2836_v9 = vld [vmem:[#allocation4 + $0x40] sm:$0xff] }
 0x544   :  { %5644 = vpow2.f32 %v3799_v15  ;;  %v2839_v15 = vld [vmem:[#allocation4 + $0x58] sm:$0xff] }
 0x54d   :  { %v5643_v61 = vpop.eup %5642 }
 0x54e   :  { %v2113_v25 = vadd.f32 1.0, %v5643_v61  ;;  %v5645_v60 = vpop.eup %5644  ;;  %v6800_v61 = vpack.c.bf16 %v2839_v15, %v2836_v9  ;;  %v2875_v15 = vld [vmem:[#allocation4 + $0x178] sm:$0xff] }
 0x54f   :  { %v2120_v20 = vadd.f32 1.0, %v5645_v60  ;;  %v2844_v60 = vld [vmem:[#allocation4 + $0x80] sm:$0xff] }
 0x550   :  { %5646 = vrcp.f32 %v2113_v25  ;;  %v2841_v25 = vld [vmem:[#allocation4 + $0x68] sm:$0xff] }
 0x551   :  { %5648 = vrcp.f32 %v2120_v20  ;;  %v6804_v20 = vpack.c.bf16 %v2844_v60, %v2841_v25  ;;  %v3056_v60 = vld [vmem:[#allocation4 + $0x188] sm:$0xff] }
 0x55a   :  { %v5647_v37 = vpop.eup %5646 }
 0x55b   :  { %v2124_v59 = vmul.f32 %v5647_v37, %v2123_v19  ;;  %v5649_v28 = vpop.eup %5648  ;;  %v2840_v19 = vld [vmem:[#allocation4 + $0x60] sm:$0xff]  ;;  %v2843_v37 = vld [vmem:[#allocation4 + $0x78] sm:$0xff] }
 0x55c   :  { %v2127_v40 = vsub.f32 1.0, %v5649_v28  ;;  %v2129_v27 = vmul.f32 %v5649_v28, %v6607_v35 }
 0x55d   :  { %v2125_v26 = vadd.f32 %v2124_v59, %v1919_v43  ;;  %v2842_v43 = vld [vmem:[#allocation4 + $0x70] sm:$0xff]  ;;  %v6807_v59 = vpack.c.bf16 %v2843_v37, %v2840_v19  ;;  %v3059_v19 = vld [vmem:[#allocation4 + $0x1a0] sm:$0xff] }
 0x55e   :  { %v2261_v3 = vpop.f32.mrb[18].mxu0  ;;  %v2332_v21 = vpop.f32.mrb[18].mxu1  ;;  %v6864_v37 = vpack.c.bf16 %v3059_v19, %v3056_v60  ;;  %v3058_v60 = vld [vmem:[#allocation4 + $0x198] sm:$0xff]  ;;  %v3057_v19 = vld [vmem:[#allocation4 + $0x190] sm:$0xff] }
 0x55f   :  { %5650 = vtanh.f32 %v2125_v26  ;;  %v2336_v50 = vadd.f32 %v2261_v3, %v2144_v38  ;;  %v2263_v16 = vpop.f32.mrb[19].mxu0  ;;  %v4440_v56 = vpop.f32.mrb[19].mxu1  ;;  %v2845_v38 = vld [vmem:[#allocation4 + $0x88] sm:$0xff]  ;;  %v2847_v3 = vld [vmem:[#allocation4 + $0x98] sm:$0xff] }
 0x560   :  { %v2343_v24 = vadd.f32 %v2263_v16, %v2145_v5  ;;  %v6810_v26 = vpack.c.bf16 %v2845_v38, %v2842_v43  ;;  %v2846_v5 = vld [vmem:[#allocation4 + $0x90] sm:$0xff]  ;;  %v2849_v16 = vld [vmem:[#allocation4 + $0xa8] sm:$0xff]  ;;  %v2848_v56 = vld [vmem:[#allocation4 + $0xa0] sm:$0xff] }
 0x561   :  { %v3800_v31 = vmul.f32 -1.442695, %v2336_v50  ;;  %v2371_v43 = vld [vmem:[#allocation6 + $0x78] sm:$0xff] }
 0x562   :  { %v3801_v18 = vmul.f32 -1.442695, %v2343_v24  ;;  %v2851_v24 = vld [vmem:[#allocation4 + $0xb8] sm:$0xff] }
 0x563   :  { %5652 = vpow2.f32 %v3800_v31  ;;  %v6817_v31 = vpack.c.bf16 %v2849_v16, %v2846_v5  ;;  %v6820_v28 = vpack.c.bf16 %v2851_v24, %v2848_v56  ;;  %v2372_v5 = vld [vmem:[#allocation6 + $0x80] sm:$0xff] }
 0x564   :  { %5654 = vpow2.f32 %v3801_v18  ;;  %v2853_v18 = vld [vmem:[#allocation4 + $0xc8] sm:$0xff] }
 0x569   :  { %v5651_v48 = vpop.eup %5650 }
 0x56a   :  { %v2128_v6 = vmul.f32 %v5651_v48, %v2127_v40  ;;  %v2856_v40 = vld [vmem:[#allocation4 + $0xe0] sm:$0xff] }
 0x56b   :  { %v6824_v48 = vpack.c.bf16 %v2856_v40, %v2853_v18 }
 0x56c   :  { %v2130_v14 = vadd.f32 %v2129_v27, %v2128_v6  ;;  %v2852_v6 = vld [vmem:[#allocation4 + $0xc0] sm:$0xff]  ;;  %v2855_v27 = vld [vmem:[#allocation4 + $0xd8] sm:$0xff] }
 0x56d   :  { %v5653_v58 = vpop.eup %5652 }
 0x56e   :  { %v2340_v34 = vadd.f32 1.0, %v5653_v58  ;;  %v6739_v8 = vsel %vm2138_vm2, %v2130_v14, %v6607_v35  ;;  %v2140_v7 = vsel %vm2138_vm2, %v2130_v14, 0.0  ;;  %v5655_v35 = vpop.eup %5654  ;;  %v6827_v14 = vpack.c.bf16 %v2855_v27, %v2852_v6  ;;  %v2857_v58 = vld [vmem:[#allocation4 + $0xe8] sm:$0xff] }
 0x56f   :  { %2142 = vst [vmem:[#allocation11 + $0x20] sm:$0xff] %v2140_v7  ;;  %2487 = vmatmul.mubr.f32.vlgmr.msra.gmra.mrb[20].mxu0 %v6739_v8  ;;  %4474 = vmatmul.mubr.f32.vlgmr.msra.gmra.mrb[20].mxu1 %v6739_v8  ;;  %v2859_v7 = vld [vmem:[#allocation4 + $0xf8] sm:$0xff] }
 0x570   :  { %5656 = vrcp.f32 %v2340_v34  ;;  %5270 = vmatpush1.bf16.msra.mxu0 %v6600_v12  ;;  %5301 = vmatpush3.bf16.msra.mxu1 %v6602_v62  ;;  %v2347_v12 = vadd.f32 1.0, %v5655_v35  ;;  %v2350_v62 = vadd.f32 %v6643_v57, %v2332_v21  ;;  %v2850_v21 = vld [vmem:[#allocation4 + $0xb0] sm:$0xff]  ;;  %v6830_v34 = vpack.c.bf16 %v2857_v58, %v2854_v13 }
 0x571   :  { %5272 = vmatprep.subr.bf16.mxu0 %v6604_v39  ;;  %5302 = vmatprep.subr.bf16.mxu1 %v5851_v0  ;;  %v6814_v50 = vpack.c.bf16 %v2850_v21, %v2847_v3  ;;  %v2862_v35 = vld [vmem:[#allocation4 + $0x110] sm:$0xff] }
 0x572   :  { %2713 = vmatprep.mubr.f32.mxu0 %v7100_v1  ;;  %4508 = vmatprep.mubr.msk.f32.mxu1 %vm5853_vm0, %v7100_v1  ;;  %5658 = vrcp.f32 %v2347_v12  ;;  %v6834_v12 = vpack.c.bf16 %v2862_v35, %v2859_v7 }
 0x574   :  { %5274 = vmatpush1.bf16.msra.mxu0 %v6613_v63  ;;  %5304 = vmatpush3.bf16.msra.mxu1 %v6615_v23 }
 0x575   :  { %5276 = vmatprep.subr.bf16.mxu0 %v6619_v44  ;;  %5305 = vmatprep.subr.bf16.mxu1 %v5851_v0 }
 0x578   :  { %5278 = vmatpush1.bf16.msra.mxu0 %v6626_v4  ;;  %5307 = vmatpush3.bf16.msra.mxu1 %v6628_v52 }
 0x579   :  { %5280 = vmatprep.subr.bf16.mxu0 %v6632_v41  ;;  %5308 = vmatprep.subr.bf16.mxu1 %v5851_v0 }
 0x57a   :  { %v5657_v39 = vpop.eup %5656 }
 0x57b   :  { %v2351_v63 = vmul.f32 %v5657_v39, %v2350_v62  ;;  %v2858_v62 = vld [vmem:[#allocation4 + $0xf0] sm:$0xff]  ;;  %v2861_v39 = vld [vmem:[#allocation4 + $0x108] sm:$0xff] }
 0x57c   :  { %5282 = vmatpush1.bf16.msra.mxu0 %v6636_v2  ;;  %5310 = vmatpush3.bf16.msra.mxu1 %v6638_v53  ;;  %v5659_v44 = vpop.eup %5658  ;;  %v2364_v53 = vpop.permute.xlu1 %2363 }
 0x57d   :  { %v2352_v23 = vadd.f32 %v2351_v63, %v2146_v36  ;;  %5284 = vmatprep.subr.bf16.mxu0 %v6649_v51  ;;  %5311 = vmatprep.subr.bf16.mxu1 %v5851_v0  ;;  %v2354_v4 = vsub.f32 1.0, %v5659_v44  ;;  %v2356_v2 = vmul.f32 %v5659_v44, %v6695_v54  ;;  %vm2365_vm3 = vcmp.eq.s32.totalorder %v2364_v53, 1  ;;  %v2860_v36 = vld [vmem:[#allocation4 + $0x100] sm:$0xff]  ;;  %v2867_v53 = vld [vmem:[#allocation4 + $0x138] sm:$0xff] }
 0x57e   :  { %v6837_v63 = vpack.c.bf16 %v2861_v39, %v2858_v62  ;;  %v2373_v62 = vld [vmem:[#allocation6 + $0x88] sm:$0xff] }
 0x57f   :  { %5660 = vtanh.f32 %v2352_v23  ;;  %v2863_v23 = vld [vmem:[#allocation4 + $0x118] sm:$0xff] }
 0x580   :  { %5286 = vmatpush1.bf16.msra.mxu0 %v6653_v32  ;;  %5313 = vmatpush3.bf16.msra.mxu1 %v6655_v49  ;;  %v6840_v44 = vpack.c.bf16 %v2863_v23, %v2860_v36  ;;  %v2598_v36 = vld [vmem:[#allocation9 + $0x30] sm:$0xff] }
 0x581   :  { %5288 = vmatprep.subr.bf16.mxu0 %v6659_v29  ;;  %5314 = vmatprep.subr.bf16.mxu1 %v5851_v0  ;;  %v2829_v29 = vld [vmem:[#allocation4 + $0x8] sm:$0xff] }
 0x584   :  { %5290 = vmatpush1.bf16.msra.mxu0 %v6663_v47  ;;  %5316 = vmatpush3.bf16.msra.mxu1 %v6665_v30  ;;  %v2832_v47 = vld [vmem:[#allocation4 + $0x20] sm:$0xff] }
 0x585   :  { %5292 = vmatprep.subr.bf16.mxu0 %v6669_v55  ;;  %5317 = vmatprep.subr.bf16.mxu1 %v5851_v0  ;;  %v6789_v30 = vpack.c.bf16 %v2832_v47, %v2829_v29  ;;  %v2828_v55 = vld [vmem:[#allocation4] sm:$0xff]  ;;  %v2869_v29 = vld [vmem:[#allocation4 + $0x148] sm:$0xff] }
 0x588   :  { %5294 = vmatpush1.bf16.msra.mxu0 %v6673_v33  ;;  %5319 = vmatpush3.bf16.msra.mxu1 %v6675_v42  ;;  %v2831_v33 = vld [vmem:[#allocation4 + $0x18] sm:$0xff] }
 0x589   :  { %v5661_v52 = vpop.eup %5660  ;;  %5296 = vmatprep.subr.bf16.mxu0 %v6679_v22  ;;  %5320 = vmatprep.subr.bf16.mxu1 %v5851_v0  ;;  %v6791_v42 = vpack.c.bf16 %v2831_v33, %v2828_v55  ;;  %v2835_v22 = vld [vmem:[#allocation4 + $0x38] sm:$0xff]  ;;  %v2874_v33 = vld [vmem:[#allocation4 + $0x170] sm:$0xff] }
 0x58a   :  { %v2355_v41 = vmul.f32 %v5661_v52, %v2354_v4  ;;  %v2865_v4 = vld [vmem:[#allocation4 + $0x128] sm:$0xff]  ;;  %v2868_v52 = vld [vmem:[#allocation4 + $0x140] sm:$0xff]  ;;  %v2871_v55 = vld [vmem:[#allocation4 + $0x158] sm:$0xff] }
 0x58c   :  { %5298 = vmatpush1.bf16.msra.mxu0 %v6683_v46  ;;  %5322 = vmatpush3.bf16.msra.mxu1 %v6685_v17  ;;  %v2357_v51 = vadd.f32 %v2356_v2, %v2355_v41  ;;  %v2838_v46 = vld [vmem:[#allocation4 + $0x50] sm:$0xff]  ;;  %v6844_v41 = vpack.c.bf16 %v2868_v52, %v2865_v4  ;;  %v2864_v2 = vld [vmem:[#allocation4 + $0x120] sm:$0xff] }
 0x58d   :  { %5355 = vmatprep.subr.bf16.mxu1 %v5851_v0  ;;  %5324 = vmatprep.subr.bf16.mxu0 %v6789_v30  ;;  %v6795_v17 = vpack.c.bf16 %v2838_v46, %v2835_v22  ;;  %v6854_v22 = vpack.c.bf16 %v2874_v33, %v2871_v55  ;;  %v2870_v46 = vld [vmem:[#allocation4 + $0x150] sm:$0xff] }
 0x58e   :  { %v6780_v32 = vsel %vm2365_vm3, %v2357_v51, %v6695_v54  ;;  %v2367_v49 = vsel %vm2365_vm3, %v2357_v51, 0.0  ;;  %v2834_v54 = vld [vmem:[#allocation4 + $0x30] sm:$0xff] }
 0x58f   :  { %2369 = vst [vmem:[#allocation12 + $0x18] sm:$0xff] %v2367_v49  ;;  %2714 = vmatmul.mubr.f32.vlgmr.msra.gmra.mrb[22].mxu0 %v6780_v32  ;;  %4509 = vmatmul.mubr.f32.vlgmr.msra.gmra.mrb[22].mxu1 %v6780_v32  ;;  %v2866_v51 = vld [vmem:[#allocation4 + $0x130] sm:$0xff]  ;;  %v6847_v49 = vpack.c.bf16 %v2867_v53, %v2864_v2  ;;  %v2599_v53 = vld [vmem:[#allocation9 + $0x38] sm:$0xff] }
 0x590   :  { %5357 = vmatpush3.bf16.msra.mxu1 %v6718_v11  ;;  %2940 = vmatprep.mubr.f32.mxu0 %v7100_v1  ;;  %v2837_v11 = vld [vmem:[#allocation4 + $0x48] sm:$0xff]  ;;  %v6850_v47 = vpack.c.bf16 %v2869_v29, %v2866_v51 }
 0x591   :  { %5358 = vmatprep.subr.bf16.mxu1 %v5851_v0  ;;  %4543 = vmatprep.mubr.msk.f32.mxu1 %vm5853_vm0, %v7100_v1  ;;  %v6797_v10 = vpack.c.bf16 %v2837_v11, %v2834_v54  ;;  %v2873_v54 = vld [vmem:[#allocation4 + $0x168] sm:$0xff]  ;;  %v2872_v11 = vld [vmem:[#allocation4 + $0x160] sm:$0xff] }
 0x592   :  { %5326 = vmatpush1.bf16.msra.mxu0 %v6791_v42  ;;  %v6857_v9 = vpack.c.bf16 %v2873_v54, %v2870_v46  ;;  %v6860_v25 = vpack.c.bf16 %v2875_v15, %v2872_v11  ;;  %v3055_v11 = vld [vmem:[#allocation4 + $0x180] sm:$0xff] }
 0x593   :  { %5328 = vmatprep.subr.bf16.mxu0 %v6795_v17 }
 0x594   :  { %5360 = vmatpush3.bf16.msra.mxu1 %v6800_v61 }
 0x595   :  { %5361 = vmatprep.subr.bf16.mxu1 %v5851_v0 }
 0x596   :  { %5330 = vmatpush1.bf16.msra.mxu0 %v6797_v10 }
 0x597   :  { %5332 = vmatprep.subr.bf16.mxu0 %v6804_v20 }
 0x598   :  { %5363 = vmatpush3.bf16.msra.mxu1 %v6810_v26 }
 0x599   :  { %5364 = vmatprep.subr.bf16.mxu1 %v5851_v0 }
 0x59a   :  { %5334 = vmatpush1.bf16.msra.mxu0 %v6807_v59 }
 0x59b   :  { %5336 = vmatprep.subr.bf16.mxu0 %v6814_v50 }
 0x59c   :  { %5366 = vmatpush3.bf16.msra.mxu1 %v6820_v28 }
 0x59d   :  { %5367 = vmatprep.subr.bf16.mxu1 %v5851_v0 }
 0x59e   :  { %5338 = vmatpush1.bf16.msra.mxu0 %v6817_v31 }
 0x59f   :  { %5340 = vmatprep.subr.bf16.mxu0 %v6824_v48 }
 0x5a0   :  { %5369 = vmatpush3.bf16.msra.mxu1 %v6830_v34 }
 0x5a1   :  { %5370 = vmatprep.subr.bf16.mxu1 %v5851_v0 }
 0x5a2   :  { %5342 = vmatpush1.bf16.msra.mxu0 %v6827_v14 }
 0x5a3   :  { %5344 = vmatprep.subr.bf16.mxu0 %v6834_v12 }
 0x5a4   :  { %5372 = vmatpush3.bf16.msra.mxu1 %v6840_v44 }
 0x5a5   :  { %5373 = vmatprep.subr.bf16.mxu1 %v5851_v0 }
 0x5a6   :  { %5346 = vmatpush1.bf16.msra.mxu0 %v6837_v63 }
 0x5a7   :  { %5348 = vmatprep.subr.bf16.mxu0 %v6844_v41 }
 0x5a8   :  { %5375 = vmatpush3.bf16.msra.mxu1 %v6850_v47 }
 0x5a9   :  { %5376 = vmatprep.subr.bf16.mxu1 %v5851_v0 }
 0x5aa   :  { %5350 = vmatpush1.bf16.msra.mxu0 %v6847_v49 }
 0x5ab   :  { %5352 = vmatprep.subr.bf16.mxu0 %v6854_v22 }
 0x5ac   :  { %5378 = vmatpush3.bf16.msra.mxu1 %v6860_v25 }
 0x5ad   :  { %5411 = vmatprep.subr.bf16.mxu1 %v5851_v0 }
 0x5ae   :  { %5354 = vmatpush1.bf16.msra.mxu0 %v6857_v9 }
 0x5af   :  { %5380 = vmatprep.subr.bf16.mxu0 %v6864_v37 }
 0x642   :  { %v2488_v38 = vpop.f32.mrb[20].mxu0  ;;  %v2559_v3 = vpop.f32.mrb[20].mxu1 }
 0x643   :  { %v2563_v21 = vadd.f32 %v2488_v38, %v2371_v43  ;;  %v2490_v16 = vpop.f32.mrb[21].mxu0  ;;  %v4475_v56 = vpop.f32.mrb[21].mxu1  ;;  %v2577_v7 = vadd.f32 %v6594_v45, %v2559_v3  ;;  %v3060_v43 = vld [vmem:[#allocation4 + $0x1a8] sm:$0xff] }
 0x644   :  { %v2570_v18 = vadd.f32 %v2490_v16, %v2372_v5  ;;  %v3065_v5 = vld [vmem:[#allocation4 + $0x1d0] sm:$0xff]  ;;  %v2591_v16 = vpop.permute.xlu0 %2590 }
 0x645   :  { %v3802_v24 = vmul.f32 -1.442695, %v2563_v21  ;;  %v3062_v21 = vld [vmem:[#allocation4 + $0x1b8] sm:$0xff]  ;;  %vm2592_vm4 = vcmp.eq.s32.totalorder %v2591_v16, 1 }
 0x646   :  { %v3803_v40 = vmul.f32 -1.442695, %v2570_v18  ;;  %v6874_v18 = vpack.c.bf16 %v3060_v43, %v3057_v19  ;;  %v3076_v19 = vld [vmem:[#allocation4 + $0x228] sm:$0xff]  ;;  %v3075_v43 = vld [vmem:[#allocation4 + $0x220] sm:$0xff] }
 0x647   :  { %5662 = vpow2.f32 %v3802_v24  ;;  %v6872_v24 = vpack.c.bf16 %v3058_v60, %v3055_v11 }
 0x648   :  { %5664 = vpow2.f32 %v3803_v40  ;;  %v3061_v40 = vld [vmem:[#allocation4 + $0x1b0] sm:$0xff] }
 0x651   :  { %v5663_v6 = vpop.eup %5662 }
 0x652   :  { %v2567_v27 = vadd.f32 1.0, %v5663_v6  ;;  %v5665_v13 = vpop.eup %5664 }
 0x653   :  { %v2574_v58 = vadd.f32 1.0, %v5665_v13  ;;  %v3064_v13 = vld [vmem:[#allocation4 + $0x1c8] sm:$0xff] }
 0x654   :  { %5666 = vrcp.f32 %v2567_v27  ;;  %v6876_v27 = vpack.c.bf16 %v3065_v5, %v3062_v21  ;;  %v3083_v21 = vld [vmem:[#allocation4 + $0x260] sm:$0xff] }
 0x655   :  { %5668 = vrcp.f32 %v2574_v58  ;;  %v3063_v58 = vld [vmem:[#allocation4 + $0x1c0] sm:$0xff] }
 0x65e   :  { %v5667_v35 = vpop.eup %5666 }
 0x65f   :  { %v2578_v39 = vmul.f32 %v5667_v35, %v2577_v7  ;;  %v5669_v46 = vpop.eup %5668  ;;  %v3066_v7 = vld [vmem:[#allocation4 + $0x1d8] sm:$0xff] }
 0x660   :  { %v2581_v45 = vsub.f32 1.0, %v5669_v46  ;;  %v2583_v3 = vmul.f32 %v5669_v46, %v6739_v8  ;;  %v3077_v46 = vld [vmem:[#allocation4 + $0x230] sm:$0xff] }
 0x661   :  { %v2579_v23 = vadd.f32 %v2578_v39, %v2373_v62 }
 0x662   :  { %v2715_v4 = vpop.f32.mrb[22].mxu0  ;;  %v6869_v52 = vpop.f32.mrb[22].mxu1 }
 0x663   :  { %5670 = vtanh.f32 %v2579_v23  ;;  %v2790_v2 = vadd.f32 %v2715_v4, %v2598_v36  ;;  %v2717_v51 = vpop.f32.mrb[23].mxu0  ;;  %v4510_v29 = vpop.f32.mrb[23].mxu1  ;;  %v3068_v36 = vld [vmem:[#allocation4 + $0x1e8] sm:$0xff]  ;;  %v3071_v23 = vld [vmem:[#allocation4 + $0x200] sm:$0xff]  ;;  %v6885_v4 = vpack.c.bf16 %v3064_v13, %v3061_v40 }
 0x664   :  { %v2797_v33 = vadd.f32 %v2717_v51, %v2599_v53  ;;  %v3067_v53 = vld [vmem:[#allocation4 + $0x1e0] sm:$0xff]  ;;  %v3070_v51 = vld [vmem:[#allocation4 + $0x1f8] sm:$0xff]  ;;  %v3069_v29 = vld [vmem:[#allocation4 + $0x1f0] sm:$0xff] }
 0x665   :  { %v3804_v55 = vmul.f32 -1.442695, %v2790_v2  ;;  %v6887_v2 = vpack.c.bf16 %v3066_v7, %v3063_v58  ;;  %v3079_v40 = vld [vmem:[#allocation4 + $0x240] sm:$0xff]  ;;  %v3082_v58 = vld [vmem:[#allocation4 + $0x258] sm:$0xff]  ;;  %v3081_v7 = vld [vmem:[#allocation4 + $0x250] sm:$0xff] }
 0x666   :  { %v3805_v54 = vmul.f32 -1.442695, %v2797_v33  ;;  %v3074_v33 = vld [vmem:[#allocation4 + $0x218] sm:$0xff] }
 0x667   :  { %5672 = vpow2.f32 %v3804_v55  ;;  %v3072_v55 = vld [vmem:[#allocation4 + $0x208] sm:$0xff]  ;;  %v6904_v60 = vpack.c.bf16 %v3077_v46, %v3074_v33 }
 0x668   :  { %5674 = vpow2.f32 %v3805_v54  ;;  %v6900_v11 = vpack.c.bf16 %v3072_v55, %v3069_v29  ;;  %v3085_v29 = vld [vmem:[#allocation4 + $0x270] sm:$0xff]  ;;  %v3088_v46 = vld [vmem:[#allocation4 + $0x288] sm:$0xff] }
 0x66d   :  { %v5671_v15 = vpop.eup %5670 }
 0x66e   :  { %v2582_v38 = vmul.f32 %v5671_v15, %v2581_v45  ;;  %v6898_v45 = vpack.c.bf16 %v3070_v51, %v3067_v53  ;;  %v3073_v15 = vld [vmem:[#allocation4 + $0x210] sm:$0xff] }
 0x66f   :  { %v6908_v16 = vpack.c.bf16 %v3076_v19, %v3073_v15  ;;  %v3089_v53 = vld [vmem:[#allocation4 + $0x290] sm:$0xff]  ;;  %v3090_v15 = vld [vmem:[#allocation4 + $0x298] sm:$0xff]  ;;  %v3092_v19 = vld [vmem:[#allocation4 + $0x2a8] sm:$0xff] }
 0x670   :  { %v2584_v56 = vadd.f32 %v2583_v3, %v2582_v38  ;;  %v3078_v38 = vld [vmem:[#allocation4 + $0x238] sm:$0xff]  ;;  %v3080_v3 = vld [vmem:[#allocation4 + $0x248] sm:$0xff] }
 0x671   :  { %v5673_v6 = vpop.eup %5672  ;;  %v6916_v13 = vpack.c.bf16 %v3083_v21, %v3080_v3  ;;  %v3091_v21 = vld [vmem:[#allocation4 + $0x2a0] sm:$0xff] }
 0x672   :  { %v2794_v35 = vadd.f32 1.0, %v5673_v6  ;;  %v6879_v62 = vsel %vm2592_vm4, %v2584_v56, %v6739_v8  ;;  %v2594_v39 = vsel %vm2592_vm4, %v2584_v56, 0.0  ;;  %v6891_v8 = vpack.c.bf16 %v3071_v23, %v3068_v36  ;;  %v5675_v54 = vpop.eup %5674  ;;  %v2600_v36 = vld [vmem:[#allocation9 + $0x40] sm:$0xff]  ;;  %v3086_v23 = vld [vmem:[#allocation4 + $0x278] sm:$0xff] }
 0x673   :  { %2596 = vst [vmem:[#allocation11 + $0x28] sm:$0xff] %v2594_v39  ;;  %2941 = vmatmul.mubr.f32.vlgmr.msra.gmra.mrb[24].mxu0 %v6879_v62  ;;  %4544 = vmatmul.mubr.f32.vlgmr.msra.gmra.mrb[24].mxu1 %v6879_v62  ;;  %v2801_v5 = vadd.f32 1.0, %v5675_v54  ;;  %v6910_v56 = vpack.c.bf16 %v3078_v38, %v3075_v43  ;;  %v2804_v6 = vadd.f32 %v6643_v57, %v6869_v52  ;;  %v3087_v54 = vld [vmem:[#allocation4 + $0x280] sm:$0xff] }
 0x674   :  { %5676 = vrcp.f32 %v2794_v35  ;;  %5382 = vmatpush1.bf16.msra.mxu0 %v6872_v24  ;;  %5413 = vmatpush3.bf16.msra.mxu1 %v6874_v18  ;;  %v3084_v35 = vld [vmem:[#allocation4 + $0x268] sm:$0xff]  ;;  %v6920_v57 = vpack.c.bf16 %v3082_v58, %v3079_v40  ;;  %v6926_v33 = vpack.c.bf16 %v3089_v53, %v3086_v23  ;;  %v3095_v43 = vld [vmem:[#allocation4 + $0x2c0] sm:$0xff]  ;;  %v6930_v38 = vpack.c.bf16 %v3088_v46, %v3085_v29  ;;  %v3094_v40 = vld [vmem:[#allocation4 + $0x2b8] sm:$0xff] }
 0x675   :  { %5384 = vmatprep.subr.bf16.mxu0 %v6876_v27  ;;  %5414 = vmatprep.subr.bf16.mxu1 %v5851_v0  ;;  %5678 = vrcp.f32 %v2801_v5  ;;  %v6922_v52 = vpack.c.bf16 %v3084_v35, %v3081_v7  ;;  %v6932_v3 = vpack.c.bf16 %v3090_v15, %v3087_v54  ;;  %v6936_v5 = vpack.c.bf16 %v3095_v43, %v3092_v19  ;;  %v3096_v58 = vld [vmem:[#allocation4 + $0x2c8] sm:$0xff]  ;;  %v3098_v7 = vld [vmem:[#allocation4 + $0x2d8] sm:$0xff]  ;;  %v3101_v35 = vld [vmem:[#allocation4 + $0x2f0] sm:$0xff] }
 0x676   :  { %3167 = vmatprep.mubr.f32.mxu0 %v7100_v1  ;;  %4578 = vmatprep.mubr.msk.f32.mxu1 %vm5853_vm0, %v7100_v1  ;;  %v3097_v23 = vld [vmem:[#allocation4 + $0x2d0] sm:$0xff]  ;;  %v3100_v29 = vld [vmem:[#allocation4 + $0x2e8] sm:$0xff]  ;;  %v3102_v46 = vld [vmem:[#allocation4 + $0x2f8] sm:$0xff] }
 0x677   :  { %v6950_v54 = vpack.c.bf16 %v3100_v29, %v3097_v23  ;;  %v3053_v29 = vld [vmem:[#allocation9 + $0x20] sm:$0xff] }
 0x678   :  { %5386 = vmatpush1.bf16.msra.mxu0 %v6885_v4  ;;  %5416 = vmatpush3.bf16.msra.mxu1 %v6887_v2 }
 0x679   :  { %5388 = vmatprep.subr.bf16.mxu0 %v6891_v8  ;;  %5417 = vmatprep.subr.bf16.mxu1 %v5851_v0 }
 0x67c   :  { %5390 = vmatpush1.bf16.msra.mxu0 %v6898_v45  ;;  %5419 = vmatpush3.bf16.msra.mxu1 %v6900_v11 }
 0x67d   :  { %5392 = vmatprep.subr.bf16.mxu0 %v6904_v60  ;;  %5420 = vmatprep.subr.bf16.mxu1 %v5851_v0 }
 0x67e   :  { %v5677_v39 = vpop.eup %5676 }
 0x67f   :  { %v2805_v51 = vmul.f32 %v5677_v39, %v2804_v6  ;;  %v3093_v6 = vld [vmem:[#allocation4 + $0x2b0] sm:$0xff]  ;;  %v6940_v39 = vpack.c.bf16 %v3094_v40, %v3091_v21  ;;  %v5679_v53 = vpop.eup %5678 }
 0x680   :  { %5394 = vmatpush1.bf16.msra.mxu0 %v6908_v16  ;;  %5422 = vmatpush3.bf16.msra.mxu1 %v6910_v56  ;;  %v2808_v19 = vsub.f32 1.0, %v5679_v53  ;;  %v2810_v40 = vmul.f32 %v5679_v53, %v6780_v32 }
 0x681   :  { %v2806_v55 = vadd.f32 %v2805_v51, %v2600_v36  ;;  %5396 = vmatprep.subr.bf16.mxu0 %v6916_v13  ;;  %5423 = vmatprep.subr.bf16.mxu1 %v5851_v0  ;;  %v6942_v36 = vpack.c.bf16 %v3096_v58, %v3093_v6  ;;  %v6946_v51 = vpack.c.bf16 %v3101_v35, %v3098_v7  ;;  %v2818_v6 = vpop.permute.xlu1 %2817 }
 0x682   :  { %vm2819_vm5 = vcmp.eq.s32.totalorder %v2818_v6, 1 }
 0x683   :  { %5680 = vtanh.f32 %v2806_v55  ;;  %v3099_v55 = vld [vmem:[#allocation4 + $0x2e0] sm:$0xff] }
 0x684   :  { %5398 = vmatpush1.bf16.msra.mxu0 %v6920_v57  ;;  %5425 = vmatpush3.bf16.msra.mxu1 %v6922_v52  ;;  %v6952_v15 = vpack.c.bf16 %v3102_v46, %v3099_v55 }
 0x685   :  { %5400 = vmatprep.subr.bf16.mxu0 %v6926_v33  ;;  %5426 = vmatprep.subr.bf16.mxu1 %v5851_v0 }
 0x688   :  { %5402 = vmatpush1.bf16.msra.mxu0 %v6930_v38  ;;  %5428 = vmatpush3.bf16.msra.mxu1 %v6932_v3 }
 0x689   :  { %5404 = vmatprep.subr.bf16.mxu0 %v6936_v5  ;;  %5429 = vmatprep.subr.bf16.mxu1 %v5851_v0 }
 0x68c   :  { %5406 = vmatpush1.bf16.msra.mxu0 %v6940_v39  ;;  %5431 = vmatpush3.bf16.msra.mxu1 %v6942_v36 }
 0x68d   :  { %v5681_v43 = vpop.eup %5680  ;;  %5408 = vmatprep.subr.bf16.mxu0 %v6946_v51  ;;  %5432 = vmatprep.subr.bf16.mxu1 %v5851_v0 }
 0x68e   :  { %v2809_v21 = vmul.f32 %v5681_v43, %v2808_v19 }
 0x690   :  { %5410 = vmatpush1.bf16.msra.mxu0 %v6950_v54  ;;  %5434 = vmatpush3.bf16.msra.mxu1 %v6952_v15  ;;  %v2811_v58 = vadd.f32 %v2810_v40, %v2809_v21 }
 0x691   :  { %5436 = vmatprep.subr.bf16.mxu0 %v6789_v30  ;;  %5467 = vmatprep.subr.bf16.mxu1 %v5851_v0  ;;  %v3287_v30 = vld [vmem:[#allocation4 + $0x28] sm:$0xff] }
 0x692   :  { %v6962_v7 = vsel %vm2819_vm5, %v2811_v58, %v6780_v32  ;;  %v2821_v35 = vsel %vm2819_vm5, %v2811_v58, 0.0  ;;  %v3284_v32 = vld [vmem:[#allocation4 + $0x10] sm:$0xff] }
 0x693   :  { %2823 = vst [vmem:[#allocation12 + $0x10] sm:$0xff] %v2821_v35  ;;  %3168 = vmatmul.mubr.f32.vlgmr.msra.gmra.mrb[26].mxu0 %v6962_v7  ;;  %4579 = vmatmul.mubr.f32.vlgmr.msra.gmra.mrb[26].mxu1 %v6962_v7 }
 0x694   :  { %5438 = vmatpush1.bf16.msra.mxu0 %v6791_v42  ;;  %3394 = vmatprep.mubr.f32.mxu0 %v7100_v1  ;;  %v5468_v42 = vpack.c.bf16 %v3287_v30, %v3284_v32  ;;  %v3045_v30 = vpop.permute.xlu0 %3044 }
 0x695   :  { %5440 = vmatprep.subr.bf16.mxu0 %v6795_v17  ;;  %4613 = vmatprep.mubr.msk.f32.mxu1 %vm5853_vm0, %v7100_v1  ;;  %v2825_v17 = vld [vmem:[#allocation6 + $0x90] sm:$0xff]  ;;  %vm3046_vm6 = vcmp.eq.s32.totalorder %v3045_v30, 1 }
 0x696   :  { %5469 = vmatpush3.bf16.msra.mxu1 %v5468_v42 }
 0x697   :  { %5470 = vmatprep.subr.bf16.mxu1 %v5851_v0 }
 0x698   :  { %5442 = vmatpush1.bf16.msra.mxu0 %v6797_v10 }
 0x699   :  { %5444 = vmatprep.subr.bf16.mxu0 %v6804_v20 }
 0x69a   :  { %5472 = vmatpush3.bf16.msra.mxu1 %v6800_v61 }
 0x69b   :  { %5473 = vmatprep.subr.bf16.mxu1 %v5851_v0 }
 0x69c   :  { %5446 = vmatpush1.bf16.msra.mxu0 %v6807_v59  ;;  %v2826_v59 = vld [vmem:[#allocation6 + $0x98] sm:$0xff] }
 0x69d   :  { %5448 = vmatprep.subr.bf16.mxu0 %v6814_v50 }
 0x69e   :  { %5475 = vmatpush3.bf16.msra.mxu1 %v6810_v26 }
 0x69f   :  { %5476 = vmatprep.subr.bf16.mxu1 %v5851_v0 }
 0x6a0   :  { %5450 = vmatpush1.bf16.msra.mxu0 %v6817_v31 }
 0x6a1   :  { %5452 = vmatprep.subr.bf16.mxu0 %v6824_v48 }
 0x6a2   :  { %5478 = vmatpush3.bf16.msra.mxu1 %v6820_v28 }
 0x6a3   :  { %5479 = vmatprep.subr.bf16.mxu1 %v5851_v0 }
 0x6a4   :  { %5454 = vmatpush1.bf16.msra.mxu0 %v6827_v14 }
 0x6a5   :  { %5456 = vmatprep.subr.bf16.mxu0 %v6834_v12 }
 0x6a6   :  { %5481 = vmatpush3.bf16.msra.mxu1 %v6830_v34 }
 0x6a7   :  { %5482 = vmatprep.subr.bf16.mxu1 %v5851_v0 }
 0x6a8   :  { %5458 = vmatpush1.bf16.msra.mxu0 %v6837_v63 }
 0x6a9   :  { %5460 = vmatprep.subr.bf16.mxu0 %v6844_v41 }
 0x6aa   :  { %5484 = vmatpush3.bf16.msra.mxu1 %v6840_v44  ;;  %v7003_v44 = vld [vmem:[%s7094_s3] ss:$0 sm:$0xff] }
 0x6ab   :  { %5485 = vmatprep.subr.bf16.mxu1 %v5851_v0 }
 0x6ac   :  { %5462 = vmatpush1.bf16.msra.mxu0 %v6847_v49 }
 0x6ad   :  { %5464 = vmatprep.subr.bf16.mxu0 %v6854_v22 }
 0x6ae   :  { %5487 = vmatpush3.bf16.msra.mxu1 %v6850_v47  ;;  %v2827_v47 = vld [vmem:[#allocation6 + $0xa0] sm:$0xff] }
 0x6af   :  { %5488 = vmatprep.subr.bf16.mxu1 %v5851_v0 }
 0x6b0   :  { %5466 = vmatpush1.bf16.msra.mxu0 %v6857_v9  ;;  %v3052_v9 = vld [vmem:[#allocation9 + $0x18] sm:$0xff] }
 0x6b1   :  { %5492 = vmatprep.subr.bf16.mxu0 %v6864_v37 }
 0x6b2   :  { %5490 = vmatpush3.bf16.msra.mxu1 %v6860_v25 }
 0x6b3   :  { %5523 = vmatprep.subr.bf16.mxu1 %v5851_v0 }
 0x746   :  { %v2942_v10 = vpop.f32.mrb[24].mxu0  ;;  %v3013_v61 = vpop.f32.mrb[24].mxu1 }
 0x747   :  { %v3017_v20 = vadd.f32 %v2942_v10, %v2825_v17  ;;  %v2944_v26 = vpop.f32.mrb[25].mxu0  ;;  %v4545_v50 = vpop.f32.mrb[25].mxu1  ;;  %v3031_v41 = vadd.f32 %v7003_v44, %v3013_v61 }
 0x748   :  { %v3024_v28 = vadd.f32 %v2944_v26, %v2826_v59 }
 0x749   :  { %v3806_v31 = vmul.f32 -1.442695, %v3017_v20 }
 0x74a   :  { %v3807_v48 = vmul.f32 -1.442695, %v3024_v28 }
 0x74b   :  { %5682 = vpow2.f32 %v3806_v31 }
 0x74c   :  { %5684 = vpow2.f32 %v3807_v48 }
 0x755   :  { %v5683_v14 = vpop.eup %5682 }
 0x756   :  { %v3021_v34 = vadd.f32 1.0, %v5683_v14  ;;  %v5685_v12 = vpop.eup %5684  ;;  %v3281_v14 = vld [vmem:[#allocation6 + $0xb8] sm:$0xff] }
 0x757   :  { %v3028_v63 = vadd.f32 1.0, %v5685_v12  ;;  %v3505_v12 = vld [vmem:[#allocation9] sm:$0xff] }
 0x758   :  { %5686 = vrcp.f32 %v3021_v34 }
 0x759   :  { %5688 = vrcp.f32 %v3028_v63 }
 0x762   :  { %v5687_v49 = vpop.eup %5686 }
 0x763   :  { %v3032_v22 = vmul.f32 %v5687_v49, %v3031_v41  ;;  %v5689_v21 = vpop.eup %5688 }
 0x764   :  { %v3035_v6 = vsub.f32 1.0, %v5689_v21  ;;  %v3037_v32 = vmul.f32 %v5689_v21, %v6879_v62 }
 0x765   :  { %v3033_v25 = vadd.f32 %v3032_v22, %v2827_v47  ;;  %v3506_v22 = vld [vmem:[#allocation9 + $0x8] sm:$0xff] }
 0x766   :  { %v3169_v37 = vpop.f32.mrb[26].mxu0  ;;  %v3240_v23 = vpop.f32.mrb[26].mxu1 }
 0x767   :  { %5690 = vtanh.f32 %v3033_v25  ;;  %v3244_v53 = vadd.f32 %v3169_v37, %v3052_v9  ;;  %v3171_v55 = vpop.f32.mrb[27].mxu0  ;;  %v4580_v46 = vpop.f32.mrb[27].mxu1 }
 0x768   :  { %v3251_v43 = vadd.f32 %v3171_v55, %v3053_v29  ;;  %v3499_v46 = vpop.permute.xlu0 %3498 }
 0x769   :  { %v3808_v19 = vmul.f32 -1.442695, %v3244_v53  ;;  %vm3500_vm7 = vcmp.eq.s32.totalorder %v3499_v46, 1 }
 0x76a   :  { %v3809_v40 = vmul.f32 -1.442695, %v3251_v43 }
 0x76b   :  { %5692 = vpow2.f32 %v3808_v19 }
 0x76c   :  { %5694 = vpow2.f32 %v3809_v40 }
 0x771   :  { %v5691_v58 = vpop.eup %5690 }
 0x772   :  { %v3036_v35 = vmul.f32 %v5691_v58, %v3035_v6 }
 0x774   :  { %v3038_v42 = vadd.f32 %v3037_v32, %v3036_v35 }
 0x775   :  { %v5693_v17 = vpop.eup %5692 }
 0x776   :  { %v3248_v10 = vadd.f32 1.0, %v5693_v17  ;;  %v7008_v61 = vsel %vm3046_vm6, %v3038_v42, %v6879_v62  ;;  %v3048_v20 = vsel %vm3046_vm6, %v3038_v42, 0.0  ;;  %v5695_v62 = vpop.eup %5694 }
 0x777   :  { %3050 = vst [vmem:[#allocation11 + $0x30] sm:$0xff] %v3048_v20  ;;  %3395 = vmatmul.mubr.f32.vlgmr.msra.gmra.mrb[28].mxu0 %v7008_v61  ;;  %4614 = vmatmul.mubr.f32.vlgmr.msra.gmra.mrb[28].mxu1 %v7008_v61 }
 0x778   :  { %5696 = vrcp.f32 %v3248_v10  ;;  %5494 = vmatpush1.bf16.msra.mxu0 %v6872_v24  ;;  %5525 = vmatpush3.bf16.msra.mxu1 %v6874_v18  ;;  %v3255_v24 = vadd.f32 1.0, %v5695_v62  ;;  %v7028_v18 = vld [vmem:[%s7094_s3 + $0x1] ss:$0 sm:$0xff]  ;;  %s5855_s3 = smov [#allocation11]  }
 0x779   :  { %5496 = vmatprep.subr.bf16.mxu0 %v6876_v27  ;;  %5526 = vmatprep.subr.bf16.mxu1 %v5851_v0  ;;  %s3736_s1 = sshll.u32 %s5855_s3, 4  ;;  %s3737_s1 = int_to_ptr.vmem [resolvable:$true] %s3736_s1 }
 0x77a   :  { %3620 = vmatprep.mubr.f32.mxu0 %v7100_v1  ;;  %4648 = vmatprep.mubr.msk.f32.mxu1 %vm5853_vm0, %v7100_v1  ;;  %v3258_v1 = vadd.f32 %v7028_v18, %v3240_v23  ;;  %5698 = vrcp.f32 %v3255_v24  ;;  %s5792_s21 = scalar_lea.vmem %s3737_s1, 1024  ;;  %p5797_p11 = scmp.lt.s32.totalorder %s3737_s1, %s3737_s1 }
 0x77b   :  { %p5793_p10 = scmp.ne.s32.totalorder %s3737_s1, %s5792_s21  ;;  %p5798_p12 = scmp.lt.s32.totalorder %s5792_s21, %s5792_s21 }
 0x77c   :  { %5498 = vmatpush1.bf16.msra.mxu0 %v6885_v4  ;;  %5528 = vmatpush3.bf16.msra.mxu1 %v6887_v2  ;;  %v3054_v4 = vld [vmem:[#allocation9 + $0x28] sm:$0xff] }
 0x77d   :  { %5500 = vmatprep.subr.bf16.mxu0 %v6891_v8  ;;  %5529 = vmatprep.subr.bf16.mxu1 %v5851_v0  ;;  %p5799_p13 = por %p5798_p12, %p5797_p11 }
 0x77f   :  { %p5800_p0 = pnand %p5799_p13, %p5793_p10 }
 0x780   :  { %5502 = vmatpush1.bf16.msra.mxu0 %v6898_v45  ;;  %5531 = vmatpush3.bf16.msra.mxu1 %v6900_v11 }
 0x781   :  { %5504 = vmatprep.subr.bf16.mxu0 %v6904_v60  ;;  %5532 = vmatprep.subr.bf16.mxu1 %v5851_v0 }
 0x782   :  { %v5697_v27 = vpop.eup %5696 }
 0x783   :  { %v3259_v2 = vmul.f32 %v5697_v27, %v3258_v1 }
 0x784   :  { %5506 = vmatpush1.bf16.msra.mxu0 %v6908_v16  ;;  %5534 = vmatpush3.bf16.msra.mxu1 %v6910_v56  ;;  %v5699_v45 = vpop.eup %5698 }
 0x785   :  { %v3260_v8 = vadd.f32 %v3259_v2, %v3054_v4  ;;  %5508 = vmatprep.subr.bf16.mxu0 %v6916_v13  ;;  %5535 = vmatprep.subr.bf16.mxu1 %v5851_v0  ;;  %v3262_v11 = vsub.f32 1.0, %v5699_v45  ;;  %v3264_v56 = vmul.f32 %v5699_v45, %v6962_v7  ;;  %v3272_v13 = vpop.permute.xlu1 %3271 }
 0x786   :  { %vm3273_vm0 = vcmp.eq.s32.totalorder %v3272_v13, 1 }
 0x787   :  { %5700 = vtanh.f32 %v3260_v8 }
 0x788   :  { %5510 = vmatpush1.bf16.msra.mxu0 %v6920_v57  ;;  %5537 = vmatpush3.bf16.msra.mxu1 %v6922_v52 }
 0x789   :  { %5512 = vmatprep.subr.bf16.mxu0 %v6926_v33  ;;  %5538 = vmatprep.subr.bf16.mxu1 %v5851_v0 }
 0x78c   :  { %5514 = vmatpush1.bf16.msra.mxu0 %v6930_v38  ;;  %5540 = vmatpush3.bf16.msra.mxu1 %v6932_v3 }
 0x78d   :  { %5516 = vmatprep.subr.bf16.mxu0 %v6936_v5  ;;  %5541 = vmatprep.subr.bf16.mxu1 %v5851_v0 }
 0x790   :  { %5518 = vmatpush1.bf16.msra.mxu0 %v6940_v39  ;;  %5543 = vmatpush3.bf16.msra.mxu1 %v6942_v36  ;;  %v3280_v39 = vld [vmem:[#allocation6 + $0xb0] sm:$0xff] }
 0x791   :  { %v5701_v60 = vpop.eup %5700  ;;  %5520 = vmatprep.subr.bf16.mxu0 %v6946_v51  ;;  %5544 = vmatprep.subr.bf16.mxu1 %v5851_v0  ;;  %v3279_v0 = vld [vmem:[#allocation6 + $0xa8] sm:$0xff] }
 0x792   :  { %v3263_v16 = vmul.f32 %v5701_v60, %v3262_v11 }
 0x794   :  { %5522 = vmatpush1.bf16.msra.mxu0 %v6950_v54  ;;  %5546 = vmatpush3.bf16.msra.mxu1 %v6952_v15  ;;  %v3265_v57 = vadd.f32 %v3264_v56, %v3263_v16 }
 0x796   :  { %v7053_v52 = vsel %vm3273_vm0, %v3265_v57, %v6962_v7  ;;  %v3275_v33 = vsel %vm3273_vm0, %v3265_v57, 0.0 }
 0x797   :  { %3277 = vst [vmem:[#allocation12 + $0x8] sm:$0xff] %v3275_v33  ;;  %3621 = vmatmul.mubr.f32.vlgmr.msra.gmra.mrb[30].mxu0 %v7053_v52  ;;  %4649 = vmatmul.mubr.f32.vlgmr.msra.gmra.mrb[30].mxu1 %v7053_v52 }
 0x84a   :  { %v3396_v38 = vpop.f32.mrb[28].mxu0  ;;  %v3467_v3 = vpop.f32.mrb[28].mxu1 }
 0x84b   :  { %v3471_v5 = vadd.f32 %v3396_v38, %v3279_v0  ;;  %v3398_v36 = vpop.f32.mrb[29].mxu0  ;;  %v4615_v51 = vpop.f32.mrb[29].mxu1  ;;  %v3485_v28 = vadd.f32 %v7003_v44, %v3467_v3 }
 0x84c   :  { %v3478_v15 = vadd.f32 %v3398_v36, %v3280_v39 }
 0x84d   :  { %v3810_v54 = vmul.f32 -1.442695, %v3471_v5 }
 0x84e   :  { %v3811_v59 = vmul.f32 -1.442695, %v3478_v15 }
 0x84f   :  { %5702 = vpow2.f32 %v3810_v54 }
 0x850   :  { %5704 = vpow2.f32 %v3811_v59 }
 0x859   :  { %v5703_v7 = vpop.eup %5702 }
 0x85a   :  { %v3475_v26 = vadd.f32 1.0, %v5703_v7  ;;  %v5705_v50 = vpop.eup %5704 }
 0x85b   :  { %v3482_v31 = vadd.f32 1.0, %v5705_v50 }
 0x85c   :  { %5706 = vrcp.f32 %v3475_v26 }
 0x85d   :  { %5708 = vrcp.f32 %v3482_v31 }
 0x866   :  { %v5707_v48 = vpop.eup %5706 }
 0x867   :  { %v3486_v34 = vmul.f32 %v5707_v48, %v3485_v28  ;;  %v5709_v53 = vpop.eup %5708 }
 0x868   :  { %v3489_v55 = vsub.f32 1.0, %v5709_v53  ;;  %v3491_v43 = vmul.f32 %v5709_v53, %v7008_v61 }
 0x869   :  { %v3487_v63 = vadd.f32 %v3486_v34, %v3281_v14 }
 0x86a   :  { %v3622_v41 = vpop.f32.mrb[30].mxu0  ;;  %v3693_v49 = vpop.f32.mrb[30].mxu1 }
 0x86b   :  { %5710 = vtanh.f32 %v3487_v63  ;;  %v3697_v47 = vadd.f32 %v3622_v41, %v3505_v12  ;;  %v3624_v9 = vpop.f32.mrb[31].mxu0  ;;  %v4650_v25 = vpop.f32.mrb[31].mxu1 }
 0x86c   :  { %v3704_v23 = vadd.f32 %v3624_v9, %v3506_v22 }
 0x86d   :  { %v3812_v37 = vmul.f32 -1.442695, %v3697_v47 }
 0x86e   :  { %v3813_v29 = vmul.f32 -1.442695, %v3704_v23 }
 0x86f   :  { %5712 = vpow2.f32 %v3812_v37 }
 0x870   :  { %5714 = vpow2.f32 %v3813_v29 }
 0x875   :  { %v5711_v44 = vpop.eup %5710 }
 0x876   :  { %v3490_v19 = vmul.f32 %v5711_v44, %v3489_v55 }
 0x878   :  { %v3492_v21 = vadd.f32 %v3491_v43, %v3490_v19 }
 0x879   :  { %v5713_v40 = vpop.eup %5712 }
 0x87a   :  { %v3502_v6 = vsel %vm3500_vm7, %v3492_v21, 0.0  ;;  %v3701_v58 = vadd.f32 1.0, %v5713_v40 }
 0x87b   :  { %3504 = vst [vmem:[#allocation11 + $0x38] sm:$0xff] %v3502_v6 }
 0x87c   :  { %5716 = vrcp.f32 %v3701_v58 }
 0x87d   :  { %5803 = shalt.err (!%p5800_p0)
}
 0x87e   :  { %s5804_s24 = scalar_lea.hbm %s7096_s5, 1024 }
 0x87f   :  { %p5805_p1 = scmp.ne.s32.totalorder %s7096_s5, %s5804_s24  ;;  %p5808_p2 = scmp.lt.u32.totalorder %s5804_s24, %s7096_s5 }
 0x881   :  { %p5810_p3 = pnand %p5808_p2, %p5805_p1 }
 0x883   :  { %5813 = shalt.err (!%p5810_p3)
}
 0x884   :  { %s5856_s29 = smov 128   ;;  %s5857_s30 = smov 8   ;;  %v5715_v35 = vpop.eup %5714  ;;  %v3711_v30 = vadd.f32 %v7028_v18, %v3693_v49  ;;  %v3507_v17 = vld [vmem:[#allocation9 + $0x10] sm:$0xff]  ;;  %v3724_v1 = vpop.permute.xlu1 %3723 }
 0x885   :  { %3742 = dma.vmem_to_hbm [thread:$0]  %s3737_s1, 1024, %s7096_s5, [#allocation8], %s5856_s29, %s5856_s29, %s5857_s30   ;;  %v3708_v32 = vadd.f32 1.0, %v5715_v35  ;;  %vm3725_vm8 = vcmp.eq.s32.totalorder %v3724_v1, 1 }
 0x886   :  { %v5717_v42 = vpop.eup %5716  ;;  %s5858_s8 = smov [#allocation12]  }
 0x887   :  { %v3712_v10 = vmul.f32 %v5717_v42, %v3711_v30  ;;  %5718 = vrcp.f32 %v3708_v32  ;;  %s3752_s4 = sshll.u32 %s5858_s8, 4  ;;  %s3753_s4 = int_to_ptr.vmem [resolvable:$true] %s3752_s4 }
 0x888   :  { %s5814_s5 = scalar_lea.vmem %s3753_s4, 1024  ;;  %p5819_p5 = scmp.lt.s32.totalorder %s3753_s4, %s3753_s4 }
 0x889   :  { %v3713_v61 = vadd.f32 %v3712_v10, %v3507_v17  ;;  %p5815_p4 = scmp.ne.s32.totalorder %s3753_s4, %s5814_s5  ;;  %p5820_p6 = scmp.lt.s32.totalorder %s5814_s5, %s5814_s5 }
 0x88b   :  { %5720 = vtanh.f32 %v3713_v61  ;;  %p5821_p7 = por %p5820_p6, %p5819_p5 }
 0x88d   :  { %p5822_p8 = pnand %p5821_p7, %p5815_p4 }
 0x891   :  { %v5719_v20 = vpop.eup %5718 }
 0x892   :  { %v3715_v62 = vsub.f32 1.0, %v5719_v20  ;;  %v3717_v4 = vmul.f32 %v5719_v20, %v7053_v52 }
 0x895   :  { %v5721_v24 = vpop.eup %5720 }
 0x896   :  { %v3716_v27 = vmul.f32 %v5721_v24, %v3715_v62 }
 0x898   :  { %v3718_v2 = vadd.f32 %v3717_v4, %v3716_v27 }
 0x89a   :  { %v3727_v8 = vsel %vm3725_vm8, %v3718_v2, 0.0 }
 0x89b   :  { %3728 = vst [vmem:[#allocation12] sm:$0xff] %v3727_v8 }
 0x89c   :  { %5825 = shalt.err (!%p5822_p8)
}
 0x89d   :  { %s5826_s10 = scalar_lea.hbm %s7097_s6, 1024 }
 0x89e   :  { %p5827_p9 = scmp.ne.s32.totalorder %s7097_s6, %s5826_s10  ;;  %p5830_p10 = scmp.lt.u32.totalorder %s5826_s10, %s7097_s6 }
 0x8a0   :  { %p5832_p11 = pnand %p5830_p10, %p5827_p9 }
 0x8a2   :  { %5835 = shalt.err (!%p5832_p11)
}
 0x8a3   :  { %3758 = dma.vmem_to_hbm [thread:$0]  %s3753_s4, 1024, %s7097_s6, [#allocation13], %s5856_s29, %s5856_s29, %s5857_s30  }
 0x8a4   :  { %5842 = dma.done.wait [#allocation8], 1024  }
 0x8a5   :  { %5843 = vsyncadd [#allocation8], 4294966272 }
 0x8a6   :  { %5844 = dma.done.wait [#allocation13], 1024  }
 0x8a7   :  { %5845 = vsyncadd [#allocation13], 4294966272 }
 0x8a8   :  { %3765 = vsyncpa [#allocation7], 1 }
 0x8a9   :  { %3766 = vsyncpa [#allocation10], 1 }
 0x8aa   :  { %3767 = vsyncpa [#allocation8], 1 }
 0x8ab   :  { %3768 = vsyncpa [#allocation13], 1 }
 0x8ac   :  { %3769 = vsyncmov [#allocation5] }
 0x8af   :  { %s3770_s17 = vpop.sfrf %3769 }
 0x8b0   :  { %p3814_p12 = scmp.ne.s32.totalorder %s3770_s17, 0 }
 0x8b2   :  { %3774 = shalt.err (%p3814_p12)  }

</bundles_post_ra>
